<compile_context>
chip_gen: v5e
topology: v5e:2x2
jax: 0.10.0
libtpu: 0.0.40
codegen_flags: <defaults>
</compile_context>

<pallas_src>
import functools
import math

import numpy as np
import jax
import jax.numpy as jnp
from jax.experimental import pallas as pl
from jax.experimental.pallas import tpu as pltpu

LANE = 128
SUB = 8


def _round_up(x, m):
    return ((x + m - 1) // m) * m


def _conv_out(h, k, s):
    return (h - k) // s + 1


# ------------------------------ fused kernel ------------------------------- #

def _fused_dqn_kernel(p1_ref, w1_ref, b1_ref,
                      s2_ref, w2_ref, b2_ref,
                      s3_ref, w3_ref, b3_ref,
                      wf1_ref, bf1_ref, wf2_ref, bf2_ref,
                      q_ref):
    dot = functools.partial(jnp.dot, preferred_element_type=jnp.float32)

    # conv1: precomputed im2col patches (M1, K1) @ (K1, 128) + bias, ReLU.
    y1 = jnp.maximum(dot(p1_ref[...], w1_ref[...]) + b1_ref[...], 0.0)

    # conv2: per-tap (ki,kj) 0/1 row-selection matmul + weight matmul, accumulated.
    acc2 = jnp.zeros((s2_ref.shape[1], w2_ref.shape[2]), jnp.float32)
    for k in range(s2_ref.shape[0]):
        acc2 = acc2 + dot(dot(s2_ref[k], y1), w2_ref[k])
    y2 = jnp.maximum(acc2 + b2_ref[...], 0.0)

    # conv3 (output spatial collapses to 1x1, rows = batch).
    acc3 = jnp.zeros((s3_ref.shape[1], w3_ref.shape[2]), jnp.float32)
    for k in range(s3_ref.shape[0]):
        acc3 = acc3 + dot(dot(s3_ref[k], y2), w3_ref[k])
    y3 = jnp.maximum(acc3 + b3_ref[...], 0.0)

    # fc1 + ReLU, fc2 — bias/ReLU fused on the accumulator before the store.
    h = jnp.maximum(dot(y3, wf1_ref[...]) + bf1_ref[...], 0.0)
    q_ref[...] = dot(h, wf2_ref[...]) + bf2_ref[...]


# ------------------------------ input im2col ------------------------------- #
# Single cheap XLA gather on the raw input; everything downstream is in-kernel.

def _im2col(x, kh, kw, stride):
    """x: (N, C, H, W) -> patches (N*OH*OW, C*KH*KW), feature order (C, KH, KW)."""
    n, c, h, w = x.shape
    oh = _conv_out(h, kh, stride)
    ow = _conv_out(w, kw, stride)
    cols = []
    for i in range(kh):
        for j in range(kw):
            cols.append(x[:, :, i:i + stride * oh:stride, j:j + stride * ow:stride])
    p = jnp.stack(cols, axis=0)               # (KH*KW, N, C, OH, OW)
    p = jnp.transpose(p, (1, 3, 4, 2, 0))     # (N, OH, OW, C, KH*KW)
    return p.reshape(n * oh * ow, c * kh * kw), oh, ow


# --------------------------- one-time param prep ---------------------------- #

def _selection_matrices(batch, ih, iw, kh, kw, stride, m_out_pad, m_in_pad):
    """0/1 matrices S[k], S[k][m_out, m_in]=1 selects the input row feeding
    output row m_out for conv tap k = ki*kw + kj. Rows are ordered (n, oh, ow)."""
    oh, ow = _conv_out(ih, kh, stride), _conv_out(iw, kw, stride)
    s = np.zeros((kh * kw, m_out_pad, m_in_pad), np.float32)
    for ki in range(kh):
        for kj in range(kw):
            k = ki * kw + kj
            for b in range(batch):
                for i in range(oh):
                    for j in range(ow):
                        mo = (b * oh + i) * ow + j
                        mi = (b * ih + (stride * i + ki)) * iw + (stride * j + kj)
                        s[k, mo, mi] = 1.0
    return jnp.asarray(s)


def _stack_conv_weight(w, c_pad, oc_pad):
    """(OC, IC, KH, KW) -> (KH*KW, c_pad, oc_pad), zero-padded."""
    oc, ic, kh, kw = w.shape
    wt = jnp.transpose(w, (2, 3, 1, 0)).reshape(kh * kw, ic, oc)
    return jnp.pad(wt, ((0, 0), (0, c_pad - ic), (0, oc_pad - oc)))


def _pad_bias(b, n_pad):
    return jnp.pad(b, (0, n_pad - b.shape[0])).reshape(1, n_pad)


def prepare_params(params, batch, in_channels, hw, n_actions):
    """One-time transform: pre-transposed, lane-dense / sublane-aligned kernel
    buffers + conv2/conv3 row-selection matrices. Runs once, not per forward."""
    oh1 = _conv_out(hw, 8, 4)
    oh2 = _conv_out(oh1, 4, 2)
    oh3 = _conv_out(oh2, 3, 1)
    # This fused layout assumes the last conv collapses spatial to 1x1 (true
    # for the 36x36 test input); the flatten is then just the channel axis.
    assert oh3 == 1, "fused kernel assumes conv3 output spatial == 1x1"

    m2_pad = _round_up(batch * oh2 * oh2, SUB)
    m3_pad = _round_up(batch * oh3 * oh3, SUB)
    c1p, c2p, c3p = _round_up(32, LANE), _round_up(64, LANE), _round_up(64, LANE)
    nap = _round_up(n_actions, LANE)
    conv_out_size = 64 * oh3 * oh3

    kp = {}
    # conv1 weight pre-reshaped to (K1=(c,ki,kj), OC) and lane-padded.
    kp["w1"] = jnp.pad(params["cw1"].reshape(32, in_channels * 8 * 8).T,
                       ((0, 0), (0, c1p - 32)))
    kp["b1"] = _pad_bias(params["cb1"], c1p)
    # conv2 / conv3: per-tap weights + in-kernel row-selection matrices.
    kp["s2"] = _selection_matrices(batch, oh1, oh1, 4, 4, 2, m2_pad, batch * oh1 * oh1)
    kp["w2"] = _stack_conv_weight(params["cw2"], c1p, c2p)
    kp["b2"] = _pad_bias(params["cb2"], c2p)
    kp["s3"] = _selection_matrices(batch, oh2, oh2, 3, 3, 1, m3_pad, m2_pad)
    kp["w3"] = _stack_conv_weight(params["cw3"], c2p, c3p)
    kp["b3"] = _pad_bias(params["cb3"], c3p)
    # fc layers pre-transposed to (K, N) and zero-padded.
    kp["wf1"] = jnp.pad(params["fw1"].T, ((0, c3p - conv_out_size), (0, 0)))
    kp["bf1"] = params["fb1"].reshape(1, -1)
    kp["wf2"] = jnp.pad(params["fw2"].T, ((0, 0), (0, nap - n_actions)))
    kp["bf2"] = _pad_bias(params["fb2"], nap)
    return kp


# ------------------------------ model forward ------------------------------ #

def dqn_forward(kparams, x, *, n_actions):
    patches1, _, _ = _im2col(x, 8, 8, 4)                  # (N*OH1*OW1, C*8*8)
    args = (patches1,
            kparams["w1"], kparams["b1"],
            kparams["s2"], kparams["w2"], kparams["b2"],
            kparams["s3"], kparams["w3"], kparams["b3"],
            kparams["wf1"], kparams["bf1"], kparams["wf2"], kparams["bf2"])
    m3_pad = kparams["s3"].shape[1]
    nap = kparams["wf2"].shape[1]
    vmem = functools.partial(pl.BlockSpec, memory_space=pltpu.MemorySpace.VMEM)
    q_pad = pl.pallas_call(
        _fused_dqn_kernel,
        out_shape=jax.ShapeDtypeStruct((m3_pad, nap), jnp.float32),
        in_specs=[vmem() for _ in args],
        out_specs=vmem(),
    )(*args)
    # TODO(synk): RingAttractor(n_actions, n_actions) has no definition in the
    # provided source module, so its dynamics cannot be reproduced; Q-values
    # are passed through unchanged.
    return q_pad[: x.shape[0], :n_actions]


# ----------------------------- reference (XLA) ------------------------------ #

def _reference_forward(params, x):
    dn = ("NCHW", "OIHW", "NCHW")

    def conv(x, w, b, s):
        y = jax.lax.conv_general_dilated(x, w, (s, s), "VALID", dimension_numbers=dn)
        return jnp.maximum(y + b[None, :, None, None], 0.0)

    y = conv(x, params["cw1"], params["cb1"], 4)
    y = conv(y, params["cw2"], params["cb2"], 2)
    y = conv(y, params["cw3"], params["cb3"], 1)
    flat = y.reshape(x.shape[0], -1)
    h = jnp.maximum(flat @ params["fw1"].T + params["fb1"], 0.0)
    return h @ params["fw2"].T + params["fb2"]


# ------------------------------ params / main ------------------------------- #

def _uniform(key, shape, fan_in):
    bound = 1.0 / math.sqrt(fan_in)
    return jax.random.uniform(key, shape, jnp.float32, -bound, bound)


def init_params(key, in_channels, hw, n_actions):
    oh1 = _conv_out(hw, 8, 4)
    oh2 = _conv_out(oh1, 4, 2)
    oh3 = _conv_out(oh2, 3, 1)
    conv_out_size = 64 * oh3 * oh3
    ks = jax.random.split(key, 10)
    p = {}
    p["cw1"] = _uniform(ks[0], (32, in_channels, 8, 8), in_channels * 8 * 8)
    p["cb1"] = _uniform(ks[1], (32,), in_channels * 8 * 8)
    p["cw2"] = _uniform(ks[2], (64, 32, 4, 4), 32 * 4 * 4)
    p["cb2"] = _uniform(ks[3], (64,), 32 * 4 * 4)
    p["cw3"] = _uniform(ks[4], (64, 64, 3, 3), 64 * 3 * 3)
    p["cb3"] = _uniform(ks[5], (64,), 64 * 3 * 3)
    p["fw1"] = _uniform(ks[6], (512, conv_out_size), conv_out_size)  # PyTorch (out, in)
    p["fb1"] = _uniform(ks[7], (512,), conv_out_size)
    p["fw2"] = _uniform(ks[8], (n_actions, 512), 512)
    p["fb2"] = _uniform(ks[9], (n_actions,), 512)
    return p


if __name__ == "__main__":
    # Smallest spatial size that survives the conv stack: 36 -> 8 -> 3 -> 1.
    batch, in_channels, H, W = 2, 4, 36, 36
    n_actions = 6

    key = jax.random.PRNGKey(0)
    k_params, k_x = jax.random.split(key)
    params = init_params(k_params, in_channels, H, n_actions)
    x = jax.random.normal(k_x, (batch, in_channels, H, W), jnp.float32)

    kparams = prepare_params(params, batch, in_channels, H, n_actions)
    fwd = jax.jit(functools.partial(dqn_forward, n_actions=n_actions))
    q = fwd(kparams, x)
    jax.block_until_ready(q)

    q_ref = _reference_forward(params, x)
    assert q.shape == (batch, n_actions), q.shape
    assert jnp.allclose(q, q_ref, atol=1e-3, rtol=1e-3), "mismatch vs XLA reference"

    print("KERNEL_OK")
</pallas_src>

<mosaic_0001>
module attributes {stable_mosaic.version = 11 : i64} {
  func.func @_fused_dqn_kernel(%arg0: memref<128x256xf32, #tpu.memory_space<vmem>>, %arg1: memref<256x128xf32, #tpu.memory_space<vmem>>, %arg2: memref<1x128xf32, #tpu.memory_space<vmem>>, %arg3: memref<16x24x128xf32, #tpu.memory_space<vmem>>, %arg4: memref<16x128x128xf32, #tpu.memory_space<vmem>>, %arg5: memref<1x128xf32, #tpu.memory_space<vmem>>, %arg6: memref<9x8x24xf32, #tpu.memory_space<vmem>>, %arg7: memref<9x128x128xf32, #tpu.memory_space<vmem>>, %arg8: memref<1x128xf32, #tpu.memory_space<vmem>>, %arg9: memref<128x512xf32, #tpu.memory_space<vmem>>, %arg10: memref<1x512xf32, #tpu.memory_space<vmem>>, %arg11: memref<512x128xf32, #tpu.memory_space<vmem>>, %arg12: memref<1x128xf32, #tpu.memory_space<vmem>>, %arg13: memref<8x128xf32, #tpu.memory_space<vmem>>) attributes {dimension_semantics = [], scalar_prefetch = 0 : i64, scratch_operands = 0 : i64, tpu.core_type = #tpu.core_type<tc>} {
    %c0 = arith.constant 0 : index
    %c0_0 = arith.constant 0 : index
    %0 = vector.load %arg0[%c0, %c0_0] : memref<128x256xf32, #tpu.memory_space<vmem>>, vector<128x256xf32>
    %c0_1 = arith.constant 0 : index
    %c0_2 = arith.constant 0 : index
    %1 = vector.load %arg1[%c0_1, %c0_2] : memref<256x128xf32, #tpu.memory_space<vmem>>, vector<256x128xf32>
    %cst = arith.constant dense<0.000000e+00> : vector<128x128xf32>
    %2 = tpu.matmul %0, %1, %cst {dimension_numbers = #tpu.dot_dimension_numbers<[1], [0], [0], [1], [0, 0, 1, 1], [], []>} : vector<128x256xf32>, vector<256x128xf32>, vector<128x128xf32> -> vector<128x128xf32>
    %c0_3 = arith.constant 0 : index
    %c0_4 = arith.constant 0 : index
    %3 = vector.load %arg2[%c0_3, %c0_4] : memref<1x128xf32, #tpu.memory_space<vmem>>, vector<1x128xf32>
    %4 = vector.broadcast %3 : vector<1x128xf32> to vector<128x128xf32>
    %5 = arith.addf %2, %4 : vector<128x128xf32>
    %cst_5 = arith.constant 0.000000e+00 : f32
    %6 = vector.broadcast %cst_5 : f32 to vector<128x128xf32>
    %7 = arith.maximumf %5, %6 : vector<128x128xf32>
    %cst_6 = arith.constant 0.000000e+00 : f32
    %8 = vector.broadcast %cst_6 : f32 to vector<24x128xf32>
    %c0_7 = arith.constant 0 : index
    %c0_8 = arith.constant 0 : index
    %c0_9 = arith.constant 0 : index
    %9 = vector.load %arg3[%c0_7, %c0_8, %c0_9] : memref<16x24x128xf32, #tpu.memory_space<vmem>>, vector<1x24x128xf32>
    %10 = vector.shape_cast %9 : vector<1x24x128xf32> to vector<24x128xf32>
    %cst_10 = arith.constant dense<0.000000e+00> : vector<24x128xf32>
    %11 = tpu.matmul %10, %7, %cst_10 {dimension_numbers = #tpu.dot_dimension_numbers<[1], [0], [0], [1], [0, 0, 1, 1], [], []>} : vector<24x128xf32>, vector<128x128xf32>, vector<24x128xf32> -> vector<24x128xf32>
    %c0_11 = arith.constant 0 : index
    %c0_12 = arith.constant 0 : index
    %c0_13 = arith.constant 0 : index
    %12 = vector.load %arg4[%c0_11, %c0_12, %c0_13] : memref<16x128x128xf32, #tpu.memory_space<vmem>>, vector<1x128x128xf32>
    %13 = vector.shape_cast %12 : vector<1x128x128xf32> to vector<128x128xf32>
    %cst_14 = arith.constant dense<0.000000e+00> : vector<24x128xf32>
    %14 = tpu.matmul %11, %13, %cst_14 {dimension_numbers = #tpu.dot_dimension_numbers<[1], [0], [0], [1], [0, 0, 1, 1], [], []>} : vector<24x128xf32>, vector<128x128xf32>, vector<24x128xf32> -> vector<24x128xf32>
    %15 = arith.addf %8, %14 : vector<24x128xf32>
    %c1 = arith.constant 1 : index
    %c0_15 = arith.constant 0 : index
    %c0_16 = arith.constant 0 : index
    %16 = vector.load %arg3[%c1, %c0_15, %c0_16] : memref<16x24x128xf32, #tpu.memory_space<vmem>>, vector<1x24x128xf32>
    %17 = vector.shape_cast %16 : vector<1x24x128xf32> to vector<24x128xf32>
    %cst_17 = arith.constant dense<0.000000e+00> : vector<24x128xf32>
    %18 = tpu.matmul %17, %7, %cst_17 {dimension_numbers = #tpu.dot_dimension_numbers<[1], [0], [0], [1], [0, 0, 1, 1], [], []>} : vector<24x128xf32>, vector<128x128xf32>, vector<24x128xf32> -> vector<24x128xf32>
    %c1_18 = arith.constant 1 : index
    %c0_19 = arith.constant 0 : index
    %c0_20 = arith.constant 0 : index
    %19 = vector.load %arg4[%c1_18, %c0_19, %c0_20] : memref<16x128x128xf32, #tpu.memory_space<vmem>>, vector<1x128x128xf32>
    %20 = vector.shape_cast %19 : vector<1x128x128xf32> to vector<128x128xf32>
    %cst_21 = arith.constant dense<0.000000e+00> : vector<24x128xf32>
    %21 = tpu.matmul %18, %20, %cst_21 {dimension_numbers = #tpu.dot_dimension_numbers<[1], [0], [0], [1], [0, 0, 1, 1], [], []>} : vector<24x128xf32>, vector<128x128xf32>, vector<24x128xf32> -> vector<24x128xf32>
    %22 = arith.addf %15, %21 : vector<24x128xf32>
    %c2 = arith.constant 2 : index
    %c0_22 = arith.constant 0 : index
    %c0_23 = arith.constant 0 : index
    %23 = vector.load %arg3[%c2, %c0_22, %c0_23] : memref<16x24x128xf32, #tpu.memory_space<vmem>>, vector<1x24x128xf32>
    %24 = vector.shape_cast %23 : vector<1x24x128xf32> to vector<24x128xf32>
    %cst_24 = arith.constant dense<0.000000e+00> : vector<24x128xf32>
    %25 = tpu.matmul %24, %7, %cst_24 {dimension_numbers = #tpu.dot_dimension_numbers<[1], [0], [0], [1], [0, 0, 1, 1], [], []>} : vector<24x128xf32>, vector<128x128xf32>, vector<24x128xf32> -> vector<24x128xf32>
    %c2_25 = arith.constant 2 : index
    %c0_26 = arith.constant 0 : index
    %c0_27 = arith.constant 0 : index
    %26 = vector.load %arg4[%c2_25, %c0_26, %c0_27] : memref<16x128x128xf32, #tpu.memory_space<vmem>>, vector<1x128x128xf32>
    %27 = vector.shape_cast %26 : vector<1x128x128xf32> to vector<128x128xf32>
    %cst_28 = arith.constant dense<0.000000e+00> : vector<24x128xf32>
    %28 = tpu.matmul %25, %27, %cst_28 {dimension_numbers = #tpu.dot_dimension_numbers<[1], [0], [0], [1], [0, 0, 1, 1], [], []>} : vector<24x128xf32>, vector<128x128xf32>, vector<24x128xf32> -> vector<24x128xf32>
    %29 = arith.addf %22, %28 : vector<24x128xf32>
    %c3 = arith.constant 3 : index
    %c0_29 = arith.constant 0 : index
    %c0_30 = arith.constant 0 : index
    %30 = vector.load %arg3[%c3, %c0_29, %c0_30] : memref<16x24x128xf32, #tpu.memory_space<vmem>>, vector<1x24x128xf32>
    %31 = vector.shape_cast %30 : vector<1x24x128xf32> to vector<24x128xf32>
    %cst_31 = arith.constant dense<0.000000e+00> : vector<24x128xf32>
    %32 = tpu.matmul %31, %7, %cst_31 {dimension_numbers = #tpu.dot_dimension_numbers<[1], [0], [0], [1], [0, 0, 1, 1], [], []>} : vector<24x128xf32>, vector<128x128xf32>, vector<24x128xf32> -> vector<24x128xf32>
    %c3_32 = arith.constant 3 : index
    %c0_33 = arith.constant 0 : index
    %c0_34 = arith.constant 0 : index
    %33 = vector.load %arg4[%c3_32, %c0_33, %c0_34] : memref<16x128x128xf32, #tpu.memory_space<vmem>>, vector<1x128x128xf32>
    %34 = vector.shape_cast %33 : vector<1x128x128xf32> to vector<128x128xf32>
    %cst_35 = arith.constant dense<0.000000e+00> : vector<24x128xf32>
    %35 = tpu.matmul %32, %34, %cst_35 {dimension_numbers = #tpu.dot_dimension_numbers<[1], [0], [0], [1], [0, 0, 1, 1], [], []>} : vector<24x128xf32>, vector<128x128xf32>, vector<24x128xf32> -> vector<24x128xf32>
    %36 = arith.addf %29, %35 : vector<24x128xf32>
    %c4 = arith.constant 4 : index
    %c0_36 = arith.constant 0 : index
    %c0_37 = arith.constant 0 : index
    %37 = vector.load %arg3[%c4, %c0_36, %c0_37] : memref<16x24x128xf32, #tpu.memory_space<vmem>>, vector<1x24x128xf32>
    %38 = vector.shape_cast %37 : vector<1x24x128xf32> to vector<24x128xf32>
    %cst_38 = arith.constant dense<0.000000e+00> : vector<24x128xf32>
    %39 = tpu.matmul %38, %7, %cst_38 {dimension_numbers = #tpu.dot_dimension_numbers<[1], [0], [0], [1], [0, 0, 1, 1], [], []>} : vector<24x128xf32>, vector<128x128xf32>, vector<24x128xf32> -> vector<24x128xf32>
    %c4_39 = arith.constant 4 : index
    %c0_40 = arith.constant 0 : index
    %c0_41 = arith.constant 0 : index
    %40 = vector.load %arg4[%c4_39, %c0_40, %c0_41] : memref<16x128x128xf32, #tpu.memory_space<vmem>>, vector<1x128x128xf32>
    %41 = vector.shape_cast %40 : vector<1x128x128xf32> to vector<128x128xf32>
    %cst_42 = arith.constant dense<0.000000e+00> : vector<24x128xf32>
    %42 = tpu.matmul %39, %41, %cst_42 {dimension_numbers = #tpu.dot_dimension_numbers<[1], [0], [0], [1], [0, 0, 1, 1], [], []>} : vector<24x128xf32>, vector<128x128xf32>, vector<24x128xf32> -> vector<24x128xf32>
    %43 = arith.addf %36, %42 : vector<24x128xf32>
    %c5 = arith.constant 5 : index
    %c0_43 = arith.constant 0 : index
    %c0_44 = arith.constant 0 : index
    %44 = vector.load %arg3[%c5, %c0_43, %c0_44] : memref<16x24x128xf32, #tpu.memory_space<vmem>>, vector<1x24x128xf32>
    %45 = vector.shape_cast %44 : vector<1x24x128xf32> to vector<24x128xf32>
    %cst_45 = arith.constant dense<0.000000e+00> : vector<24x128xf32>
    %46 = tpu.matmul %45, %7, %cst_45 {dimension_numbers = #tpu.dot_dimension_numbers<[1], [0], [0], [1], [0, 0, 1, 1], [], []>} : vector<24x128xf32>, vector<128x128xf32>, vector<24x128xf32> -> vector<24x128xf32>
    %c5_46 = arith.constant 5 : index
    %c0_47 = arith.constant 0 : index
    %c0_48 = arith.constant 0 : index
    %47 = vector.load %arg4[%c5_46, %c0_47, %c0_48] : memref<16x128x128xf32, #tpu.memory_space<vmem>>, vector<1x128x128xf32>
    %48 = vector.shape_cast %47 : vector<1x128x128xf32> to vector<128x128xf32>
    %cst_49 = arith.constant dense<0.000000e+00> : vector<24x128xf32>
    %49 = tpu.matmul %46, %48, %cst_49 {dimension_numbers = #tpu.dot_dimension_numbers<[1], [0], [0], [1], [0, 0, 1, 1], [], []>} : vector<24x128xf32>, vector<128x128xf32>, vector<24x128xf32> -> vector<24x128xf32>
    %50 = arith.addf %43, %49 : vector<24x128xf32>
    %c6 = arith.constant 6 : index
    %c0_50 = arith.constant 0 : index
    %c0_51 = arith.constant 0 : index
    %51 = vector.load %arg3[%c6, %c0_50, %c0_51] : memref<16x24x128xf32, #tpu.memory_space<vmem>>, vector<1x24x128xf32>
    %52 = vector.shape_cast %51 : vector<1x24x128xf32> to vector<24x128xf32>
    %cst_52 = arith.constant dense<0.000000e+00> : vector<24x128xf32>
    %53 = tpu.matmul %52, %7, %cst_52 {dimension_numbers = #tpu.dot_dimension_numbers<[1], [0], [0], [1], [0, 0, 1, 1], [], []>} : vector<24x128xf32>, vector<128x128xf32>, vector<24x128xf32> -> vector<24x128xf32>
    %c6_53 = arith.constant 6 : index
    %c0_54 = arith.constant 0 : index
    %c0_55 = arith.constant 0 : index
    %54 = vector.load %arg4[%c6_53, %c0_54, %c0_55] : memref<16x128x128xf32, #tpu.memory_space<vmem>>, vector<1x128x128xf32>
    %55 = vector.shape_cast %54 : vector<1x128x128xf32> to vector<128x128xf32>
    %cst_56 = arith.constant dense<0.000000e+00> : vector<24x128xf32>
    %56 = tpu.matmul %53, %55, %cst_56 {dimension_numbers = #tpu.dot_dimension_numbers<[1], [0], [0], [1], [0, 0, 1, 1], [], []>} : vector<24x128xf32>, vector<128x128xf32>, vector<24x128xf32> -> vector<24x128xf32>
    %57 = arith.addf %50, %56 : vector<24x128xf32>
    %c7 = arith.constant 7 : index
    %c0_57 = arith.constant 0 : index
    %c0_58 = arith.constant 0 : index
    %58 = vector.load %arg3[%c7, %c0_57, %c0_58] : memref<16x24x128xf32, #tpu.memory_space<vmem>>, vector<1x24x128xf32>
    %59 = vector.shape_cast %58 : vector<1x24x128xf32> to vector<24x128xf32>
    %cst_59 = arith.constant dense<0.000000e+00> : vector<24x128xf32>
    %60 = tpu.matmul %59, %7, %cst_59 {dimension_numbers = #tpu.dot_dimension_numbers<[1], [0], [0], [1], [0, 0, 1, 1], [], []>} : vector<24x128xf32>, vector<128x128xf32>, vector<24x128xf32> -> vector<24x128xf32>
    %c7_60 = arith.constant 7 : index
    %c0_61 = arith.constant 0 : index
    %c0_62 = arith.constant 0 : index
    %61 = vector.load %arg4[%c7_60, %c0_61, %c0_62] : memref<16x128x128xf32, #tpu.memory_space<vmem>>, vector<1x128x128xf32>
    %62 = vector.shape_cast %61 : vector<1x128x128xf32> to vector<128x128xf32>
    %cst_63 = arith.constant dense<0.000000e+00> : vector<24x128xf32>
    %63 = tpu.matmul %60, %62, %cst_63 {dimension_numbers = #tpu.dot_dimension_numbers<[1], [0], [0], [1], [0, 0, 1, 1], [], []>} : vector<24x128xf32>, vector<128x128xf32>, vector<24x128xf32> -> vector<24x128xf32>
    %64 = arith.addf %57, %63 : vector<24x128xf32>
    %c8 = arith.constant 8 : index
    %c0_64 = arith.constant 0 : index
    %c0_65 = arith.constant 0 : index
    %65 = vector.load %arg3[%c8, %c0_64, %c0_65] : memref<16x24x128xf32, #tpu.memory_space<vmem>>, vector<1x24x128xf32>
    %66 = vector.shape_cast %65 : vector<1x24x128xf32> to vector<24x128xf32>
    %cst_66 = arith.constant dense<0.000000e+00> : vector<24x128xf32>
    %67 = tpu.matmul %66, %7, %cst_66 {dimension_numbers = #tpu.dot_dimension_numbers<[1], [0], [0], [1], [0, 0, 1, 1], [], []>} : vector<24x128xf32>, vector<128x128xf32>, vector<24x128xf32> -> vector<24x128xf32>
    %c8_67 = arith.constant 8 : index
    %c0_68 = arith.constant 0 : index
    %c0_69 = arith.constant 0 : index
    %68 = vector.load %arg4[%c8_67, %c0_68, %c0_69] : memref<16x128x128xf32, #tpu.memory_space<vmem>>, vector<1x128x128xf32>
    %69 = vector.shape_cast %68 : vector<1x128x128xf32> to vector<128x128xf32>
    %cst_70 = arith.constant dense<0.000000e+00> : vector<24x128xf32>
    %70 = tpu.matmul %67, %69, %cst_70 {dimension_numbers = #tpu.dot_dimension_numbers<[1], [0], [0], [1], [0, 0, 1, 1], [], []>} : vector<24x128xf32>, vector<128x128xf32>, vector<24x128xf32> -> vector<24x128xf32>
    %71 = arith.addf %64, %70 : vector<24x128xf32>
    %c9 = arith.constant 9 : index
    %c0_71 = arith.constant 0 : index
    %c0_72 = arith.constant 0 : index
    %72 = vector.load %arg3[%c9, %c0_71, %c0_72] : memref<16x24x128xf32, #tpu.memory_space<vmem>>, vector<1x24x128xf32>
    %73 = vector.shape_cast %72 : vector<1x24x128xf32> to vector<24x128xf32>
    %cst_73 = arith.constant dense<0.000000e+00> : vector<24x128xf32>
    %74 = tpu.matmul %73, %7, %cst_73 {dimension_numbers = #tpu.dot_dimension_numbers<[1], [0], [0], [1], [0, 0, 1, 1], [], []>} : vector<24x128xf32>, vector<128x128xf32>, vector<24x128xf32> -> vector<24x128xf32>
    %c9_74 = arith.constant 9 : index
    %c0_75 = arith.constant 0 : index
    %c0_76 = arith.constant 0 : index
    %75 = vector.load %arg4[%c9_74, %c0_75, %c0_76] : memref<16x128x128xf32, #tpu.memory_space<vmem>>, vector<1x128x128xf32>
    %76 = vector.shape_cast %75 : vector<1x128x128xf32> to vector<128x128xf32>
    %cst_77 = arith.constant dense<0.000000e+00> : vector<24x128xf32>
    %77 = tpu.matmul %74, %76, %cst_77 {dimension_numbers = #tpu.dot_dimension_numbers<[1], [0], [0], [1], [0, 0, 1, 1], [], []>} : vector<24x128xf32>, vector<128x128xf32>, vector<24x128xf32> -> vector<24x128xf32>
    %78 = arith.addf %71, %77 : vector<24x128xf32>
    %c10 = arith.constant 10 : index
    %c0_78 = arith.constant 0 : index
    %c0_79 = arith.constant 0 : index
    %79 = vector.load %arg3[%c10, %c0_78, %c0_79] : memref<16x24x128xf32, #tpu.memory_space<vmem>>, vector<1x24x128xf32>
    %80 = vector.shape_cast %79 : vector<1x24x128xf32> to vector<24x128xf32>
    %cst_80 = arith.constant dense<0.000000e+00> : vector<24x128xf32>
    %81 = tpu.matmul %80, %7, %cst_80 {dimension_numbers = #tpu.dot_dimension_numbers<[1], [0], [0], [1], [0, 0, 1, 1], [], []>} : vector<24x128xf32>, vector<128x128xf32>, vector<24x128xf32> -> vector<24x128xf32>
    %c10_81 = arith.constant 10 : index
    %c0_82 = arith.constant 0 : index
    %c0_83 = arith.constant 0 : index
    %82 = vector.load %arg4[%c10_81, %c0_82, %c0_83] : memref<16x128x128xf32, #tpu.memory_space<vmem>>, vector<1x128x128xf32>
    %83 = vector.shape_cast %82 : vector<1x128x128xf32> to vector<128x128xf32>
    %cst_84 = arith.constant dense<0.000000e+00> : vector<24x128xf32>
    %84 = tpu.matmul %81, %83, %cst_84 {dimension_numbers = #tpu.dot_dimension_numbers<[1], [0], [0], [1], [0, 0, 1, 1], [], []>} : vector<24x128xf32>, vector<128x128xf32>, vector<24x128xf32> -> vector<24x128xf32>
    %85 = arith.addf %78, %84 : vector<24x128xf32>
    %c11 = arith.constant 11 : index
    %c0_85 = arith.constant 0 : index
    %c0_86 = arith.constant 0 : index
    %86 = vector.load %arg3[%c11, %c0_85, %c0_86] : memref<16x24x128xf32, #tpu.memory_space<vmem>>, vector<1x24x128xf32>
    %87 = vector.shape_cast %86 : vector<1x24x128xf32> to vector<24x128xf32>
    %cst_87 = arith.constant dense<0.000000e+00> : vector<24x128xf32>
    %88 = tpu.matmul %87, %7, %cst_87 {dimension_numbers = #tpu.dot_dimension_numbers<[1], [0], [0], [1], [0, 0, 1, 1], [], []>} : vector<24x128xf32>, vector<128x128xf32>, vector<24x128xf32> -> vector<24x128xf32>
    %c11_88 = arith.constant 11 : index
    %c0_89 = arith.constant 0 : index
    %c0_90 = arith.constant 0 : index
    %89 = vector.load %arg4[%c11_88, %c0_89, %c0_90] : memref<16x128x128xf32, #tpu.memory_space<vmem>>, vector<1x128x128xf32>
    %90 = vector.shape_cast %89 : vector<1x128x128xf32> to vector<128x128xf32>
    %cst_91 = arith.constant dense<0.000000e+00> : vector<24x128xf32>
    %91 = tpu.matmul %88, %90, %cst_91 {dimension_numbers = #tpu.dot_dimension_numbers<[1], [0], [0], [1], [0, 0, 1, 1], [], []>} : vector<24x128xf32>, vector<128x128xf32>, vector<24x128xf32> -> vector<24x128xf32>
    %92 = arith.addf %85, %91 : vector<24x128xf32>
    %c12 = arith.constant 12 : index
    %c0_92 = arith.constant 0 : index
    %c0_93 = arith.constant 0 : index
    %93 = vector.load %arg3[%c12, %c0_92, %c0_93] : memref<16x24x128xf32, #tpu.memory_space<vmem>>, vector<1x24x128xf32>
    %94 = vector.shape_cast %93 : vector<1x24x128xf32> to vector<24x128xf32>
    %cst_94 = arith.constant dense<0.000000e+00> : vector<24x128xf32>
    %95 = tpu.matmul %94, %7, %cst_94 {dimension_numbers = #tpu.dot_dimension_numbers<[1], [0], [0], [1], [0, 0, 1, 1], [], []>} : vector<24x128xf32>, vector<128x128xf32>, vector<24x128xf32> -> vector<24x128xf32>
    %c12_95 = arith.constant 12 : index
    %c0_96 = arith.constant 0 : index
    %c0_97 = arith.constant 0 : index
    %96 = vector.load %arg4[%c12_95, %c0_96, %c0_97] : memref<16x128x128xf32, #tpu.memory_space<vmem>>, vector<1x128x128xf32>
    %97 = vector.shape_cast %96 : vector<1x128x128xf32> to vector<128x128xf32>
    %cst_98 = arith.constant dense<0.000000e+00> : vector<24x128xf32>
    %98 = tpu.matmul %95, %97, %cst_98 {dimension_numbers = #tpu.dot_dimension_numbers<[1], [0], [0], [1], [0, 0, 1, 1], [], []>} : vector<24x128xf32>, vector<128x128xf32>, vector<24x128xf32> -> vector<24x128xf32>
    %99 = arith.addf %92, %98 : vector<24x128xf32>
    %c13 = arith.constant 13 : index
    %c0_99 = arith.constant 0 : index
    %c0_100 = arith.constant 0 : index
    %100 = vector.load %arg3[%c13, %c0_99, %c0_100] : memref<16x24x128xf32, #tpu.memory_space<vmem>>, vector<1x24x128xf32>
    %101 = vector.shape_cast %100 : vector<1x24x128xf32> to vector<24x128xf32>
    %cst_101 = arith.constant dense<0.000000e+00> : vector<24x128xf32>
    %102 = tpu.matmul %101, %7, %cst_101 {dimension_numbers = #tpu.dot_dimension_numbers<[1], [0], [0], [1], [0, 0, 1, 1], [], []>} : vector<24x128xf32>, vector<128x128xf32>, vector<24x128xf32> -> vector<24x128xf32>
    %c13_102 = arith.constant 13 : index
    %c0_103 = arith.constant 0 : index
    %c0_104 = arith.constant 0 : index
    %103 = vector.load %arg4[%c13_102, %c0_103, %c0_104] : memref<16x128x128xf32, #tpu.memory_space<vmem>>, vector<1x128x128xf32>
    %104 = vector.shape_cast %103 : vector<1x128x128xf32> to vector<128x128xf32>
    %cst_105 = arith.constant dense<0.000000e+00> : vector<24x128xf32>
    %105 = tpu.matmul %102, %104, %cst_105 {dimension_numbers = #tpu.dot_dimension_numbers<[1], [0], [0], [1], [0, 0, 1, 1], [], []>} : vector<24x128xf32>, vector<128x128xf32>, vector<24x128xf32> -> vector<24x128xf32>
    %106 = arith.addf %99, %105 : vector<24x128xf32>
    %c14 = arith.constant 14 : index
    %c0_106 = arith.constant 0 : index
    %c0_107 = arith.constant 0 : index
    %107 = vector.load %arg3[%c14, %c0_106, %c0_107] : memref<16x24x128xf32, #tpu.memory_space<vmem>>, vector<1x24x128xf32>
    %108 = vector.shape_cast %107 : vector<1x24x128xf32> to vector<24x128xf32>
    %cst_108 = arith.constant dense<0.000000e+00> : vector<24x128xf32>
    %109 = tpu.matmul %108, %7, %cst_108 {dimension_numbers = #tpu.dot_dimension_numbers<[1], [0], [0], [1], [0, 0, 1, 1], [], []>} : vector<24x128xf32>, vector<128x128xf32>, vector<24x128xf32> -> vector<24x128xf32>
    %c14_109 = arith.constant 14 : index
    %c0_110 = arith.constant 0 : index
    %c0_111 = arith.constant 0 : index
    %110 = vector.load %arg4[%c14_109, %c0_110, %c0_111] : memref<16x128x128xf32, #tpu.memory_space<vmem>>, vector<1x128x128xf32>
    %111 = vector.shape_cast %110 : vector<1x128x128xf32> to vector<128x128xf32>
    %cst_112 = arith.constant dense<0.000000e+00> : vector<24x128xf32>
    %112 = tpu.matmul %109, %111, %cst_112 {dimension_numbers = #tpu.dot_dimension_numbers<[1], [0], [0], [1], [0, 0, 1, 1], [], []>} : vector<24x128xf32>, vector<128x128xf32>, vector<24x128xf32> -> vector<24x128xf32>
    %113 = arith.addf %106, %112 : vector<24x128xf32>
    %c15 = arith.constant 15 : index
    %c0_113 = arith.constant 0 : index
    %c0_114 = arith.constant 0 : index
    %114 = vector.load %arg3[%c15, %c0_113, %c0_114] : memref<16x24x128xf32, #tpu.memory_space<vmem>>, vector<1x24x128xf32>
    %115 = vector.shape_cast %114 : vector<1x24x128xf32> to vector<24x128xf32>
    %cst_115 = arith.constant dense<0.000000e+00> : vector<24x128xf32>
    %116 = tpu.matmul %115, %7, %cst_115 {dimension_numbers = #tpu.dot_dimension_numbers<[1], [0], [0], [1], [0, 0, 1, 1], [], []>} : vector<24x128xf32>, vector<128x128xf32>, vector<24x128xf32> -> vector<24x128xf32>
    %c15_116 = arith.constant 15 : index
    %c0_117 = arith.constant 0 : index
    %c0_118 = arith.constant 0 : index
    %117 = vector.load %arg4[%c15_116, %c0_117, %c0_118] : memref<16x128x128xf32, #tpu.memory_space<vmem>>, vector<1x128x128xf32>
    %118 = vector.shape_cast %117 : vector<1x128x128xf32> to vector<128x128xf32>
    %cst_119 = arith.constant dense<0.000000e+00> : vector<24x128xf32>
    %119 = tpu.matmul %116, %118, %cst_119 {dimension_numbers = #tpu.dot_dimension_numbers<[1], [0], [0], [1], [0, 0, 1, 1], [], []>} : vector<24x128xf32>, vector<128x128xf32>, vector<24x128xf32> -> vector<24x128xf32>
    %120 = arith.addf %113, %119 : vector<24x128xf32>
    %c0_120 = arith.constant 0 : index
    %c0_121 = arith.constant 0 : index
    %121 = vector.load %arg5[%c0_120, %c0_121] : memref<1x128xf32, #tpu.memory_space<vmem>>, vector<1x128xf32>
    %122 = vector.broadcast %121 : vector<1x128xf32> to vector<24x128xf32>
    %123 = arith.addf %120, %122 : vector<24x128xf32>
    %cst_122 = arith.constant 0.000000e+00 : f32
    %124 = vector.broadcast %cst_122 : f32 to vector<24x128xf32>
    %125 = arith.maximumf %123, %124 : vector<24x128xf32>
    %cst_123 = arith.constant 0.000000e+00 : f32
    %126 = vector.broadcast %cst_123 : f32 to vector<8x128xf32>
    %c0_124 = arith.constant 0 : index
    %c0_125 = arith.constant 0 : index
    %c0_126 = arith.constant 0 : index
    %127 = vector.load %arg6[%c0_124, %c0_125, %c0_126] : memref<9x8x24xf32, #tpu.memory_space<vmem>>, vector<1x8x24xf32>
    %128 = vector.shape_cast %127 : vector<1x8x24xf32> to vector<8x24xf32>
    %cst_127 = arith.constant dense<0.000000e+00> : vector<8x128xf32>
    %129 = tpu.matmul %128, %125, %cst_127 {dimension_numbers = #tpu.dot_dimension_numbers<[1], [0], [0], [1], [0, 0, 1, 1], [], []>} : vector<8x24xf32>, vector<24x128xf32>, vector<8x128xf32> -> vector<8x128xf32>
    %c0_128 = arith.constant 0 : index
    %c0_129 = arith.constant 0 : index
    %c0_130 = arith.constant 0 : index
    %130 = vector.load %arg7[%c0_128, %c0_129, %c0_130] : memref<9x128x128xf32, #tpu.memory_space<vmem>>, vector<1x128x128xf32>
    %131 = vector.shape_cast %130 : vector<1x128x128xf32> to vector<128x128xf32>
    %cst_131 = arith.constant dense<0.000000e+00> : vector<8x128xf32>
    %132 = tpu.matmul %129, %131, %cst_131 {dimension_numbers = #tpu.dot_dimension_numbers<[1], [0], [0], [1], [0, 0, 1, 1], [], []>} : vector<8x128xf32>, vector<128x128xf32>, vector<8x128xf32> -> vector<8x128xf32>
    %133 = arith.addf %126, %132 : vector<8x128xf32>
    %c1_132 = arith.constant 1 : index
    %c0_133 = arith.constant 0 : index
    %c0_134 = arith.constant 0 : index
    %134 = vector.load %arg6[%c1_132, %c0_133, %c0_134] : memref<9x8x24xf32, #tpu.memory_space<vmem>>, vector<1x8x24xf32>
    %135 = vector.shape_cast %134 : vector<1x8x24xf32> to vector<8x24xf32>
    %cst_135 = arith.constant dense<0.000000e+00> : vector<8x128xf32>
    %136 = tpu.matmul %135, %125, %cst_135 {dimension_numbers = #tpu.dot_dimension_numbers<[1], [0], [0], [1], [0, 0, 1, 1], [], []>} : vector<8x24xf32>, vector<24x128xf32>, vector<8x128xf32> -> vector<8x128xf32>
    %c1_136 = arith.constant 1 : index
    %c0_137 = arith.constant 0 : index
    %c0_138 = arith.constant 0 : index
    %137 = vector.load %arg7[%c1_136, %c0_137, %c0_138] : memref<9x128x128xf32, #tpu.memory_space<vmem>>, vector<1x128x128xf32>
    %138 = vector.shape_cast %137 : vector<1x128x128xf32> to vector<128x128xf32>
    %cst_139 = arith.constant dense<0.000000e+00> : vector<8x128xf32>
    %139 = tpu.matmul %136, %138, %cst_139 {dimension_numbers = #tpu.dot_dimension_numbers<[1], [0], [0], [1], [0, 0, 1, 1], [], []>} : vector<8x128xf32>, vector<128x128xf32>, vector<8x128xf32> -> vector<8x128xf32>
    %140 = arith.addf %133, %139 : vector<8x128xf32>
    %c2_140 = arith.constant 2 : index
    %c0_141 = arith.constant 0 : index
    %c0_142 = arith.constant 0 : index
    %141 = vector.load %arg6[%c2_140, %c0_141, %c0_142] : memref<9x8x24xf32, #tpu.memory_space<vmem>>, vector<1x8x24xf32>
    %142 = vector.shape_cast %141 : vector<1x8x24xf32> to vector<8x24xf32>
    %cst_143 = arith.constant dense<0.000000e+00> : vector<8x128xf32>
    %143 = tpu.matmul %142, %125, %cst_143 {dimension_numbers = #tpu.dot_dimension_numbers<[1], [0], [0], [1], [0, 0, 1, 1], [], []>} : vector<8x24xf32>, vector<24x128xf32>, vector<8x128xf32> -> vector<8x128xf32>
    %c2_144 = arith.constant 2 : index
    %c0_145 = arith.constant 0 : index
    %c0_146 = arith.constant 0 : index
    %144 = vector.load %arg7[%c2_144, %c0_145, %c0_146] : memref<9x128x128xf32, #tpu.memory_space<vmem>>, vector<1x128x128xf32>
    %145 = vector.shape_cast %144 : vector<1x128x128xf32> to vector<128x128xf32>
    %cst_147 = arith.constant dense<0.000000e+00> : vector<8x128xf32>
    %146 = tpu.matmul %143, %145, %cst_147 {dimension_numbers = #tpu.dot_dimension_numbers<[1], [0], [0], [1], [0, 0, 1, 1], [], []>} : vector<8x128xf32>, vector<128x128xf32>, vector<8x128xf32> -> vector<8x128xf32>
    %147 = arith.addf %140, %146 : vector<8x128xf32>
    %c3_148 = arith.constant 3 : index
    %c0_149 = arith.constant 0 : index
    %c0_150 = arith.constant 0 : index
    %148 = vector.load %arg6[%c3_148, %c0_149, %c0_150] : memref<9x8x24xf32, #tpu.memory_space<vmem>>, vector<1x8x24xf32>
    %149 = vector.shape_cast %148 : vector<1x8x24xf32> to vector<8x24xf32>
    %cst_151 = arith.constant dense<0.000000e+00> : vector<8x128xf32>
    %150 = tpu.matmul %149, %125, %cst_151 {dimension_numbers = #tpu.dot_dimension_numbers<[1], [0], [0], [1], [0, 0, 1, 1], [], []>} : vector<8x24xf32>, vector<24x128xf32>, vector<8x128xf32> -> vector<8x128xf32>
    %c3_152 = arith.constant 3 : index
    %c0_153 = arith.constant 0 : index
    %c0_154 = arith.constant 0 : index
    %151 = vector.load %arg7[%c3_152, %c0_153, %c0_154] : memref<9x128x128xf32, #tpu.memory_space<vmem>>, vector<1x128x128xf32>
    %152 = vector.shape_cast %151 : vector<1x128x128xf32> to vector<128x128xf32>
    %cst_155 = arith.constant dense<0.000000e+00> : vector<8x128xf32>
    %153 = tpu.matmul %150, %152, %cst_155 {dimension_numbers = #tpu.dot_dimension_numbers<[1], [0], [0], [1], [0, 0, 1, 1], [], []>} : vector<8x128xf32>, vector<128x128xf32>, vector<8x128xf32> -> vector<8x128xf32>
    %154 = arith.addf %147, %153 : vector<8x128xf32>
    %c4_156 = arith.constant 4 : index
    %c0_157 = arith.constant 0 : index
    %c0_158 = arith.constant 0 : index
    %155 = vector.load %arg6[%c4_156, %c0_157, %c0_158] : memref<9x8x24xf32, #tpu.memory_space<vmem>>, vector<1x8x24xf32>
    %156 = vector.shape_cast %155 : vector<1x8x24xf32> to vector<8x24xf32>
    %cst_159 = arith.constant dense<0.000000e+00> : vector<8x128xf32>
    %157 = tpu.matmul %156, %125, %cst_159 {dimension_numbers = #tpu.dot_dimension_numbers<[1], [0], [0], [1], [0, 0, 1, 1], [], []>} : vector<8x24xf32>, vector<24x128xf32>, vector<8x128xf32> -> vector<8x128xf32>
    %c4_160 = arith.constant 4 : index
    %c0_161 = arith.constant 0 : index
    %c0_162 = arith.constant 0 : index
    %158 = vector.load %arg7[%c4_160, %c0_161, %c0_162] : memref<9x128x128xf32, #tpu.memory_space<vmem>>, vector<1x128x128xf32>
    %159 = vector.shape_cast %158 : vector<1x128x128xf32> to vector<128x128xf32>
    %cst_163 = arith.constant dense<0.000000e+00> : vector<8x128xf32>
    %160 = tpu.matmul %157, %159, %cst_163 {dimension_numbers = #tpu.dot_dimension_numbers<[1], [0], [0], [1], [0, 0, 1, 1], [], []>} : vector<8x128xf32>, vector<128x128xf32>, vector<8x128xf32> -> vector<8x128xf32>
    %161 = arith.addf %154, %160 : vector<8x128xf32>
    %c5_164 = arith.constant 5 : index
    %c0_165 = arith.constant 0 : index
    %c0_166 = arith.constant 0 : index
    %162 = vector.load %arg6[%c5_164, %c0_165, %c0_166] : memref<9x8x24xf32, #tpu.memory_space<vmem>>, vector<1x8x24xf32>
    %163 = vector.shape_cast %162 : vector<1x8x24xf32> to vector<8x24xf32>
    %cst_167 = arith.constant dense<0.000000e+00> : vector<8x128xf32>
    %164 = tpu.matmul %163, %125, %cst_167 {dimension_numbers = #tpu.dot_dimension_numbers<[1], [0], [0], [1], [0, 0, 1, 1], [], []>} : vector<8x24xf32>, vector<24x128xf32>, vector<8x128xf32> -> vector<8x128xf32>
    %c5_168 = arith.constant 5 : index
    %c0_169 = arith.constant 0 : index
    %c0_170 = arith.constant 0 : index
    %165 = vector.load %arg7[%c5_168, %c0_169, %c0_170] : memref<9x128x128xf32, #tpu.memory_space<vmem>>, vector<1x128x128xf32>
    %166 = vector.shape_cast %165 : vector<1x128x128xf32> to vector<128x128xf32>
    %cst_171 = arith.constant dense<0.000000e+00> : vector<8x128xf32>
    %167 = tpu.matmul %164, %166, %cst_171 {dimension_numbers = #tpu.dot_dimension_numbers<[1], [0], [0], [1], [0, 0, 1, 1], [], []>} : vector<8x128xf32>, vector<128x128xf32>, vector<8x128xf32> -> vector<8x128xf32>
    %168 = arith.addf %161, %167 : vector<8x128xf32>
    %c6_172 = arith.constant 6 : index
    %c0_173 = arith.constant 0 : index
    %c0_174 = arith.constant 0 : index
    %169 = vector.load %arg6[%c6_172, %c0_173, %c0_174] : memref<9x8x24xf32, #tpu.memory_space<vmem>>, vector<1x8x24xf32>
    %170 = vector.shape_cast %169 : vector<1x8x24xf32> to vector<8x24xf32>
    %cst_175 = arith.constant dense<0.000000e+00> : vector<8x128xf32>
    %171 = tpu.matmul %170, %125, %cst_175 {dimension_numbers = #tpu.dot_dimension_numbers<[1], [0], [0], [1], [0, 0, 1, 1], [], []>} : vector<8x24xf32>, vector<24x128xf32>, vector<8x128xf32> -> vector<8x128xf32>
    %c6_176 = arith.constant 6 : index
    %c0_177 = arith.constant 0 : index
    %c0_178 = arith.constant 0 : index
    %172 = vector.load %arg7[%c6_176, %c0_177, %c0_178] : memref<9x128x128xf32, #tpu.memory_space<vmem>>, vector<1x128x128xf32>
    %173 = vector.shape_cast %172 : vector<1x128x128xf32> to vector<128x128xf32>
    %cst_179 = arith.constant dense<0.000000e+00> : vector<8x128xf32>
    %174 = tpu.matmul %171, %173, %cst_179 {dimension_numbers = #tpu.dot_dimension_numbers<[1], [0], [0], [1], [0, 0, 1, 1], [], []>} : vector<8x128xf32>, vector<128x128xf32>, vector<8x128xf32> -> vector<8x128xf32>
    %175 = arith.addf %168, %174 : vector<8x128xf32>
    %c7_180 = arith.constant 7 : index
    %c0_181 = arith.constant 0 : index
    %c0_182 = arith.constant 0 : index
    %176 = vector.load %arg6[%c7_180, %c0_181, %c0_182] : memref<9x8x24xf32, #tpu.memory_space<vmem>>, vector<1x8x24xf32>
    %177 = vector.shape_cast %176 : vector<1x8x24xf32> to vector<8x24xf32>
    %cst_183 = arith.constant dense<0.000000e+00> : vector<8x128xf32>
    %178 = tpu.matmul %177, %125, %cst_183 {dimension_numbers = #tpu.dot_dimension_numbers<[1], [0], [0], [1], [0, 0, 1, 1], [], []>} : vector<8x24xf32>, vector<24x128xf32>, vector<8x128xf32> -> vector<8x128xf32>
    %c7_184 = arith.constant 7 : index
    %c0_185 = arith.constant 0 : index
    %c0_186 = arith.constant 0 : index
    %179 = vector.load %arg7[%c7_184, %c0_185, %c0_186] : memref<9x128x128xf32, #tpu.memory_space<vmem>>, vector<1x128x128xf32>
    %180 = vector.shape_cast %179 : vector<1x128x128xf32> to vector<128x128xf32>
    %cst_187 = arith.constant dense<0.000000e+00> : vector<8x128xf32>
    %181 = tpu.matmul %178, %180, %cst_187 {dimension_numbers = #tpu.dot_dimension_numbers<[1], [0], [0], [1], [0, 0, 1, 1], [], []>} : vector<8x128xf32>, vector<128x128xf32>, vector<8x128xf32> -> vector<8x128xf32>
    %182 = arith.addf %175, %181 : vector<8x128xf32>
    %c8_188 = arith.constant 8 : index
    %c0_189 = arith.constant 0 : index
    %c0_190 = arith.constant 0 : index
    %183 = vector.load %arg6[%c8_188, %c0_189, %c0_190] : memref<9x8x24xf32, #tpu.memory_space<vmem>>, vector<1x8x24xf32>
    %184 = vector.shape_cast %183 : vector<1x8x24xf32> to vector<8x24xf32>
    %cst_191 = arith.constant dense<0.000000e+00> : vector<8x128xf32>
    %185 = tpu.matmul %184, %125, %cst_191 {dimension_numbers = #tpu.dot_dimension_numbers<[1], [0], [0], [1], [0, 0, 1, 1], [], []>} : vector<8x24xf32>, vector<24x128xf32>, vector<8x128xf32> -> vector<8x128xf32>
    %c8_192 = arith.constant 8 : index
    %c0_193 = arith.constant 0 : index
    %c0_194 = arith.constant 0 : index
    %186 = vector.load %arg7[%c8_192, %c0_193, %c0_194] : memref<9x128x128xf32, #tpu.memory_space<vmem>>, vector<1x128x128xf32>
    %187 = vector.shape_cast %186 : vector<1x128x128xf32> to vector<128x128xf32>
    %cst_195 = arith.constant dense<0.000000e+00> : vector<8x128xf32>
    %188 = tpu.matmul %185, %187, %cst_195 {dimension_numbers = #tpu.dot_dimension_numbers<[1], [0], [0], [1], [0, 0, 1, 1], [], []>} : vector<8x128xf32>, vector<128x128xf32>, vector<8x128xf32> -> vector<8x128xf32>
    %189 = arith.addf %182, %188 : vector<8x128xf32>
    %c0_196 = arith.constant 0 : index
    %c0_197 = arith.constant 0 : index
    %190 = vector.load %arg8[%c0_196, %c0_197] : memref<1x128xf32, #tpu.memory_space<vmem>>, vector<1x128xf32>
    %191 = vector.broadcast %190 : vector<1x128xf32> to vector<8x128xf32>
    %192 = arith.addf %189, %191 : vector<8x128xf32>
    %cst_198 = arith.constant 0.000000e+00 : f32
    %193 = vector.broadcast %cst_198 : f32 to vector<8x128xf32>
    %194 = arith.maximumf %192, %193 : vector<8x128xf32>
    %c0_199 = arith.constant 0 : index
    %c0_200 = arith.constant 0 : index
    %195 = vector.load %arg9[%c0_199, %c0_200] : memref<128x512xf32, #tpu.memory_space<vmem>>, vector<128x512xf32>
    %cst_201 = arith.constant dense<0.000000e+00> : vector<8x512xf32>
    %196 = tpu.matmul %194, %195, %cst_201 {dimension_numbers = #tpu.dot_dimension_numbers<[1], [0], [0], [1], [0, 0, 1, 1], [], []>} : vector<8x128xf32>, vector<128x512xf32>, vector<8x512xf32> -> vector<8x512xf32>
    %c0_202 = arith.constant 0 : index
    %c0_203 = arith.constant 0 : index
    %197 = vector.load %arg10[%c0_202, %c0_203] : memref<1x512xf32, #tpu.memory_space<vmem>>, vector<1x512xf32>
    %198 = vector.broadcast %197 : vector<1x512xf32> to vector<8x512xf32>
    %199 = arith.addf %196, %198 : vector<8x512xf32>
    %cst_204 = arith.constant 0.000000e+00 : f32
    %200 = vector.broadcast %cst_204 : f32 to vector<8x512xf32>
    %201 = arith.maximumf %199, %200 : vector<8x512xf32>
    %c0_205 = arith.constant 0 : index
    %c0_206 = arith.constant 0 : index
    %202 = vector.load %arg11[%c0_205, %c0_206] : memref<512x128xf32, #tpu.memory_space<vmem>>, vector<512x128xf32>
    %cst_207 = arith.constant dense<0.000000e+00> : vector<8x128xf32>
    %203 = tpu.matmul %201, %202, %cst_207 {dimension_numbers = #tpu.dot_dimension_numbers<[1], [0], [0], [1], [0, 0, 1, 1], [], []>} : vector<8x512xf32>, vector<512x128xf32>, vector<8x128xf32> -> vector<8x128xf32>
    %c0_208 = arith.constant 0 : index
    %c0_209 = arith.constant 0 : index
    %204 = vector.load %arg12[%c0_208, %c0_209] : memref<1x128xf32, #tpu.memory_space<vmem>>, vector<1x128xf32>
    %205 = vector.broadcast %204 : vector<1x128xf32> to vector<8x128xf32>
    %206 = arith.addf %203, %205 : vector<8x128xf32>
    %c0_210 = arith.constant 0 : index
    %c0_211 = arith.constant 0 : index
    %207 = vector.load %arg13[%c0_210, %c0_211] : memref<8x128xf32, #tpu.memory_space<vmem>>, vector<8x128xf32>
    tpu.vector_store %arg13[%c0_210, %c0_211], %206 {strides = array<i32>} : memref<8x128xf32, #tpu.memory_space<vmem>>, vector<8x128xf32>,
    return
  }
}

</mosaic_0001>

<bundles_post_ra>
// kernel: dqn_forward.1
= control target key start
LH: loop header
LB: loop body
LE: loop exit
PB: predicated region body
PF: predicated region fallthrough
CT: control target
= control target key end

     0   :  { %vm1477_vm0 = vcmask 195584   ;;  %s5249_s1 = inlined_call_operand.vmem [shape: f32[256,128], index: 1, kind: input, shape index: {}]   ;;  %s5250_s2 = inlined_call_operand.vmem [shape: f32[1,128], index: 2, kind: input, shape index: {}]   ;;  %s5251_s0 = inlined_call_operand.vmem [shape: f32[128,256], index: 0, kind: input, shape index: {}]   ;;  %s5252_s3 = inlined_call_operand.vmem [shape: f32[16,24,128], index: 3, kind: input, shape index: {}]   ;;  %s5253_s4 = inlined_call_operand.vmem [shape: f32[16,128,128], index: 4, kind: input, shape index: {}]   ;;  %s5254_s5 = inlined_call_operand.vmem [shape: f32[1,128], index: 5, kind: input, shape index: {}]   ;;  %s5255_s7 = inlined_call_operand.vmem [shape: f32[9,128,128], index: 7, kind: input, shape index: {}]   ;;  %s5256_s6 = inlined_call_operand.vmem [shape: f32[9,8,24], index: 6, kind: input, shape index: {}]   ;;  %s5257_s8 = inlined_call_operand.vmem [shape: f32[1,128], index: 8, kind: input, shape index: {}]   ;;  %s5258_s9 = inlined_call_operand.vmem [shape: f32[128,512], index: 9, kind: input, shape index: {}]   ;;  %s5259_s11 = inlined_call_operand.vmem [shape: f32[512,128], index: 11, kind: input, shape index: {}]   ;;  %s5260_s10 = inlined_call_operand.vmem [shape: f32[1,512], index: 10, kind: input, shape index: {}]   ;;  %s5261_s12 = inlined_call_operand.vmem [shape: f32[1,128], index: 12, kind: input, shape index: {}]   ;;  %s5262_s13 = inlined_call_operand.vmem [shape: f32[8,128], index: 13, kind: output, shape index: {}]  }
   0x1   :  { %v91_v0 = vld [vmem:[%s5249_s1 + $0x78] sm:$0xff]  ;;  %v90_v1 = vld [vmem:[%s5249_s1 + $0x70] sm:$0xff]  ;;  %v89_v4 = vld [vmem:[%s5249_s1 + $0x68] sm:$0xff] }
   0x2   :  { %v107_v2 = vld [vmem:[%s5249_s1 + $0xf8] sm:$0xff]  ;;  %112 = vmatpush.msra.mxu0 %v91_v0  ;;  %v106_v3 = vld [vmem:[%s5249_s1 + $0xf0] sm:$0xff]  ;;  %v105_v5 = vld [vmem:[%s5249_s1 + $0xe8] sm:$0xff] }
   0x3   :  { %177 = vmatpush.msra.mxu1 %v107_v2  ;;  %v88_v6 = vld [vmem:[%s5249_s1 + $0x60] sm:$0xff]  ;;  %v87_v8 = vld [vmem:[%s5249_s1 + $0x58] sm:$0xff]  ;;  %v86_v10 = vld [vmem:[%s5249_s1 + $0x50] sm:$0xff] }
   0x4   :  { %113 = vmatpush.msra.mxu0 %v90_v1  ;;  %v104_v7 = vld [vmem:[%s5249_s1 + $0xe0] sm:$0xff]  ;;  %v103_v9 = vld [vmem:[%s5249_s1 + $0xd8] sm:$0xff]  ;;  %v102_v11 = vld [vmem:[%s5249_s1 + $0xd0] sm:$0xff] }
   0x5   :  { %178 = vmatpush.msra.mxu1 %v106_v3  ;;  %v85_v12 = vld [vmem:[%s5249_s1 + $0x48] sm:$0xff]  ;;  %v84_v14 = vld [vmem:[%s5249_s1 + $0x40] sm:$0xff]  ;;  %v83_v16 = vld [vmem:[%s5249_s1 + $0x38] sm:$0xff] }
   0x6   :  { %114 = vmatpush.msra.mxu0 %v89_v4  ;;  %v101_v13 = vld [vmem:[%s5249_s1 + $0xc8] sm:$0xff]  ;;  %v100_v15 = vld [vmem:[%s5249_s1 + $0xc0] sm:$0xff]  ;;  %v99_v17 = vld [vmem:[%s5249_s1 + $0xb8] sm:$0xff] }
   0x7   :  { %179 = vmatpush.msra.mxu1 %v105_v5  ;;  %v82_v18 = vld [vmem:[%s5249_s1 + $0x30] sm:$0xff]  ;;  %v81_v20 = vld [vmem:[%s5249_s1 + $0x28] sm:$0xff]  ;;  %v80_v22 = vld [vmem:[%s5249_s1 + $0x20] sm:$0xff] }
   0x8   :  { %115 = vmatpush.msra.mxu0 %v88_v6  ;;  %v98_v19 = vld [vmem:[%s5249_s1 + $0xb0] sm:$0xff]  ;;  %v97_v21 = vld [vmem:[%s5249_s1 + $0xa8] sm:$0xff]  ;;  %v96_v23 = vld [vmem:[%s5249_s1 + $0xa0] sm:$0xff] }
   0x9   :  { %180 = vmatpush.msra.mxu1 %v104_v7  ;;  %v79_v24 = vld [vmem:[%s5249_s1 + $0x18] sm:$0xff]  ;;  %v78_v26 = vld [vmem:[%s5249_s1 + $0x10] sm:$0xff]  ;;  %v77_v28 = vld [vmem:[%s5249_s1 + $0x8] sm:$0xff] }
   0xa   :  { %116 = vmatpush.msra.mxu0 %v87_v8  ;;  %v95_v25 = vld [vmem:[%s5249_s1 + $0x98] sm:$0xff]  ;;  %v94_v27 = vld [vmem:[%s5249_s1 + $0x90] sm:$0xff]  ;;  %v93_v29 = vld [vmem:[%s5249_s1 + $0x88] sm:$0xff] }
   0xb   :  { %181 = vmatpush.msra.mxu1 %v103_v9  ;;  %v76_v30 = vld [vmem:[%s5249_s1] sm:$0xff]  ;;  %v45_v33 = vld [vmem:[%s5251_s0 + $0x8] sm:$0xff]  ;;  %v46_v34 = vld [vmem:[%s5251_s0 + $0x10] sm:$0xff] }
   0xc   :  { %117 = vmatpush.msra.mxu0 %v86_v10  ;;  %v92_v31 = vld [vmem:[%s5249_s1 + $0x80] sm:$0xff]  ;;  %v47_v35 = vld [vmem:[%s5251_s0 + $0x18] sm:$0xff]  ;;  %v49_v37 = vld [vmem:[%s5251_s0 + $0x28] sm:$0xff] }
   0xd   :  { %182 = vmatpush.msra.mxu1 %v102_v11  ;;  %v44_v32 = vld [vmem:[%s5251_s0] sm:$0xff]  ;;  %v50_v38 = vld [vmem:[%s5251_s0 + $0x30] sm:$0xff]  ;;  %v51_v39 = vld [vmem:[%s5251_s0 + $0x38] sm:$0xff] }
   0xe   :  { %118 = vmatpush.msra.mxu0 %v85_v12  ;;  %v48_v36 = vld [vmem:[%s5251_s0 + $0x20] sm:$0xff]  ;;  %v53_v41 = vld [vmem:[%s5251_s0 + $0x48] sm:$0xff]  ;;  %v54_v42 = vld [vmem:[%s5251_s0 + $0x50] sm:$0xff] }
   0xf   :  { %183 = vmatpush.msra.mxu1 %v101_v13  ;;  %v52_v40 = vld [vmem:[%s5251_s0 + $0x40] sm:$0xff]  ;;  %v55_v43 = vld [vmem:[%s5251_s0 + $0x58] sm:$0xff]  ;;  %v57_v45 = vld [vmem:[%s5251_s0 + $0x68] sm:$0xff] }
  0x10   :  { %119 = vmatpush.msra.mxu0 %v84_v14  ;;  %v56_v44 = vld [vmem:[%s5251_s0 + $0x60] sm:$0xff]  ;;  %v58_v46 = vld [vmem:[%s5251_s0 + $0x70] sm:$0xff]  ;;  %v59_v47 = vld [vmem:[%s5251_s0 + $0x78] sm:$0xff] }
  0x11   :  { %184 = vmatpush.msra.mxu1 %v100_v15  ;;  %v60_v48 = vld [vmem:[%s5251_s0 + $0x80] sm:$0xff]  ;;  %v61_v49 = vld [vmem:[%s5251_s0 + $0x88] sm:$0xff]  ;;  %v62_v50 = vld [vmem:[%s5251_s0 + $0x90] sm:$0xff] }
  0x12   :  { %120 = vmatpush.msra.mxu0 %v83_v16  ;;  %v63_v51 = vld [vmem:[%s5251_s0 + $0x98] sm:$0xff]  ;;  %v64_v52 = vld [vmem:[%s5251_s0 + $0xa0] sm:$0xff]  ;;  %v65_v53 = vld [vmem:[%s5251_s0 + $0xa8] sm:$0xff] }
  0x13   :  { %185 = vmatpush.msra.mxu1 %v99_v17  ;;  %v66_v54 = vld [vmem:[%s5251_s0 + $0xb0] sm:$0xff]  ;;  %v67_v55 = vld [vmem:[%s5251_s0 + $0xb8] sm:$0xff]  ;;  %v68_v56 = vld [vmem:[%s5251_s0 + $0xc0] sm:$0xff] }
  0x14   :  { %121 = vmatpush.msra.mxu0 %v82_v18  ;;  %v69_v57 = vld [vmem:[%s5251_s0 + $0xc8] sm:$0xff]  ;;  %v70_v58 = vld [vmem:[%s5251_s0 + $0xd0] sm:$0xff]  ;;  %v71_v59 = vld [vmem:[%s5251_s0 + $0xd8] sm:$0xff] }
  0x15   :  { %186 = vmatpush.msra.mxu1 %v98_v19  ;;  %v72_v60 = vld [vmem:[%s5251_s0 + $0xe0] sm:$0xff]  ;;  %v73_v61 = vld [vmem:[%s5251_s0 + $0xe8] sm:$0xff]  ;;  %v74_v62 = vld [vmem:[%s5251_s0 + $0xf0] sm:$0xff] }
  0x16   :  { %122 = vmatpush.msra.mxu0 %v81_v20  ;;  %v75_v63 = vld [vmem:[%s5251_s0 + $0xf8] sm:$0xff] }
  0x17   :  { %187 = vmatpush.msra.mxu1 %v97_v21 }
  0x18   :  { %123 = vmatpush.msra.mxu0 %v80_v22 }
  0x19   :  { %188 = vmatpush.msra.mxu1 %v96_v23 }
  0x1a   :  { %124 = vmatpush.msra.mxu0 %v79_v24 }
  0x1b   :  { %189 = vmatpush.msra.mxu1 %v95_v25 }
  0x1c   :  { %125 = vmatpush.msra.mxu0 %v78_v26 }
  0x1d   :  { %190 = vmatpush.msra.mxu1 %v94_v27 }
  0x1e   :  { %126 = vmatpush.msra.mxu0 %v77_v28 }
  0x1f   :  { %191 = vmatpush.msra.mxu1 %v93_v29 }
  0x20   :  { %127 = vmatpush.msra.mxu0 %v76_v30  ;;  %v3080_v30 = vld [vmem:[%s5250_s2] ss:$0 sm:$0xff] }
  0x21   :  { %192 = vmatpush.msra.mxu1 %v92_v31  ;;  %128 = vmatmul.f32.vlgmr.msra.gmra.mxu0 %v44_v32 }
  0x22   :  { %193 = vmatmul.f32.vlgmr.msra.gmra.mxu1 %v45_v33 }
  0x29   :  { %131 = vmatmul.f32.gmra.mxu0 %v46_v34 }
  0x2a   :  { %196 = vmatmul.f32.gmra.mxu1 %v47_v35 }
  0x31   :  { %134 = vmatmul.f32.gmra.mxu0 %v48_v36 }
  0x32   :  { %199 = vmatmul.f32.gmra.mxu1 %v49_v37 }
  0x39   :  { %137 = vmatmul.f32.gmra.mxu0 %v50_v38 }
  0x3a   :  { %202 = vmatmul.f32.gmra.mxu1 %v51_v39 }
  0x41   :  { %140 = vmatmul.f32.gmra.mxu0 %v52_v40 }
  0x42   :  { %205 = vmatmul.f32.gmra.mxu1 %v53_v41 }
  0x49   :  { %143 = vmatmul.f32.gmra.mxu0 %v54_v42 }
  0x4a   :  { %208 = vmatmul.f32.gmra.mxu1 %v55_v43 }
  0x51   :  { %146 = vmatmul.f32.gmra.mxu0 %v56_v44 }
  0x52   :  { %211 = vmatmul.f32.gmra.mxu1 %v57_v45 }
  0x59   :  { %149 = vmatmul.f32.gmra.mxu0 %v58_v46 }
  0x5a   :  { %214 = vmatmul.f32.gmra.mxu1 %v59_v47 }
  0x61   :  { %152 = vmatmul.f32.gmra.mxu0 %v60_v48 }
  0x62   :  { %217 = vmatmul.f32.gmra.mxu1 %v61_v49 }
  0x69   :  { %155 = vmatmul.f32.gmra.mxu0 %v62_v50 }
  0x6a   :  { %220 = vmatmul.f32.gmra.mxu1 %v63_v51 }
  0x71   :  { %158 = vmatmul.f32.gmra.mxu0 %v64_v52 }
  0x72   :  { %223 = vmatmul.f32.gmra.mxu1 %v65_v53 }
  0x79   :  { %161 = vmatmul.f32.gmra.mxu0 %v66_v54 }
  0x7a   :  { %226 = vmatmul.f32.gmra.mxu1 %v67_v55 }
  0x81   :  { %164 = vmatmul.f32.gmra.mxu0 %v68_v56 }
  0x82   :  { %229 = vmatmul.f32.gmra.mxu1 %v69_v57 }
  0x89   :  { %167 = vmatmul.f32.gmra.mxu0 %v70_v58 }
  0x8a   :  { %232 = vmatmul.f32.gmra.mxu1 %v71_v59 }
  0x91   :  { %170 = vmatmul.f32.gmra.mxu0 %v72_v60 }
  0x92   :  { %235 = vmatmul.f32.gmra.mxu1 %v73_v61 }
  0x99   :  { %173 = vmatmul.f32.gmra.mxu0 %v74_v62 }
  0x9a   :  { %238 = vmatmul.f32.gmra.mxu1 %v75_v63 }
  0x9e   :  { %v3053_v0 = vpop.f32.mrf.mxu0 }
  0x9f   :  { %v3055_v1 = vpop.f32.mrf.mxu1 }
  0xa6   :  { %v3057_v2 = vpop.f32.mrf.mxu0 }
  0xa7   :  { %v3059_v3 = vpop.f32.mrf.mxu1 }
  0xae   :  { %v3061_v4 = vpop.f32.mrf.mxu0 }
  0xaf   :  { %v3063_v5 = vpop.f32.mrf.mxu1 }
  0xb6   :  { %v3065_v6 = vpop.f32.mrf.mxu0 }
  0xb7   :  { %v3067_v7 = vpop.f32.mrf.mxu1  ;;  %v139_v63 = vadd.f32 %v3080_v30, %v3065_v6  ;;  %v133_v6 = vadd.f32 %v3080_v30, %v3057_v2 }
  0xb9   :  { %v198_v2 = vadd.f32 %v3059_v3, %v133_v6  ;;  %v291_v6 = vld [vmem:[%s5253_s4 + $0x20] sm:$0xff] }
  0xbe   :  { %v3069_v8 = vpop.f32.mrf.mxu0 }
  0xbf   :  { %v3071_v9 = vpop.f32.mrf.mxu1  ;;  %v142_v60 = vadd.f32 %v3080_v30, %v3069_v8  ;;  %v136_v8 = vadd.f32 %v3080_v30, %v3061_v4  ;;  %v130_v4 = vadd.f32 %v3080_v30, %v3053_v0 }
  0xc1   :  { %v195_v0 = vadd.f32 %v3055_v1, %v130_v4  ;;  %v258_v1 = vld [vmem:[%s5252_s3] sm:$0xff]  ;;  %v290_v4 = vld [vmem:[%s5253_s4 + $0x18] sm:$0xff] }
  0xc3   :  { %v3182_v3 = vmax.f32 %v195_v0, 0.0  ;;  %v287_v0 = vld [vmem:[%s5253_s4] sm:$0xff] }
  0xc6   :  { %v144_v10 = vpop.f32.mrf.mxu0 }
  0xc7   :  { %v3073_v11 = vpop.f32.mrf.mxu1  ;;  %v145_v57 = vadd.f32 %v3080_v30, %v144_v10 }
  0xc9   :  { %v210_v10 = vadd.f32 %v3073_v11, %v145_v57  ;;  %v204_v11 = vadd.f32 %v3067_v7, %v139_v63  ;;  %v298_v57 = vld [vmem:[%s5253_s4 + $0x58] sm:$0xff]  ;;  %v2492_v63 = vld [vmem:[%s5252_s3 + $0xd0] sm:$0xff] }
  0xcb   :  { %v3166_v7 = vmax.f32 %v204_v11, 0.0  ;;  %v2528_v11 = vld [vmem:[%s5252_s3 + $0xf0] sm:$0xff] }
  0xce   :  { %v147_v12 = vpop.f32.mrf.mxu0 }
  0xcf   :  { %v3075_v13 = vpop.f32.mrf.mxu1  ;;  %v148_v54 = vadd.f32 %v3080_v30, %v147_v12 }
  0xd1   :  { %v213_v61 = vadd.f32 %v3075_v13, %v148_v54  ;;  %v207_v13 = vadd.f32 %v3071_v9, %v142_v60  ;;  %v201_v9 = vadd.f32 %v3063_v5, %v136_v8  ;;  %v299_v54 = vld [vmem:[%s5253_s4 + $0x60] sm:$0xff]  ;;  %v296_v60 = vld [vmem:[%s5253_s4 + $0x48] sm:$0xff]  ;;  %v293_v8 = vld [vmem:[%s5253_s4 + $0x30] sm:$0xff] }
  0xd3   :  { %v3172_v5 = vmax.f32 %v201_v9, 0.0  ;;  %v289_v9 = vld [vmem:[%s5253_s4 + $0x10] sm:$0xff] }
  0xd6   :  { %v150_v14 = vpop.f32.mrf.mxu0 }
  0xd7   :  { %v215_v15 = vpop.f32.mrf.mxu1  ;;  %v151_v51 = vadd.f32 %v3080_v30, %v150_v14  ;;  %v3144_v14 = vmax.f32 %v213_v61, 0.0  ;;  %v295_v61 = vld [vmem:[%s5253_s4 + $0x40] sm:$0xff] }
  0xd9   :  { %v216_v58 = vadd.f32 %v215_v15, %v151_v51  ;;  %v3152_v15 = vmax.f32 %v210_v10, 0.0  ;;  %v301_v51 = vld [vmem:[%s5253_s4 + $0x70] sm:$0xff]  ;;  %v294_v10 = vld [vmem:[%s5253_s4 + $0x38] sm:$0xff] }
  0xdb   :  { %v3136_v12 = vmax.f32 %v216_v58, 0.0  ;;  %v297_v58 = vld [vmem:[%s5253_s4 + $0x50] sm:$0xff] }
  0xde   :  { %v153_v16 = vpop.f32.mrf.mxu0 }
  0xdf   :  { %v218_v17 = vpop.f32.mrf.mxu1  ;;  %v154_v48 = vadd.f32 %v3080_v30, %v153_v16  ;;  %v3160_v16 = vmax.f32 %v207_v13, 0.0  ;;  %v292_v13 = vld [vmem:[%s5253_s4 + $0x28] sm:$0xff] }
  0xe1   :  { %v219_v55 = vadd.f32 %v218_v17, %v154_v48  ;;  %v3177_v17 = vmax.f32 %v198_v2, 0.0  ;;  %v2490_v48 = vld [vmem:[%s5252_s3 + $0xc0] sm:$0xff]  ;;  %v288_v2 = vld [vmem:[%s5253_s4 + $0x8] sm:$0xff] }
  0xe3   :  { %v3128_v62 = vmax.f32 %v219_v55, 0.0  ;;  %v2491_v55 = vld [vmem:[%s5252_s3 + $0xc8] sm:$0xff] }
  0xe6   :  { %v156_v18 = vpop.f32.mrf.mxu0 }
  0xe7   :  { %v221_v19 = vpop.f32.mrf.mxu1  ;;  %v157_v45 = vadd.f32 %v3080_v30, %v156_v18  ;;  %v2357_v18 = vld [vmem:[%s5252_s3 + $0x18] sm:$0xff] }
  0xe9   :  { %v222_v52 = vadd.f32 %v221_v19, %v157_v45  ;;  %v2375_v19 = vld [vmem:[%s5253_s4 + $0xf8] sm:$0xff] }
  0xea   :  { %v2453_v45 = vld [vmem:[%s5252_s3 + $0x98] sm:$0xff] }
  0xeb   :  { %v3120_v59 = vmax.f32 %v222_v52, 0.0  ;;  %v300_v52 = vld [vmem:[%s5253_s4 + $0x68] sm:$0xff] }
  0xee   :  { %v159_v20 = vpop.f32.mrf.mxu0 }
  0xef   :  { %v224_v21 = vpop.f32.mrf.mxu1  ;;  %v160_v42 = vadd.f32 %v3080_v30, %v159_v20  ;;  %v2374_v20 = vld [vmem:[%s5253_s4 + $0xf0] sm:$0xff] }
  0xf1   :  { %v225_v49 = vadd.f32 %v224_v21, %v160_v42  ;;  %v2414_v21 = vld [vmem:[%s5252_s3 + $0x60] sm:$0xff] }
  0xf2   :  { %v2360_v42 = vld [vmem:[%s5253_s4 + $0x80] sm:$0xff] }
  0xf3   :  { %v3114_v56 = vmax.f32 %v225_v49, 0.0  ;;  %v302_v49 = vld [vmem:[%s5253_s4 + $0x78] sm:$0xff] }
  0xf6   :  { %v162_v22 = vpop.f32.mrf.mxu0 }
  0xf7   :  { %v227_v23 = vpop.f32.mrf.mxu1  ;;  %v163_v39 = vadd.f32 %v3080_v30, %v162_v22  ;;  %v2373_v22 = vld [vmem:[%s5253_s4 + $0xe8] sm:$0xff] }
  0xf9   :  { %v228_v46 = vadd.f32 %v227_v23, %v163_v39  ;;  %v2372_v23 = vld [vmem:[%s5253_s4 + $0xe0] sm:$0xff]  ;;  %v2416_v39 = vld [vmem:[%s5252_s3 + $0x70] sm:$0xff] }
  0xfb   :  { %v3108_v53 = vmax.f32 %v228_v46, 0.0  ;;  %v2454_v46 = vld [vmem:[%s5252_s3 + $0xa0] sm:$0xff] }
  0xfe   :  { %v165_v24 = vpop.f32.mrf.mxu0 }
  0xff   :  { %v230_v25 = vpop.f32.mrf.mxu1  ;;  %v166_v36 = vadd.f32 %v3080_v30, %v165_v24  ;;  %v259_v24 = vld [vmem:[%s5252_s3 + $0x8] sm:$0xff] }
 0x101   :  { %v231_v43 = vadd.f32 %v230_v25, %v166_v36  ;;  %v2358_v25 = vld [vmem:[%s5252_s3 + $0x20] sm:$0xff] }
 0x102   :  { %v2364_v36 = vld [vmem:[%s5253_s4 + $0xa0] sm:$0xff] }
 0x103   :  { %v3102_v50 = vmax.f32 %v231_v43, 0.0  ;;  %v2452_v43 = vld [vmem:[%s5252_s3 + $0x90] sm:$0xff] }
 0x106   :  { %v168_v26 = vpop.f32.mrf.mxu0 }
 0x107   :  { %v233_v27 = vpop.f32.mrf.mxu1  ;;  %v169_v34 = vadd.f32 %v3080_v30, %v168_v26  ;;  %v2371_v26 = vld [vmem:[%s5253_s4 + $0xd8] sm:$0xff] }
 0x109   :  { %v234_v40 = vadd.f32 %v233_v27, %v169_v34  ;;  %v2370_v27 = vld [vmem:[%s5253_s4 + $0xd0] sm:$0xff]  ;;  %v2415_v34 = vld [vmem:[%s5252_s3 + $0x68] sm:$0xff] }
 0x10b   :  { %v3096_v47 = vmax.f32 %v234_v40, 0.0  ;;  %v2361_v40 = vld [vmem:[%s5253_s4 + $0x88] sm:$0xff] }
 0x10e   :  { %v171_v28 = vpop.f32.mrf.mxu0 }
 0x10f   :  { %v236_v29 = vpop.f32.mrf.mxu1  ;;  %v172_v31 = vadd.f32 %v3080_v30, %v171_v28  ;;  %v2369_v28 = vld [vmem:[%s5253_s4 + $0xc8] sm:$0xff] }
 0x111   :  { %v237_v37 = vadd.f32 %v236_v29, %v172_v31  ;;  %v2368_v29 = vld [vmem:[%s5253_s4 + $0xc0] sm:$0xff]  ;;  %v2359_v31 = vld [vmem:[%s5252_s3 + $0x28] sm:$0xff] }
 0x113   :  { %v3090_v44 = vmax.f32 %v237_v37, 0.0  ;;  %v2363_v37 = vld [vmem:[%s5253_s4 + $0x98] sm:$0xff] }
 0x116   :  { %v174_v32 = vpop.f32.mrf.mxu0 }
 0x117   :  { %v239_v33 = vpop.f32.mrf.mxu1  ;;  %v175_v35 = vadd.f32 %v3080_v30, %v174_v32  ;;  %v260_v30 = vld [vmem:[%s5252_s3 + $0x10] sm:$0xff]  ;;  %v2367_v32 = vld [vmem:[%s5253_s4 + $0xb8] sm:$0xff] }
 0x119   :  { %v240_v38 = vadd.f32 %v239_v33, %v175_v35  ;;  %v2366_v33 = vld [vmem:[%s5253_s4 + $0xb0] sm:$0xff]  ;;  %v2365_v35 = vld [vmem:[%s5253_s4 + $0xa8] sm:$0xff] }
 0x11b   :  { %v3087_v41 = vmax.f32 %v240_v38, 0.0  ;;  %v2362_v38 = vld [vmem:[%s5253_s4 + $0x90] sm:$0xff] }
 0x11d   :  { %261 = vmatpush.msra.mxu2 %v3087_v41  ;;  %307 = vmatpush.msra.mxu3 %v3087_v41 }
 0x11e   :  { %558 = vmatpush.msrb.mxu0 %v3087_v41 }
 0x11f   :  { %262 = vmatpush.msra.mxu2 %v3090_v44  ;;  %308 = vmatpush.msra.mxu3 %v3090_v44 }
 0x120   :  { %559 = vmatpush.msrb.mxu0 %v3090_v44 }
 0x121   :  { %263 = vmatpush.msra.mxu2 %v3096_v47  ;;  %309 = vmatpush.msra.mxu3 %v3096_v47 }
 0x122   :  { %560 = vmatpush.msrb.mxu0 %v3096_v47 }
 0x123   :  { %264 = vmatpush.msra.mxu2 %v3102_v50  ;;  %310 = vmatpush.msra.mxu3 %v3102_v50 }
 0x124   :  { %561 = vmatpush.msrb.mxu0 %v3102_v50 }
 0x125   :  { %265 = vmatpush.msra.mxu2 %v3108_v53  ;;  %311 = vmatpush.msra.mxu3 %v3108_v53 }
 0x126   :  { %562 = vmatpush.msrb.mxu0 %v3108_v53 }
 0x127   :  { %266 = vmatpush.msra.mxu2 %v3114_v56  ;;  %312 = vmatpush.msra.mxu3 %v3114_v56 }
 0x128   :  { %563 = vmatpush.msrb.mxu0 %v3114_v56 }
 0x129   :  { %267 = vmatpush.msra.mxu2 %v3120_v59  ;;  %313 = vmatpush.msra.mxu3 %v3120_v59 }
 0x12a   :  { %564 = vmatpush.msrb.mxu0 %v3120_v59 }
 0x12b   :  { %268 = vmatpush.msra.mxu2 %v3128_v62  ;;  %314 = vmatpush.msra.mxu3 %v3128_v62 }
 0x12c   :  { %565 = vmatpush.msrb.mxu0 %v3128_v62 }
 0x12d   :  { %269 = vmatpush.msra.mxu2 %v3136_v12  ;;  %315 = vmatpush.msra.mxu3 %v3136_v12 }
 0x12e   :  { %566 = vmatpush.msrb.mxu0 %v3136_v12 }
 0x12f   :  { %270 = vmatpush.msra.mxu2 %v3144_v14  ;;  %316 = vmatpush.msra.mxu3 %v3144_v14 }
 0x130   :  { %567 = vmatpush.msrb.mxu0 %v3144_v14 }
 0x131   :  { %271 = vmatpush.msra.mxu2 %v3152_v15  ;;  %317 = vmatpush.msra.mxu3 %v3152_v15 }
 0x132   :  { %568 = vmatpush.msrb.mxu0 %v3152_v15 }
 0x133   :  { %272 = vmatpush.msra.mxu2 %v3160_v16  ;;  %318 = vmatpush.msra.mxu3 %v3160_v16 }
 0x134   :  { %569 = vmatpush.msrb.mxu0 %v3160_v16 }
 0x135   :  { %273 = vmatpush.msra.mxu2 %v3166_v7  ;;  %319 = vmatpush.msra.mxu3 %v3166_v7 }
 0x136   :  { %570 = vmatpush.msrb.mxu0 %v3166_v7 }
 0x137   :  { %274 = vmatpush.msra.mxu2 %v3172_v5  ;;  %320 = vmatpush.msra.mxu3 %v3172_v5 }
 0x138   :  { %571 = vmatpush.msrb.mxu0 %v3172_v5 }
 0x139   :  { %275 = vmatpush.msra.mxu2 %v3177_v17  ;;  %321 = vmatpush.msra.mxu3 %v3177_v17 }
 0x13a   :  { %572 = vmatpush.msrb.mxu0 %v3177_v17 }
 0x13b   :  { %276 = vmatpush.msra.mxu2 %v3182_v3  ;;  %322 = vmatpush.msra.mxu3 %v3182_v3 }
 0x13c   :  { %573 = vmatpush.msrb.mxu0 %v3182_v3  ;;  %277 = vmatmul.f32.vlgmr.msra.gmra.mxu2 %v258_v1 }
 0x13d   :  { %323 = vmatmul.f32.vlgmr.msra.gmra.mxu3 %v2357_v18  ;;  %350 = vmatpush.msrb.mxu2 %v2375_v19 }
 0x13e   :  { %710 = vmatpush.msra.mxu0 %v3087_v41  ;;  %376 = vmatpush.msrb.mxu3 %v302_v49  ;;  %v2382_v49 = vld [vmem:[%s5253_s4 + $0x118] sm:$0xff] }
 0x13f   :  { %351 = vmatpush.msrb.mxu2 %v2374_v20  ;;  %574 = vmatmul.f32.vlgmr.msrb.gmra.mxu0 %v2414_v21 }
 0x140   :  { %711 = vmatpush.msra.mxu0 %v3090_v44  ;;  %377 = vmatpush.msrb.mxu3 %v301_v51  ;;  %v2381_v51 = vld [vmem:[%s5253_s4 + $0x110] sm:$0xff] }
 0x141   :  { %352 = vmatpush.msrb.mxu2 %v2373_v22 }
 0x142   :  { %712 = vmatpush.msra.mxu0 %v3096_v47  ;;  %378 = vmatpush.msrb.mxu3 %v300_v52  ;;  %v2380_v52 = vld [vmem:[%s5253_s4 + $0x108] sm:$0xff] }
 0x143   :  { %353 = vmatpush.msrb.mxu2 %v2372_v23  ;;  %v2376_v23 = vld [vmem:[%s5252_s3 + $0x30] sm:$0xff] }
 0x144   :  { %713 = vmatpush.msra.mxu0 %v3102_v50  ;;  %280 = vmatmul.f32.gmra.mxu2 %v259_v24  ;;  %v2377_v24 = vld [vmem:[%s5252_s3 + $0x38] sm:$0xff] }
 0x145   :  { %326 = vmatmul.f32.gmra.mxu3 %v2358_v25  ;;  %354 = vmatpush.msrb.mxu2 %v2371_v26  ;;  %v2378_v25 = vld [vmem:[%s5252_s3 + $0x40] sm:$0xff]  ;;  %v2395_v26 = vld [vmem:[%s5252_s3 + $0x48] sm:$0xff] }
 0x146   :  { %714 = vmatpush.msra.mxu0 %v3108_v53  ;;  %379 = vmatpush.msrb.mxu3 %v299_v54  ;;  %v2379_v54 = vld [vmem:[%s5253_s4 + $0x100] sm:$0xff] }
 0x147   :  { %355 = vmatpush.msrb.mxu2 %v2370_v27  ;;  %577 = vmatmul.f32.gmra.mxu0 %v2415_v34  ;;  %v2396_v27 = vld [vmem:[%s5252_s3 + $0x50] sm:$0xff]  ;;  %v2390_v34 = vld [vmem:[%s5253_s4 + $0x158] sm:$0xff] }
 0x148   :  { %715 = vmatpush.msra.mxu0 %v3114_v56  ;;  %380 = vmatpush.msrb.mxu3 %v298_v57  ;;  %v2431_v57 = vld [vmem:[%s5253_s4 + $0x270] sm:$0xff] }
 0x149   :  { %356 = vmatpush.msrb.mxu2 %v2369_v28  ;;  %v2397_v28 = vld [vmem:[%s5252_s3 + $0x58] sm:$0xff] }
 0x14a   :  { %716 = vmatpush.msra.mxu0 %v3120_v59  ;;  %381 = vmatpush.msrb.mxu3 %v297_v58  ;;  %v2472_v58 = vld [vmem:[%s5252_s3 + $0xb0] sm:$0xff] }
 0x14b   :  { %357 = vmatpush.msrb.mxu2 %v2368_v29  ;;  %v2394_v29 = vld [vmem:[%s5253_s4 + $0x178] sm:$0xff] }
 0x14c   :  { %717 = vmatpush.msra.mxu0 %v3128_v62  ;;  %283 = vmatmul.f32.gmra.mxu2 %v260_v30  ;;  %v2433_v30 = vld [vmem:[%s5252_s3 + $0x78] sm:$0xff] }
 0x14d   :  { %329 = vmatmul.f32.gmra.mxu3 %v2359_v31  ;;  %358 = vmatpush.msrb.mxu2 %v2367_v32  ;;  %v2393_v31 = vld [vmem:[%s5253_s4 + $0x170] sm:$0xff]  ;;  %v2392_v32 = vld [vmem:[%s5253_s4 + $0x168] sm:$0xff] }
 0x14e   :  { %718 = vmatpush.msra.mxu0 %v3136_v12  ;;  %382 = vmatpush.msrb.mxu3 %v296_v60  ;;  %v2412_v60 = vld [vmem:[%s5253_s4 + $0x1f0] sm:$0xff] }
 0x14f   :  { %359 = vmatpush.msrb.mxu2 %v2366_v33  ;;  %580 = vmatmul.f32.gmra.mxu0 %v2416_v39  ;;  %v2391_v33 = vld [vmem:[%s5253_s4 + $0x160] sm:$0xff]  ;;  %v2386_v39 = vld [vmem:[%s5253_s4 + $0x138] sm:$0xff] }
 0x150   :  { %719 = vmatpush.msra.mxu0 %v3144_v14  ;;  %383 = vmatpush.msrb.mxu3 %v295_v61  ;;  %v2411_v61 = vld [vmem:[%s5253_s4 + $0x1e8] sm:$0xff] }
 0x151   :  { %360 = vmatpush.msrb.mxu2 %v2365_v35  ;;  %v2434_v35 = vld [vmem:[%s5252_s3 + $0x80] sm:$0xff] }
 0x152   :  { %720 = vmatpush.msra.mxu0 %v3152_v15  ;;  %384 = vmatpush.msrb.mxu3 %v294_v10  ;;  %v2409_v10 = vld [vmem:[%s5253_s4 + $0x1d8] sm:$0xff] }
 0x153   :  { %361 = vmatpush.msrb.mxu2 %v2364_v36  ;;  %v2389_v36 = vld [vmem:[%s5253_s4 + $0x150] sm:$0xff] }
 0x154   :  { %721 = vmatpush.msra.mxu0 %v3160_v16  ;;  %385 = vmatpush.msrb.mxu3 %v293_v8  ;;  %v2430_v8 = vld [vmem:[%s5253_s4 + $0x268] sm:$0xff] }
 0x155   :  { %362 = vmatpush.msrb.mxu2 %v2363_v37  ;;  %v2388_v37 = vld [vmem:[%s5253_s4 + $0x148] sm:$0xff] }
 0x156   :  { %722 = vmatpush.msra.mxu0 %v3166_v7  ;;  %386 = vmatpush.msrb.mxu3 %v292_v13  ;;  %v2473_v13 = vld [vmem:[%s5252_s3 + $0xb8] sm:$0xff] }
 0x157   :  { %363 = vmatpush.msrb.mxu2 %v2362_v38  ;;  %v2387_v38 = vld [vmem:[%s5253_s4 + $0x140] sm:$0xff] }
 0x158   :  { %723 = vmatpush.msra.mxu0 %v3172_v5  ;;  %387 = vmatpush.msrb.mxu3 %v291_v6  ;;  %v2408_v6 = vld [vmem:[%s5253_s4 + $0x1d0] sm:$0xff] }
 0x159   :  { %364 = vmatpush.msrb.mxu2 %v2361_v40  ;;  %v2435_v40 = vld [vmem:[%s5252_s3 + $0x88] sm:$0xff] }
 0x15a   :  { %724 = vmatpush.msra.mxu0 %v3177_v17  ;;  %388 = vmatpush.msrb.mxu3 %v290_v4  ;;  %v2406_v4 = vld [vmem:[%s5253_s4 + $0x1c0] sm:$0xff] }
 0x15b   :  { %365 = vmatpush.msrb.mxu2 %v2360_v42  ;;  %v2385_v42 = vld [vmem:[%s5253_s4 + $0x130] sm:$0xff] }
 0x15c   :  { %725 = vmatpush.msra.mxu0 %v3182_v3  ;;  %389 = vmatpush.msrb.mxu3 %v289_v9  ;;  %v2429_v9 = vld [vmem:[%s5253_s4 + $0x260] sm:$0xff] }
 0x15d   :  { %406 = vmatpush.msra.mxu2 %v3087_v41  ;;  %726 = vmatmul.f32.vlgmr.msra.gmra.mxu0 %v2452_v43  ;;  %v2384_v43 = vld [vmem:[%s5253_s4 + $0x128] sm:$0xff] }
 0x15e   :  { %862 = vmatpush.msrb.mxu0 %v3087_v41  ;;  %390 = vmatpush.msrb.mxu3 %v288_v2  ;;  %v2529_v2 = vld [vmem:[%s5252_s3 + $0xf8] sm:$0xff] }
 0x15f   :  { %407 = vmatpush.msra.mxu2 %v3090_v44 }
 0x160   :  { %863 = vmatpush.msrb.mxu0 %v3090_v44  ;;  %391 = vmatpush.msrb.mxu3 %v287_v0  ;;  %v2405_v0 = vld [vmem:[%s5253_s4 + $0x1b8] sm:$0xff] }
 0x161   :  { %408 = vmatpush.msra.mxu2 %v3096_v47 }
 0x162   :  { %864 = vmatpush.msrb.mxu0 %v3096_v47  ;;  %449 = vmatpush.msra.mxu3 %v2394_v29  ;;  %v2423_v29 = vld [vmem:[%s5253_s4 + $0x230] sm:$0xff] }
 0x163   :  { %409 = vmatpush.msra.mxu2 %v3102_v50 }
 0x164   :  { %865 = vmatpush.msrb.mxu0 %v3102_v50  ;;  %450 = vmatpush.msra.mxu3 %v2393_v31  ;;  %v2510_v31 = vld [vmem:[%s5252_s3 + $0xe0] sm:$0xff] }
 0x165   :  { %410 = vmatpush.msra.mxu2 %v3108_v53  ;;  %729 = vmatmul.f32.gmra.mxu0 %v2453_v45  ;;  %v2383_v45 = vld [vmem:[%s5253_s4 + $0x120] sm:$0xff] }
 0x166   :  { %866 = vmatpush.msrb.mxu0 %v3108_v53  ;;  %451 = vmatpush.msra.mxu3 %v2392_v32  ;;  %v2399_v32 = vld [vmem:[%s5253_s4 + $0x188] sm:$0xff] }
 0x167   :  { %411 = vmatpush.msra.mxu2 %v3114_v56 }
 0x168   :  { %867 = vmatpush.msrb.mxu0 %v3114_v56  ;;  %452 = vmatpush.msra.mxu3 %v2391_v33  ;;  %v2422_v33 = vld [vmem:[%s5253_s4 + $0x228] sm:$0xff] }
 0x169   :  { %412 = vmatpush.msra.mxu2 %v3120_v59 }
 0x16a   :  { %868 = vmatpush.msrb.mxu0 %v3120_v59  ;;  %453 = vmatpush.msra.mxu3 %v2390_v34  ;;  %v2398_v34 = vld [vmem:[%s5253_s4 + $0x180] sm:$0xff] }
 0x16b   :  { %413 = vmatpush.msra.mxu2 %v3128_v62 }
 0x16c   :  { %869 = vmatpush.msrb.mxu0 %v3128_v62  ;;  %454 = vmatpush.msra.mxu3 %v2389_v36  ;;  %v2420_v36 = vld [vmem:[%s5253_s4 + $0x218] sm:$0xff] }
 0x16d   :  { %414 = vmatpush.msra.mxu2 %v3136_v12  ;;  %732 = vmatmul.f32.gmra.mxu0 %v2454_v46  ;;  %v2432_v46 = vld [vmem:[%s5253_s4 + $0x278] sm:$0xff] }
 0x16e   :  { %870 = vmatpush.msrb.mxu0 %v3136_v12  ;;  %455 = vmatpush.msra.mxu3 %v2388_v37  ;;  %v2419_v37 = vld [vmem:[%s5253_s4 + $0x210] sm:$0xff] }
 0x16f   :  { %415 = vmatpush.msra.mxu2 %v3144_v14  ;;  %601 = vmatpush.msrb.mxu1 %v2432_v46  ;;  %v2469_v46 = vld [vmem:[%s5253_s4 + $0x370] sm:$0xff] }
 0x170   :  { %871 = vmatpush.msrb.mxu0 %v3144_v14  ;;  %456 = vmatpush.msra.mxu3 %v2387_v38 }
 0x171   :  { %416 = vmatpush.msra.mxu2 %v3152_v15  ;;  %602 = vmatpush.msrb.mxu1 %v2431_v57  ;;  %v2464_v57 = vld [vmem:[%s5253_s4 + $0x348] sm:$0xff] }
 0x172   :  { %872 = vmatpush.msrb.mxu0 %v3152_v15  ;;  %457 = vmatpush.msra.mxu3 %v2386_v39  ;;  %v2511_v39 = vld [vmem:[%s5252_s3 + $0xe8] sm:$0xff] }
 0x173   :  { %417 = vmatpush.msra.mxu2 %v3160_v16  ;;  %603 = vmatpush.msrb.mxu1 %v2430_v8  ;;  %v2568_v8 = vld [vmem:[%s5252_s3 + $0x130] sm:$0xff] }
 0x174   :  { %873 = vmatpush.msrb.mxu0 %v3160_v16  ;;  %458 = vmatpush.msra.mxu3 %v2385_v42  ;;  %v2566_v42 = vld [vmem:[%s5252_s3 + $0x120] sm:$0xff] }
 0x175   :  { %418 = vmatpush.msra.mxu2 %v3166_v7  ;;  %604 = vmatpush.msrb.mxu1 %v2429_v9  ;;  %v2461_v9 = vld [vmem:[%s5253_s4 + $0x330] sm:$0xff] }
 0x176   :  { %874 = vmatpush.msrb.mxu0 %v3166_v7  ;;  %459 = vmatpush.msra.mxu3 %v2384_v43  ;;  %v2417_v43 = vld [vmem:[%s5253_s4 + $0x200] sm:$0xff] }
 0x177   :  { %419 = vmatpush.msra.mxu2 %v3172_v5 }
 0x178   :  { %875 = vmatpush.msrb.mxu0 %v3172_v5  ;;  %460 = vmatpush.msra.mxu3 %v2383_v45  ;;  %v2470_v45 = vld [vmem:[%s5253_s4 + $0x378] sm:$0xff] }
 0x179   :  { %420 = vmatpush.msra.mxu2 %v3177_v17 }
 0x17a   :  { %876 = vmatpush.msrb.mxu0 %v3177_v17  ;;  %461 = vmatpush.msra.mxu3 %v2382_v49 }
 0x17b   :  { %421 = vmatpush.msra.mxu2 %v3182_v3 }
 0x17c   :  { %877 = vmatpush.msrb.mxu0 %v3182_v3  ;;  %462 = vmatpush.msra.mxu3 %v2381_v51  ;;  %v2467_v51 = vld [vmem:[%s5253_s4 + $0x360] sm:$0xff] }
 0x17d   :  { %878 = vmatmul.f32.vlgmr.msrb.gmra.mxu0 %v2490_v48  ;;  %v2471_v48 = vld [vmem:[%s5252_s3 + $0xa8] sm:$0xff] }
 0x17e   :  { %1014 = vmatpush.msra.mxu0 %v3087_v41  ;;  %463 = vmatpush.msra.mxu3 %v2380_v52  ;;  %v2567_v52 = vld [vmem:[%s5252_s3 + $0x128] sm:$0xff] }
 0x180   :  { %1015 = vmatpush.msra.mxu0 %v3090_v44  ;;  %464 = vmatpush.msra.mxu3 %v2379_v54  ;;  %v2466_v54 = vld [vmem:[%s5253_s4 + $0x358] sm:$0xff] }
 0x182   :  { %1016 = vmatpush.msra.mxu0 %v3096_v47 }
 0x184   :  { %1017 = vmatpush.msra.mxu0 %v3102_v50 }
 0x185   :  { %881 = vmatmul.f32.gmra.mxu0 %v2491_v55  ;;  %v2413_v55 = vld [vmem:[%s5253_s4 + $0x1f8] sm:$0xff] }
 0x186   :  { %1018 = vmatpush.msra.mxu0 %v3108_v53 }
 0x188   :  { %1019 = vmatpush.msra.mxu0 %v3114_v56 }
 0x18a   :  { %1020 = vmatpush.msra.mxu0 %v3120_v59 }
 0x18c   :  { %1021 = vmatpush.msra.mxu0 %v3128_v62 }
 0x18d   :  { %884 = vmatmul.f32.gmra.mxu0 %v2492_v63  ;;  %v2410_v63 = vld [vmem:[%s5253_s4 + $0x1e0] sm:$0xff] }
 0x18e   :  { %1022 = vmatpush.msra.mxu0 %v3136_v12 }
 0x190   :  { %1023 = vmatpush.msra.mxu0 %v3144_v14 }
 0x192   :  { %1024 = vmatpush.msra.mxu0 %v3152_v15 }
 0x194   :  { %1025 = vmatpush.msra.mxu0 %v3160_v16 }
 0x196   :  { %1026 = vmatpush.msra.mxu0 %v3166_v7 }
 0x198   :  { %1027 = vmatpush.msra.mxu0 %v3172_v5 }
 0x19a   :  { %1028 = vmatpush.msra.mxu0 %v3177_v17 }
 0x19c   :  { %1029 = vmatpush.msra.mxu0 %v3182_v3 }
 0x19d   :  { %1030 = vmatmul.f32.vlgmr.msra.gmra.mxu0 %v2528_v11  ;;  %v2407_v11 = vld [vmem:[%s5253_s4 + $0x1c8] sm:$0xff] }
 0x19e   :  { %1166 = vmatpush.msrb.mxu0 %v3087_v41 }
 0x1a0   :  { %1167 = vmatpush.msrb.mxu0 %v3090_v44 }
 0x1a2   :  { %1168 = vmatpush.msrb.mxu0 %v3096_v47 }
 0x1a4   :  { %1169 = vmatpush.msrb.mxu0 %v3102_v50 }
 0x1a5   :  { %1033 = vmatmul.f32.gmra.mxu0 %v2529_v2  ;;  %v2548_v2 = vld [vmem:[%s5252_s3 + $0x110] sm:$0xff] }
 0x1a6   :  { %1170 = vmatpush.msrb.mxu0 %v3108_v53 }
 0x1a8   :  { %1171 = vmatpush.msrb.mxu0 %v3114_v56 }
 0x1aa   :  { %1172 = vmatpush.msrb.mxu0 %v3120_v59 }
 0x1ac   :  { %1173 = vmatpush.msrb.mxu0 %v3128_v62 }
 0x1ae   :  { %1174 = vmatpush.msrb.mxu0 %v3136_v12 }
 0x1b0   :  { %1175 = vmatpush.msrb.mxu0 %v3144_v14 }
 0x1b2   :  { %1176 = vmatpush.msrb.mxu0 %v3152_v15 }
 0x1b4   :  { %1177 = vmatpush.msrb.mxu0 %v3160_v16 }
 0x1b6   :  { %1178 = vmatpush.msrb.mxu0 %v3166_v7 }
 0x1b8   :  { %1179 = vmatpush.msrb.mxu0 %v3172_v5 }
 0x1ba   :  { %1180 = vmatpush.msrb.mxu0 %v3177_v17 }
 0x1bc   :  { %1181 = vmatpush.msrb.mxu0 %v3182_v3 }
 0x1be   :  { %1318 = vmatpush.msra.mxu0 %v3087_v41 }
 0x1bf   :  { %v278_v1 = vpop.f32.mrf.mxu2 }
 0x1c0   :  { %1319 = vmatpush.msra.mxu0 %v3090_v44  ;;  %v324_v18 = vpop.f32.mrf.mxu3  ;;  %392 = vmatmul.f32.vlgmr.msrb.gmra.mxu3 %v278_v1  ;;  %v2428_v1 = vld [vmem:[%s5253_s4 + $0x258] sm:$0xff] }
 0x1c1   :  { %366 = vmatmul.f32.vlgmr.msrb.gmra.mxu2 %v324_v18  ;;  %525 = vmatpush.msrb.mxu3 %v2413_v55  ;;  %v2404_v18 = vld [vmem:[%s5253_s4 + $0x1b0] sm:$0xff] }
 0x1c2   :  { %1320 = vmatpush.msra.mxu0 %v3096_v47  ;;  %482 = vmatpush.msrb.mxu2 %v3087_v41  ;;  %v2465_v55 = vld [vmem:[%s5253_s4 + $0x350] sm:$0xff] }
 0x1c3   :  { %526 = vmatpush.msrb.mxu3 %v2412_v60  ;;  %605 = vmatpush.msrb.mxu1 %v2428_v1 }
 0x1c4   :  { %1321 = vmatpush.msra.mxu0 %v3102_v50  ;;  %483 = vmatpush.msrb.mxu2 %v3090_v44 }
 0x1c5   :  { %527 = vmatpush.msrb.mxu3 %v2411_v61  ;;  %v2547_v61 = vld [vmem:[%s5252_s3 + $0x108] sm:$0xff] }
 0x1c6   :  { %1322 = vmatpush.msra.mxu0 %v3108_v53  ;;  %484 = vmatpush.msrb.mxu2 %v3096_v47 }
 0x1c7   :  { %v281_v19 = vpop.f32.mrf.mxu2  ;;  %528 = vmatpush.msrb.mxu3 %v2410_v63  ;;  %v2463_v63 = vld [vmem:[%s5253_s4 + $0x340] sm:$0xff] }
 0x1c8   :  { %1323 = vmatpush.msra.mxu0 %v3114_v56  ;;  %485 = vmatpush.msrb.mxu2 %v3102_v50  ;;  %v327_v20 = vpop.f32.mrf.mxu3 }
 0x1c9   :  { %369 = vmatmul.f32.gmra.mxu2 %v327_v20  ;;  %395 = vmatmul.f32.gmra.mxu3 %v281_v19  ;;  %v2427_v19 = vld [vmem:[%s5253_s4 + $0x250] sm:$0xff]  ;;  %v2403_v20 = vld [vmem:[%s5253_s4 + $0x1a8] sm:$0xff] }
 0x1ca   :  { %1324 = vmatpush.msra.mxu0 %v3120_v59  ;;  %486 = vmatpush.msrb.mxu2 %v3108_v53 }
 0x1cb   :  { %529 = vmatpush.msrb.mxu3 %v2409_v10  ;;  %606 = vmatpush.msrb.mxu1 %v2427_v19  ;;  %v2450_v10 = vld [vmem:[%s5253_s4 + $0x2f0] sm:$0xff] }
 0x1cc   :  { %1325 = vmatpush.msra.mxu0 %v3128_v62  ;;  %487 = vmatpush.msrb.mxu2 %v3114_v56  ;;  %v2446_v19 = vld [vmem:[%s5253_s4 + $0x2d0] sm:$0xff] }
 0x1cd   :  { %530 = vmatpush.msrb.mxu3 %v2408_v6  ;;  %v575_v6 = vpop.f32.mrf.mxu0 }
 0x1ce   :  { %1326 = vmatpush.msra.mxu0 %v3136_v12  ;;  %488 = vmatpush.msrb.mxu2 %v3120_v59 }
 0x1cf   :  { %v284_v21 = vpop.f32.mrf.mxu2  ;;  %531 = vmatpush.msrb.mxu3 %v2407_v11  ;;  %v2462_v11 = vld [vmem:[%s5253_s4 + $0x338] sm:$0xff] }
 0x1d0   :  { %1327 = vmatpush.msra.mxu0 %v3144_v14  ;;  %489 = vmatpush.msrb.mxu2 %v3128_v62  ;;  %v330_v22 = vpop.f32.mrf.mxu3 }
 0x1d1   :  { %372 = vmatmul.f32.gmra.mxu2 %v330_v22  ;;  %398 = vmatmul.f32.gmra.mxu3 %v284_v21  ;;  %v2426_v21 = vld [vmem:[%s5253_s4 + $0x248] sm:$0xff]  ;;  %v2509_v22 = vld [vmem:[%s5252_s3 + $0xd8] sm:$0xff] }
 0x1d2   :  { %1328 = vmatpush.msra.mxu0 %v3152_v15  ;;  %490 = vmatpush.msrb.mxu2 %v3136_v12 }
 0x1d3   :  { %532 = vmatpush.msrb.mxu3 %v2406_v4  ;;  %607 = vmatpush.msrb.mxu1 %v2426_v21  ;;  %v2448_v4 = vld [vmem:[%s5253_s4 + $0x2e0] sm:$0xff]  ;;  %v2445_v21 = vld [vmem:[%s5253_s4 + $0x2c8] sm:$0xff] }
 0x1d4   :  { %1329 = vmatpush.msra.mxu0 %v3160_v16  ;;  %491 = vmatpush.msrb.mxu2 %v3144_v14 }
 0x1d5   :  { %533 = vmatpush.msrb.mxu3 %v2405_v0  ;;  %v2447_v0 = vld [vmem:[%s5253_s4 + $0x2d8] sm:$0xff] }
 0x1d6   :  { %1330 = vmatpush.msra.mxu0 %v3166_v7  ;;  %492 = vmatpush.msrb.mxu2 %v3152_v15 }
 0x1d7   :  { %534 = vmatpush.msrb.mxu3 %v2404_v18  ;;  %v2460_v18 = vld [vmem:[%s5253_s4 + $0x328] sm:$0xff] }
 0x1d8   :  { %1331 = vmatpush.msra.mxu0 %v3172_v5  ;;  %493 = vmatpush.msrb.mxu2 %v3160_v16 }
 0x1d9   :  { %422 = vmatmul.f32.vlgmr.msra.gmra.mxu2 %v2376_v23  ;;  %535 = vmatpush.msrb.mxu3 %v2403_v20  ;;  %v2402_v23 = vld [vmem:[%s5253_s4 + $0x1a0] sm:$0xff] }
 0x1da   :  { %1332 = vmatpush.msra.mxu0 %v3177_v17  ;;  %494 = vmatpush.msrb.mxu2 %v3166_v7  ;;  %v2459_v20 = vld [vmem:[%s5253_s4 + $0x320] sm:$0xff] }
 0x1db   :  { %536 = vmatpush.msrb.mxu3 %v2402_v23  ;;  %v2458_v23 = vld [vmem:[%s5253_s4 + $0x318] sm:$0xff] }
 0x1dc   :  { %1333 = vmatpush.msra.mxu0 %v3182_v3  ;;  %495 = vmatpush.msrb.mxu2 %v3172_v5 }
 0x1de   :  { %496 = vmatpush.msrb.mxu2 %v3177_v17 }
 0x1e0   :  { %497 = vmatpush.msrb.mxu2 %v3182_v3 }
 0x1e1   :  { %425 = vmatmul.f32.gmra.mxu2 %v2377_v24  ;;  %v2425_v24 = vld [vmem:[%s5253_s4 + $0x240] sm:$0xff] }
 0x1e2   :  { %634 = vmatpush.msra.mxu2 %v3087_v41  ;;  %608 = vmatpush.msrb.mxu1 %v2425_v24  ;;  %v2444_v24 = vld [vmem:[%s5253_s4 + $0x2c0] sm:$0xff] }
 0x1e4   :  { %635 = vmatpush.msra.mxu2 %v3090_v44 }
 0x1e6   :  { %636 = vmatpush.msra.mxu2 %v3096_v47 }
 0x1e8   :  { %637 = vmatpush.msra.mxu2 %v3102_v50 }
 0x1e9   :  { %428 = vmatmul.f32.gmra.mxu2 %v2378_v25  ;;  %v2530_v25 = vld [vmem:[%s5252_s3 + $0x100] sm:$0xff] }
 0x1ea   :  { %638 = vmatpush.msra.mxu2 %v3108_v53  ;;  %1036 = vmatmul.f32.gmra.mxu0 %v2530_v25  ;;  %v2549_v25 = vld [vmem:[%s5252_s3 + $0x118] sm:$0xff] }
 0x1ec   :  { %639 = vmatpush.msra.mxu2 %v3114_v56 }
 0x1ee   :  { %640 = vmatpush.msra.mxu2 %v3120_v59 }
 0x1f0   :  { %641 = vmatpush.msra.mxu2 %v3128_v62 }
 0x1f1   :  { %498 = vmatmul.f32.vlgmr.msrb.gmra.mxu2 %v2395_v26  ;;  %v2401_v26 = vld [vmem:[%s5253_s4 + $0x198] sm:$0xff] }
 0x1f2   :  { %642 = vmatpush.msra.mxu2 %v3136_v12  ;;  %537 = vmatpush.msrb.mxu3 %v2401_v26  ;;  %v2443_v26 = vld [vmem:[%s5253_s4 + $0x2b8] sm:$0xff] }
 0x1f3   :  { %1182 = vmatmul.f32.vlgmr.msrb.gmra.mxu0 %v2566_v42 }
 0x1f4   :  { %643 = vmatpush.msra.mxu2 %v3144_v14 }
 0x1f6   :  { %644 = vmatpush.msra.mxu2 %v3152_v15 }
 0x1f8   :  { %645 = vmatpush.msra.mxu2 %v3160_v16 }
 0x1f9   :  { %501 = vmatmul.f32.gmra.mxu2 %v2396_v27  ;;  %v2424_v27 = vld [vmem:[%s5253_s4 + $0x238] sm:$0xff] }
 0x1fa   :  { %646 = vmatpush.msra.mxu2 %v3166_v7  ;;  %609 = vmatpush.msrb.mxu1 %v2424_v27  ;;  %v2604_v27 = vld [vmem:[%s5252_s3 + $0x150] sm:$0xff] }
 0x1fb   :  { %1185 = vmatmul.f32.gmra.mxu0 %v2567_v52 }
 0x1fc   :  { %647 = vmatpush.msra.mxu2 %v3172_v5  ;;  %610 = vmatpush.msrb.mxu1 %v2423_v29  ;;  %v2457_v29 = vld [vmem:[%s5253_s4 + $0x310] sm:$0xff] }
 0x1fe   :  { %648 = vmatpush.msra.mxu2 %v3177_v17  ;;  %611 = vmatpush.msrb.mxu1 %v2422_v33  ;;  %v2441_v33 = vld [vmem:[%s5253_s4 + $0x2a8] sm:$0xff] }
 0x200   :  { %649 = vmatpush.msra.mxu2 %v3182_v3 }
 0x201   :  { %504 = vmatmul.f32.gmra.mxu2 %v2397_v28  ;;  %v2400_v28 = vld [vmem:[%s5253_s4 + $0x190] sm:$0xff] }
 0x202   :  { %786 = vmatpush.msrb.mxu2 %v3087_v41  ;;  %538 = vmatpush.msrb.mxu3 %v2400_v28 }
 0x203   :  { %1188 = vmatmul.f32.gmra.mxu0 %v2568_v8  ;;  %v2502_v8 = vld [vmem:[%s5253_s4 + $0x448] sm:$0xff] }
 0x204   :  { %787 = vmatpush.msrb.mxu2 %v3090_v44  ;;  %539 = vmatpush.msrb.mxu3 %v2399_v32  ;;  %v2456_v32 = vld [vmem:[%s5253_s4 + $0x308] sm:$0xff] }
 0x206   :  { %788 = vmatpush.msrb.mxu2 %v3096_v47  ;;  %540 = vmatpush.msrb.mxu3 %v2398_v34 }
 0x208   :  { %789 = vmatpush.msrb.mxu2 %v3102_v50 }
 0x209   :  { %650 = vmatmul.f32.vlgmr.msra.gmra.mxu2 %v2433_v30 }
 0x20a   :  { %790 = vmatpush.msrb.mxu2 %v3108_v53 }
 0x20b   :  { %1334 = vmatmul.f32.vlgmr.msra.gmra.mxu0 %v2604_v27 }
 0x20c   :  { %791 = vmatpush.msrb.mxu2 %v3114_v56 }
 0x20e   :  { %792 = vmatpush.msrb.mxu2 %v3120_v59 }
 0x210   :  { %793 = vmatpush.msrb.mxu2 %v3128_v62 }
 0x211   :  { %653 = vmatmul.f32.gmra.mxu2 %v2434_v35  ;;  %v2421_v35 = vld [vmem:[%s5253_s4 + $0x220] sm:$0xff] }
 0x212   :  { %794 = vmatpush.msrb.mxu2 %v3136_v12  ;;  %612 = vmatpush.msrb.mxu1 %v2421_v35  ;;  %v2455_v35 = vld [vmem:[%s5253_s4 + $0x300] sm:$0xff] }
 0x214   :  { %795 = vmatpush.msrb.mxu2 %v3144_v14  ;;  %613 = vmatpush.msrb.mxu1 %v2420_v36  ;;  %v2440_v36 = vld [vmem:[%s5253_s4 + $0x2a0] sm:$0xff] }
 0x216   :  { %796 = vmatpush.msrb.mxu2 %v3152_v15  ;;  %614 = vmatpush.msrb.mxu1 %v2419_v37  ;;  %v2508_v37 = vld [vmem:[%s5253_s4 + $0x478] sm:$0xff] }
 0x218   :  { %797 = vmatpush.msrb.mxu2 %v3160_v16 }
 0x219   :  { %656 = vmatmul.f32.gmra.mxu2 %v2435_v40  ;;  %v2418_v40 = vld [vmem:[%s5253_s4 + $0x208] sm:$0xff] }
 0x21a   :  { %798 = vmatpush.msrb.mxu2 %v3166_v7  ;;  %615 = vmatpush.msrb.mxu1 %v2418_v40  ;;  %v2507_v40 = vld [vmem:[%s5253_s4 + $0x470] sm:$0xff] }
 0x21c   :  { %799 = vmatpush.msrb.mxu2 %v3172_v5  ;;  %616 = vmatpush.msrb.mxu1 %v2417_v43  ;;  %v2605_v43 = vld [vmem:[%s5252_s3 + $0x158] sm:$0xff] }
 0x21d   :  { %617 = vmatmul.f32.vlgmr.msrb.gmra.mxu1 %v575_v6  ;;  %1337 = vmatmul.f32.gmra.mxu0 %v2605_v43  ;;  %v2540_v43 = vld [vmem:[%s5253_s4 + $0x548] sm:$0xff] }
 0x21e   :  { %800 = vmatpush.msrb.mxu2 %v3177_v17  ;;  %753 = vmatpush.msra.mxu1 %v2470_v45  ;;  %v2438_v45 = vld [vmem:[%s5253_s4 + $0x290] sm:$0xff] }
 0x220   :  { %801 = vmatpush.msrb.mxu2 %v3182_v3  ;;  %754 = vmatpush.msra.mxu1 %v2469_v46  ;;  %v2506_v46 = vld [vmem:[%s5253_s4 + $0x468] sm:$0xff] }
 0x221   :  { %802 = vmatmul.f32.vlgmr.msrb.gmra.mxu2 %v2471_v48  ;;  %v2468_v48 = vld [vmem:[%s5253_s4 + $0x368] sm:$0xff] }
 0x222   :  { %938 = vmatpush.msra.mxu2 %v3087_v41  ;;  %755 = vmatpush.msra.mxu1 %v2468_v48  ;;  %v2437_v48 = vld [vmem:[%s5253_s4 + $0x288] sm:$0xff] }
 0x224   :  { %939 = vmatpush.msra.mxu2 %v3090_v44  ;;  %756 = vmatpush.msra.mxu1 %v2467_v51  ;;  %v2505_v51 = vld [vmem:[%s5253_s4 + $0x460] sm:$0xff] }
 0x226   :  { %940 = vmatpush.msra.mxu2 %v3096_v47  ;;  %757 = vmatpush.msra.mxu1 %v2466_v54  ;;  %v2436_v54 = vld [vmem:[%s5253_s4 + $0x280] sm:$0xff] }
 0x228   :  { %941 = vmatpush.msra.mxu2 %v3102_v50  ;;  %758 = vmatpush.msra.mxu1 %v2465_v55  ;;  %v2504_v55 = vld [vmem:[%s5253_s4 + $0x458] sm:$0xff] }
 0x229   :  { %805 = vmatmul.f32.gmra.mxu2 %v2472_v58  ;;  %v2451_v58 = vld [vmem:[%s5253_s4 + $0x2f8] sm:$0xff] }
 0x22a   :  { %942 = vmatpush.msra.mxu2 %v3108_v53  ;;  %759 = vmatpush.msra.mxu1 %v2464_v57  ;;  %v2585_v57 = vld [vmem:[%s5252_s3 + $0x138] sm:$0xff] }
 0x22c   :  { %943 = vmatpush.msra.mxu2 %v3114_v56  ;;  %760 = vmatpush.msra.mxu1 %v2463_v63  ;;  %v2488_v63 = vld [vmem:[%s5253_s4 + $0x3f0] sm:$0xff] }
 0x22e   :  { %944 = vmatpush.msra.mxu2 %v3120_v59  ;;  %761 = vmatpush.msra.mxu1 %v2462_v11  ;;  %v2501_v11 = vld [vmem:[%s5253_s4 + $0x440] sm:$0xff] }
 0x230   :  { %945 = vmatpush.msra.mxu2 %v3128_v62  ;;  %762 = vmatpush.msra.mxu1 %v2461_v9  ;;  %v2485_v9 = vld [vmem:[%s5253_s4 + $0x3d8] sm:$0xff] }
 0x231   :  { %808 = vmatmul.f32.gmra.mxu2 %v2473_v13  ;;  %v2449_v13 = vld [vmem:[%s5253_s4 + $0x2e8] sm:$0xff] }
 0x232   :  { %946 = vmatpush.msra.mxu2 %v3136_v12  ;;  %763 = vmatpush.msra.mxu1 %v2460_v18  ;;  %v2482_v18 = vld [vmem:[%s5253_s4 + $0x3c0] sm:$0xff] }
 0x234   :  { %947 = vmatpush.msra.mxu2 %v3144_v14  ;;  %764 = vmatpush.msra.mxu1 %v2459_v20  ;;  %v2481_v20 = vld [vmem:[%s5253_s4 + $0x3b8] sm:$0xff] }
 0x236   :  { %948 = vmatpush.msra.mxu2 %v3152_v15  ;;  %765 = vmatpush.msra.mxu1 %v2458_v23  ;;  %v2479_v23 = vld [vmem:[%s5253_s4 + $0x3a8] sm:$0xff] }
 0x238   :  { %949 = vmatpush.msra.mxu2 %v3160_v16  ;;  %766 = vmatpush.msra.mxu1 %v2457_v29  ;;  %v2545_v29 = vld [vmem:[%s5253_s4 + $0x570] sm:$0xff] }
 0x23a   :  { %950 = vmatpush.msra.mxu2 %v3166_v7  ;;  %767 = vmatpush.msra.mxu1 %v2456_v32  ;;  %v2527_v32 = vld [vmem:[%s5253_s4 + $0x4f8] sm:$0xff] }
 0x23c   :  { %951 = vmatpush.msra.mxu2 %v3172_v5  ;;  %768 = vmatpush.msra.mxu1 %v2455_v35  ;;  %v2543_v35 = vld [vmem:[%s5253_s4 + $0x560] sm:$0xff] }
 0x23e   :  { %952 = vmatpush.msra.mxu2 %v3177_v17  ;;  %905 = vmatpush.msrb.mxu1 %v2508_v37  ;;  %v2524_v37 = vld [vmem:[%s5253_s4 + $0x4e0] sm:$0xff] }
 0x240   :  { %953 = vmatpush.msra.mxu2 %v3182_v3  ;;  %906 = vmatpush.msrb.mxu1 %v2507_v40  ;;  %v2624_v40 = vld [vmem:[%s5252_s3 + $0x170] sm:$0xff] }
 0x241   :  { %954 = vmatmul.f32.vlgmr.msra.gmra.mxu2 %v2509_v22  ;;  %v578_v22 = vpop.f32.mrf.mxu0 }
 0x242   :  { %1090 = vmatpush.msrb.mxu2 %v3087_v41  ;;  %620 = vmatmul.f32.gmra.mxu1 %v578_v22  ;;  %v2496_v22 = vld [vmem:[%s5253_s4 + $0x418] sm:$0xff] }
 0x243   :  { %907 = vmatpush.msrb.mxu1 %v2506_v46  ;;  %v2522_v46 = vld [vmem:[%s5253_s4 + $0x4d0] sm:$0xff] }
 0x244   :  { %1091 = vmatpush.msrb.mxu2 %v3090_v44  ;;  %v3662_v30 = vpop.f32.mrf.mxu2 }
 0x245   :  { %908 = vmatpush.msrb.mxu1 %v2505_v51 }
 0x246   :  { %1092 = vmatpush.msrb.mxu2 %v3096_v47 }
 0x247   :  { %909 = vmatpush.msrb.mxu1 %v2504_v55  ;;  %v2520_v55 = vld [vmem:[%s5253_s4 + $0x4c0] sm:$0xff] }
 0x248   :  { %1093 = vmatpush.msrb.mxu2 %v3102_v50 }
 0x249   :  { %957 = vmatmul.f32.gmra.mxu2 %v2510_v31  ;;  %v2442_v31 = vld [vmem:[%s5253_s4 + $0x2b0] sm:$0xff]  ;;  %v581_v34 = vpop.f32.mrf.mxu0 }
 0x24a   :  { %1094 = vmatpush.msrb.mxu2 %v3108_v53  ;;  %623 = vmatmul.f32.gmra.mxu1 %v581_v34 }
 0x24c   :  { %1095 = vmatpush.msrb.mxu2 %v3114_v56  ;;  %v3689_v38 = vpop.f32.mrf.mxu2 }
 0x24e   :  { %1096 = vmatpush.msrb.mxu2 %v3120_v59 }
 0x250   :  { %1097 = vmatpush.msrb.mxu2 %v3128_v62 }
 0x251   :  { %960 = vmatmul.f32.gmra.mxu2 %v2511_v39  ;;  %v2439_v39 = vld [vmem:[%s5253_s4 + $0x298] sm:$0xff]  ;;  %v727_v52 = vpop.f32.mrf.mxu0 }
 0x252   :  { %1098 = vmatpush.msrb.mxu2 %v3136_v12  ;;  %769 = vmatmul.f32.vlgmr.msra.gmra.mxu1 %v727_v52  ;;  %v2521_v52 = vld [vmem:[%s5253_s4 + $0x4c8] sm:$0xff] }
 0x254   :  { %1099 = vmatpush.msrb.mxu2 %v3144_v14  ;;  %v3716_v49 = vpop.f32.mrf.mxu2 }
 0x256   :  { %1100 = vmatpush.msrb.mxu2 %v3152_v15 }
 0x258   :  { %1101 = vmatpush.msrb.mxu2 %v3160_v16 }
 0x259   :  { %v730_v6 = vpop.f32.mrf.mxu0 }
 0x25a   :  { %1102 = vmatpush.msrb.mxu2 %v3166_v7  ;;  %772 = vmatmul.f32.gmra.mxu1 %v730_v6  ;;  %v2534_v6 = vld [vmem:[%s5253_s4 + $0x518] sm:$0xff] }
 0x25c   :  { %1103 = vmatpush.msrb.mxu2 %v3172_v5  ;;  %v423_v60 = vpop.f32.mrf.mxu2 }
 0x25d   :  { %465 = vmatmul.f32.vlgmr.msra.gmra.mxu3 %v423_v60 }
 0x25e   :  { %1104 = vmatpush.msrb.mxu2 %v3177_v17  ;;  %677 = vmatpush.msra.mxu3 %v2451_v58  ;;  %v2489_v58 = vld [vmem:[%s5253_s4 + $0x3f8] sm:$0xff] }
 0x260   :  { %1105 = vmatpush.msrb.mxu2 %v3182_v3  ;;  %678 = vmatpush.msra.mxu3 %v2450_v10  ;;  %v2606_v10 = vld [vmem:[%s5252_s3 + $0x160] sm:$0xff] }
 0x261   :  { %1106 = vmatmul.f32.vlgmr.msrb.gmra.mxu2 %v2547_v61  ;;  %v2503_v61 = vld [vmem:[%s5253_s4 + $0x450] sm:$0xff]  ;;  %1340 = vmatmul.f32.gmra.mxu0 %v2606_v10 }
 0x262   :  { %1242 = vmatpush.msra.mxu2 %v3087_v41  ;;  %679 = vmatpush.msra.mxu3 %v2449_v13  ;;  %v2487_v13 = vld [vmem:[%s5253_s4 + $0x3e8] sm:$0xff]  ;;  %v2518_v10 = vld [vmem:[%s5253_s4 + $0x4b0] sm:$0xff] }
 0x263   :  { %910 = vmatpush.msrb.mxu1 %v2503_v61  ;;  %v2536_v61 = vld [vmem:[%s5253_s4 + $0x528] sm:$0xff] }
 0x264   :  { %1243 = vmatpush.msra.mxu2 %v3090_v44  ;;  %680 = vmatpush.msra.mxu3 %v2448_v4  ;;  %v426_v1 = vpop.f32.mrf.mxu2  ;;  %v2486_v4 = vld [vmem:[%s5253_s4 + $0x3e0] sm:$0xff] }
 0x265   :  { %468 = vmatmul.f32.gmra.mxu3 %v426_v1  ;;  %911 = vmatpush.msrb.mxu1 %v2502_v8  ;;  %v2483_v1 = vld [vmem:[%s5253_s4 + $0x3c8] sm:$0xff]  ;;  %v2535_v8 = vld [vmem:[%s5253_s4 + $0x520] sm:$0xff] }
 0x266   :  { %1244 = vmatpush.msra.mxu2 %v3096_v47  ;;  %681 = vmatpush.msra.mxu3 %v2447_v0  ;;  %v2499_v0 = vld [vmem:[%s5253_s4 + $0x430] sm:$0xff] }
 0x267   :  { %912 = vmatpush.msrb.mxu1 %v2501_v11  ;;  %v2516_v11 = vld [vmem:[%s5253_s4 + $0x4a0] sm:$0xff] }
 0x268   :  { %1245 = vmatpush.msra.mxu2 %v3102_v50  ;;  %682 = vmatpush.msra.mxu3 %v2446_v19  ;;  %v733_v19 = vpop.f32.mrf.mxu0 }
 0x269   :  { %1109 = vmatmul.f32.gmra.mxu2 %v2548_v2  ;;  %775 = vmatmul.f32.gmra.mxu1 %v733_v19  ;;  %v2583_v19 = vld [vmem:[%s5253_s4 + $0x670] sm:$0xff] }
 0x26a   :  { %1246 = vmatpush.msra.mxu2 %v3108_v53  ;;  %683 = vmatpush.msra.mxu3 %v2445_v21 }
 0x26c   :  { %1247 = vmatpush.msra.mxu2 %v3114_v56  ;;  %v429_v28 = vpop.f32.mrf.mxu2  ;;  %684 = vmatpush.msra.mxu3 %v2444_v24  ;;  %v2478_v24 = vld [vmem:[%s5253_s4 + $0x3a0] sm:$0xff] }
 0x26d   :  { %471 = vmatmul.f32.gmra.mxu3 %v429_v28  ;;  %v2546_v28 = vld [vmem:[%s5253_s4 + $0x578] sm:$0xff] }
 0x26e   :  { %1248 = vmatpush.msra.mxu2 %v3120_v59  ;;  %685 = vmatpush.msra.mxu3 %v2443_v26 }
 0x270   :  { %1249 = vmatpush.msra.mxu2 %v3128_v62  ;;  %686 = vmatpush.msra.mxu3 %v2442_v31  ;;  %v879_v26 = vpop.f32.mrf.mxu0  ;;  %v2474_v31 = vld [vmem:[%s5253_s4 + $0x380] sm:$0xff] }
 0x271   :  { %1112 = vmatmul.f32.gmra.mxu2 %v2549_v25  ;;  %v2494_v25 = vld [vmem:[%s5253_s4 + $0x408] sm:$0xff] }
 0x272   :  { %1250 = vmatpush.msra.mxu2 %v3136_v12  ;;  %687 = vmatpush.msra.mxu3 %v2441_v33 }
 0x274   :  { %1251 = vmatpush.msra.mxu2 %v3144_v14  ;;  %v499_v42 = vpop.f32.mrf.mxu2  ;;  %688 = vmatpush.msra.mxu3 %v2440_v36  ;;  %v2525_v36 = vld [vmem:[%s5253_s4 + $0x4e8] sm:$0xff] }
 0x275   :  { %541 = vmatmul.f32.vlgmr.msrb.gmra.mxu3 %v499_v42  ;;  %v2523_v42 = vld [vmem:[%s5253_s4 + $0x4d8] sm:$0xff] }
 0x276   :  { %1252 = vmatpush.msra.mxu2 %v3152_v15  ;;  %689 = vmatpush.msra.mxu3 %v2439_v39  ;;  %v2541_v39 = vld [vmem:[%s5253_s4 + $0x550] sm:$0xff] }
 0x278   :  { %1253 = vmatpush.msra.mxu2 %v3160_v16  ;;  %690 = vmatpush.msra.mxu3 %v2438_v45  ;;  %v882_v34 = vpop.f32.mrf.mxu0 }
 0x27a   :  { %1254 = vmatpush.msra.mxu2 %v3166_v7  ;;  %691 = vmatpush.msra.mxu3 %v2437_v48  ;;  %v2539_v48 = vld [vmem:[%s5253_s4 + $0x540] sm:$0xff] }
 0x27c   :  { %1255 = vmatpush.msra.mxu2 %v3172_v5  ;;  %v502_v60 = vpop.f32.mrf.mxu2  ;;  %692 = vmatpush.msra.mxu3 %v2436_v54  ;;  %v2538_v54 = vld [vmem:[%s5253_s4 + $0x538] sm:$0xff] }
 0x27d   :  { %544 = vmatmul.f32.gmra.mxu3 %v502_v60  ;;  %v2519_v60 = vld [vmem:[%s5253_s4 + $0x4b8] sm:$0xff] }
 0x27e   :  { %1256 = vmatpush.msra.mxu2 %v3177_v17  ;;  %829 = vmatpush.msrb.mxu3 %v2489_v58  ;;  %v2625_v58 = vld [vmem:[%s5252_s3 + $0x178] sm:$0xff] }
 0x280   :  { %1257 = vmatpush.msra.mxu2 %v3182_v3  ;;  %830 = vmatpush.msrb.mxu3 %v2488_v63  ;;  %v885_v51 = vpop.f32.mrf.mxu0 }
 0x281   :  { %1258 = vmatmul.f32.vlgmr.msra.gmra.mxu2 %v2585_v57  ;;  %v2537_v57 = vld [vmem:[%s5253_s4 + $0x530] sm:$0xff] }
 0x282   :  { %1394 = vmatpush.msrb.mxu2 %v3087_v41  ;;  %831 = vmatpush.msrb.mxu3 %v2487_v13  ;;  %v2586_v41 = vld [vmem:[%s5252_s3 + $0x140] sm:$0xff]  ;;  %v2517_v13 = vld [vmem:[%s5253_s4 + $0x4a8] sm:$0xff] }
 0x284   :  { %1395 = vmatpush.msrb.mxu2 %v3090_v44  ;;  %v505_v2 = vpop.f32.mrf.mxu2  ;;  %832 = vmatpush.msrb.mxu3 %v2486_v4  ;;  %v2500_v44 = vld [vmem:[%s5253_s4 + $0x438] sm:$0xff]  ;;  %v2533_v4 = vld [vmem:[%s5253_s4 + $0x510] sm:$0xff] }
 0x285   :  { %547 = vmatmul.f32.gmra.mxu3 %v505_v2  ;;  %913 = vmatpush.msrb.mxu1 %v2500_v44  ;;  %v2532_v2 = vld [vmem:[%s5253_s4 + $0x508] sm:$0xff] }
 0x286   :  { %1396 = vmatpush.msrb.mxu2 %v3096_v47  ;;  %v2484_v47 = vld [vmem:[%s5253_s4 + $0x3d0] sm:$0xff]  ;;  %833 = vmatpush.msrb.mxu3 %v2485_v9  ;;  %v2515_v9 = vld [vmem:[%s5253_s4 + $0x498] sm:$0xff] }
 0x287   :  { %914 = vmatpush.msrb.mxu1 %v2499_v0  ;;  %v2531_v0 = vld [vmem:[%s5253_s4 + $0x500] sm:$0xff] }
 0x288   :  { %1397 = vmatpush.msrb.mxu2 %v3102_v50  ;;  %834 = vmatpush.msrb.mxu3 %v2484_v47  ;;  %v2498_v50 = vld [vmem:[%s5253_s4 + $0x428] sm:$0xff]  ;;  %v2514_v47 = vld [vmem:[%s5253_s4 + $0x490] sm:$0xff] }
 0x289   :  { %1261 = vmatmul.f32.gmra.mxu2 %v2586_v41  ;;  %915 = vmatpush.msrb.mxu1 %v2498_v50  ;;  %v1031_v41 = vpop.f32.mrf.mxu0  ;;  %v2584_v50 = vld [vmem:[%s5253_s4 + $0x678] sm:$0xff] }
 0x28a   :  { %1398 = vmatpush.msrb.mxu2 %v3108_v53  ;;  %835 = vmatpush.msrb.mxu3 %v2483_v1  ;;  %v2587_v53 = vld [vmem:[%s5252_s3 + $0x148] sm:$0xff] }
 0x28b   :  { %v2513_v1 = vld [vmem:[%s5253_s4 + $0x488] sm:$0xff] }
 0x28c   :  { %1399 = vmatpush.msrb.mxu2 %v3114_v56  ;;  %v651_v21 = vpop.f32.mrf.mxu2  ;;  %836 = vmatpush.msrb.mxu3 %v2482_v18  ;;  %v2497_v56 = vld [vmem:[%s5253_s4 + $0x420] sm:$0xff] }
 0x28d   :  { %693 = vmatmul.f32.vlgmr.msra.gmra.mxu3 %v651_v21  ;;  %916 = vmatpush.msrb.mxu1 %v2497_v56  ;;  %v2512_v18 = vld [vmem:[%s5253_s4 + $0x480] sm:$0xff]  ;;  %v2564_v21 = vld [vmem:[%s5253_s4 + $0x5f0] sm:$0xff] }
 0x28e   :  { %1400 = vmatpush.msrb.mxu2 %v3120_v59  ;;  %v2480_v59 = vld [vmem:[%s5253_s4 + $0x3b0] sm:$0xff]  ;;  %837 = vmatpush.msrb.mxu3 %v2481_v20  ;;  %v2582_v20 = vld [vmem:[%s5253_s4 + $0x668] sm:$0xff] }
 0x28f   :  { %917 = vmatpush.msrb.mxu1 %v2496_v22  ;;  %v2563_v22 = vld [vmem:[%s5253_s4 + $0x5e8] sm:$0xff] }
 0x290   :  { %1401 = vmatpush.msrb.mxu2 %v3128_v62  ;;  %838 = vmatpush.msrb.mxu3 %v2480_v59  ;;  %v2495_v62 = vld [vmem:[%s5253_s4 + $0x410] sm:$0xff]  ;;  %v2581_v59 = vld [vmem:[%s5253_s4 + $0x660] sm:$0xff] }
 0x291   :  { %1264 = vmatmul.f32.gmra.mxu2 %v2587_v53  ;;  %918 = vmatpush.msrb.mxu1 %v2495_v62  ;;  %v2565_v53 = vld [vmem:[%s5253_s4 + $0x5f8] sm:$0xff]  ;;  %v1034_v56 = vpop.f32.mrf.mxu0 }
 0x292   :  { %1402 = vmatpush.msrb.mxu2 %v3136_v12  ;;  %839 = vmatpush.msrb.mxu3 %v2479_v23  ;;  %v2477_v12 = vld [vmem:[%s5253_s4 + $0x398] sm:$0xff] }
 0x293   :  { %919 = vmatpush.msrb.mxu1 %v2494_v25  ;;  %v2580_v23 = vld [vmem:[%s5253_s4 + $0x658] sm:$0xff] }
 0x294   :  { %1403 = vmatpush.msrb.mxu2 %v3144_v14  ;;  %v654_v27 = vpop.f32.mrf.mxu2  ;;  %840 = vmatpush.msrb.mxu3 %v2478_v24  ;;  %v2476_v14 = vld [vmem:[%s5253_s4 + $0x390] sm:$0xff]  ;;  %v2562_v24 = vld [vmem:[%s5253_s4 + $0x5e0] sm:$0xff]  ;;  %v2561_v25 = vld [vmem:[%s5253_s4 + $0x5d8] sm:$0xff] }
 0x295   :  { %696 = vmatmul.f32.gmra.mxu3 %v654_v27  ;;  %v4112_v27 = vpop.f32.mrf.mxu3 }
 0x296   :  { %1404 = vmatpush.msrb.mxu2 %v3152_v15  ;;  %v2493_v15 = vld [vmem:[%s5253_s4 + $0x400] sm:$0xff]  ;;  %841 = vmatpush.msrb.mxu3 %v2477_v12  ;;  %v2579_v12 = vld [vmem:[%s5253_s4 + $0x650] sm:$0xff] }
 0x297   :  { %920 = vmatpush.msrb.mxu1 %v2493_v15  ;;  %v2577_v15 = vld [vmem:[%s5253_s4 + $0x640] sm:$0xff] }
 0x298   :  { %1405 = vmatpush.msrb.mxu2 %v3160_v16  ;;  %v2475_v16 = vld [vmem:[%s5253_s4 + $0x388] sm:$0xff]  ;;  %842 = vmatpush.msrb.mxu3 %v2476_v14  ;;  %v2560_v14 = vld [vmem:[%s5253_s4 + $0x5d0] sm:$0xff] }
 0x299   :  { %1057 = vmatpush.msra.mxu1 %v2546_v28  ;;  %v1037_v28 = vpop.f32.mrf.mxu0 }
 0x29a   :  { %1406 = vmatpush.msrb.mxu2 %v3166_v7  ;;  %843 = vmatpush.msrb.mxu3 %v2475_v16  ;;  %v2623_v7 = vld [vmem:[%s5252_s3 + $0x168] sm:$0xff] }
 0x29b   :  { %921 = vmatmul.f32.vlgmr.msrb.gmra.mxu1 %v879_v26  ;;  %v2578_v26 = vld [vmem:[%s5253_s4 + $0x648] sm:$0xff] }
 0x29c   :  { %1407 = vmatpush.msrb.mxu2 %v3172_v5  ;;  %1058 = vmatpush.msra.mxu1 %v2545_v29  ;;  %v657_v33 = vpop.f32.mrf.mxu2  ;;  %v2544_v5 = vld [vmem:[%s5253_s4 + $0x568] sm:$0xff]  ;;  %v2576_v29 = vld [vmem:[%s5253_s4 + $0x638] sm:$0xff] }
 0x29d   :  { %844 = vmatpush.msrb.mxu3 %v2474_v31  ;;  %v2559_v16 = vld [vmem:[%s5253_s4 + $0x5c8] sm:$0xff] }
 0x29e   :  { %1408 = vmatpush.msrb.mxu2 %v3177_v17  ;;  %699 = vmatmul.f32.gmra.mxu3 %v657_v33  ;;  %v2526_v17 = vld [vmem:[%s5253_s4 + $0x4f0] sm:$0xff]  ;;  %v2557_v33 = vld [vmem:[%s5253_s4 + $0x5b8] sm:$0xff] }
 0x29f   :  { %981 = vmatpush.msra.mxu3 %v2527_v32  ;;  %1059 = vmatpush.msra.mxu1 %v2544_v5  ;;  %v2575_v32 = vld [vmem:[%s5253_s4 + $0x630] sm:$0xff]  ;;  %v2574_v5 = vld [vmem:[%s5253_s4 + $0x628] sm:$0xff] }
 0x2a0   :  { %1409 = vmatpush.msrb.mxu2 %v3182_v3  ;;  %v2542_v3 = vld [vmem:[%s5253_s4 + $0x558] sm:$0xff] }
 0x2a1   :  { %1410 = vmatmul.f32.vlgmr.msrb.gmra.mxu2 %v2623_v7  ;;  %982 = vmatpush.msra.mxu3 %v2526_v17  ;;  %v2558_v7 = vld [vmem:[%s5253_s4 + $0x5c0] sm:$0xff]  ;;  %v4138_v17 = vpop.f32.mrf.mxu3 }
 0x2a2   :  { %1060 = vmatpush.msra.mxu1 %v2543_v35  ;;  %v2573_v35 = vld [vmem:[%s5253_s4 + $0x620] sm:$0xff] }
 0x2a3   :  { %983 = vmatpush.msra.mxu3 %v2525_v36  ;;  %924 = vmatmul.f32.gmra.mxu1 %v882_v34  ;;  %v2556_v34 = vld [vmem:[%s5253_s4 + $0x5b0] sm:$0xff]  ;;  %v2555_v36 = vld [vmem:[%s5253_s4 + $0x5a8] sm:$0xff] }
 0x2a4   :  { %1061 = vmatpush.msra.mxu1 %v2542_v3  ;;  %v803_v45 = vpop.f32.mrf.mxu2  ;;  %v2572_v3 = vld [vmem:[%s5253_s4 + $0x618] sm:$0xff] }
 0x2a5   :  { %984 = vmatpush.msra.mxu3 %v2524_v37 }
 0x2a6   :  { %1062 = vmatpush.msra.mxu1 %v2541_v39  ;;  %845 = vmatmul.f32.vlgmr.msrb.gmra.mxu3 %v803_v45  ;;  %v2554_v39 = vld [vmem:[%s5253_s4 + $0x5a0] sm:$0xff]  ;;  %v2570_v45 = vld [vmem:[%s5253_s4 + $0x608] sm:$0xff] }
 0x2a7   :  { %985 = vmatpush.msra.mxu3 %v2523_v42  ;;  %v1183_v42 = vpop.f32.mrf.mxu0 }
 0x2a8   :  { %1063 = vmatpush.msra.mxu1 %v2540_v43  ;;  %v2553_v43 = vld [vmem:[%s5253_s4 + $0x598] sm:$0xff] }
 0x2a9   :  { %1413 = vmatmul.f32.gmra.mxu2 %v2624_v40  ;;  %986 = vmatpush.msra.mxu3 %v2522_v46  ;;  %v2571_v40 = vld [vmem:[%s5253_s4 + $0x610] sm:$0xff] }
 0x2aa   :  { %1064 = vmatpush.msra.mxu1 %v2539_v48  ;;  %v2552_v46 = vld [vmem:[%s5253_s4 + $0x590] sm:$0xff]  ;;  %v2569_v48 = vld [vmem:[%s5253_s4 + $0x600] sm:$0xff] }
 0x2ab   :  { %927 = vmatmul.f32.gmra.mxu1 %v885_v51  ;;  %987 = vmatpush.msra.mxu3 %v2521_v52  ;;  %v4170_v51 = vpop.f32.mrf.mxu3  ;;  %v2551_v52 = vld [vmem:[%s5253_s4 + $0x588] sm:$0xff] }
 0x2ac   :  { %1065 = vmatpush.msra.mxu1 %v2538_v54  ;;  %v806_v63 = vpop.f32.mrf.mxu2  ;;  %v2622_v54 = vld [vmem:[%s5253_s4 + $0x778] sm:$0xff] }
 0x2ad   :  { %988 = vmatpush.msra.mxu3 %v2520_v55  ;;  %v2550_v55 = vld [vmem:[%s5253_s4 + $0x580] sm:$0xff] }
 0x2ae   :  { %1066 = vmatpush.msra.mxu1 %v2537_v57  ;;  %848 = vmatmul.f32.gmra.mxu3 %v806_v63  ;;  %v2621_v57 = vld [vmem:[%s5253_s4 + $0x770] sm:$0xff] }
 0x2af   :  { %989 = vmatpush.msra.mxu3 %v2519_v60  ;;  %v2620_v60 = vld [vmem:[%s5253_s4 + $0x768] sm:$0xff]  ;;  %v1186_v63 = vpop.f32.mrf.mxu0 }
 0x2b0   :  { %1067 = vmatpush.msra.mxu1 %v2536_v61  ;;  %v2602_v61 = vld [vmem:[%s5253_s4 + $0x6f0] sm:$0xff] }
 0x2b1   :  { %1416 = vmatmul.f32.gmra.mxu2 %v2625_v58  ;;  %990 = vmatpush.msra.mxu3 %v2518_v10  ;;  %v2603_v58 = vld [vmem:[%s5253_s4 + $0x6f8] sm:$0xff]  ;;  %v2619_v10 = vld [vmem:[%s5253_s4 + $0x760] sm:$0xff] }
 0x2b2   :  { %1068 = vmatpush.msra.mxu1 %v2535_v8 }
 0x2b3   :  { %991 = vmatpush.msra.mxu3 %v2517_v13  ;;  %v2601_v13 = vld [vmem:[%s5253_s4 + $0x6e8] sm:$0xff] }
 0x2b4   :  { %1069 = vmatpush.msra.mxu1 %v2534_v6  ;;  %v809_v44 = vpop.f32.mrf.mxu2  ;;  %v2618_v6 = vld [vmem:[%s5253_s4 + $0x758] sm:$0xff] }
 0x2b5   :  { %992 = vmatpush.msra.mxu3 %v2516_v11 }
 0x2b6   :  { %1070 = vmatpush.msra.mxu1 %v2533_v4  ;;  %851 = vmatmul.f32.gmra.mxu3 %v809_v44  ;;  %v2600_v4 = vld [vmem:[%s5253_s4 + $0x6e0] sm:$0xff]  ;;  %v2598_v44 = vld [vmem:[%s5253_s4 + $0x6d0] sm:$0xff] }
 0x2b7   :  { %993 = vmatpush.msra.mxu3 %v2515_v9  ;;  %v2599_v9 = vld [vmem:[%s5253_s4 + $0x6d8] sm:$0xff] }
 0x2b8   :  { %1071 = vmatpush.msra.mxu1 %v2532_v2  ;;  %v2616_v2 = vld [vmem:[%s5253_s4 + $0x748] sm:$0xff] }
 0x2b9   :  { %994 = vmatpush.msra.mxu3 %v2514_v47  ;;  %v2615_v47 = vld [vmem:[%s5253_s4 + $0x740] sm:$0xff] }
 0x2ba   :  { %1072 = vmatpush.msra.mxu1 %v2531_v0  ;;  %v1189_v0 = vpop.f32.mrf.mxu0 }
 0x2bb   :  { %1073 = vmatmul.f32.vlgmr.msra.gmra.mxu1 %v1031_v41  ;;  %995 = vmatpush.msra.mxu3 %v2513_v1  ;;  %v2617_v41 = vld [vmem:[%s5253_s4 + $0x750] sm:$0xff] }
 0x2bc   :  { %1209 = vmatpush.msrb.mxu1 %v2584_v50  ;;  %v2597_v50 = vld [vmem:[%s5253_s4 + $0x6c8] sm:$0xff] }
 0x2bd   :  { %996 = vmatpush.msra.mxu3 %v2512_v18  ;;  %v2614_v18 = vld [vmem:[%s5253_s4 + $0x738] sm:$0xff] }
 0x2be   :  { %1210 = vmatpush.msrb.mxu1 %v2583_v19 }
 0x2bf   :  { %1133 = vmatpush.msrb.mxu3 %v2565_v53  ;;  %v2596_v53 = vld [vmem:[%s5253_s4 + $0x6c0] sm:$0xff] }
 0x2c0   :  { %1211 = vmatpush.msrb.mxu1 %v2582_v20  ;;  %v4233_v20 = vpop.f32.mrf.mxu1 }
 0x2c1   :  { %1134 = vmatpush.msrb.mxu3 %v2564_v21  ;;  %v2613_v21 = vld [vmem:[%s5253_s4 + $0x730] sm:$0xff] }
 0x2c2   :  { %1212 = vmatpush.msrb.mxu1 %v2581_v59  ;;  %v2612_v59 = vld [vmem:[%s5253_s4 + $0x728] sm:$0xff] }
 0x2c3   :  { %1076 = vmatmul.f32.gmra.mxu1 %v1034_v56  ;;  %1135 = vmatpush.msrb.mxu3 %v2563_v22  ;;  %v2595_v56 = vld [vmem:[%s5253_s4 + $0x6b8] sm:$0xff]  ;;  %v2594_v22 = vld [vmem:[%s5253_s4 + $0x6b0] sm:$0xff] }
 0x2c4   :  { %v955_v62 = vpop.f32.mrf.mxu2  ;;  %1213 = vmatpush.msrb.mxu1 %v2580_v23  ;;  %v2611_v23 = vld [vmem:[%s5253_s4 + $0x720] sm:$0xff] }
 0x2c5   :  { %997 = vmatmul.f32.vlgmr.msra.gmra.mxu3 %v955_v62 }
 0x2c6   :  { %1136 = vmatpush.msrb.mxu3 %v2562_v24  ;;  %1214 = vmatpush.msrb.mxu1 %v2579_v12  ;;  %v2593_v24 = vld [vmem:[%s5253_s4 + $0x6a8] sm:$0xff]  ;;  %v2610_v12 = vld [vmem:[%s5253_s4 + $0x718] sm:$0xff] }
 0x2c8   :  { %1137 = vmatpush.msrb.mxu3 %v2561_v25  ;;  %1215 = vmatpush.msrb.mxu1 %v2578_v26  ;;  %v2592_v26 = vld [vmem:[%s5253_s4 + $0x6a0] sm:$0xff] }
 0x2ca   :  { %1138 = vmatpush.msrb.mxu3 %v2560_v14  ;;  %1216 = vmatpush.msrb.mxu1 %v2577_v15  ;;  %v2609_v14 = vld [vmem:[%s5253_s4 + $0x710] sm:$0xff]  ;;  %v1335_v15 = vpop.f32.mrf.mxu0 }
 0x2cb   :  { %1079 = vmatmul.f32.gmra.mxu1 %v1037_v28  ;;  %v2591_v28 = vld [vmem:[%s5253_s4 + $0x698] sm:$0xff] }
 0x2cc   :  { %v958_v31 = vpop.f32.mrf.mxu2  ;;  %1139 = vmatpush.msrb.mxu3 %v2559_v16  ;;  %1217 = vmatpush.msrb.mxu1 %v2576_v29  ;;  %v4267_v16 = vpop.f32.mrf.mxu1  ;;  %v2608_v29 = vld [vmem:[%s5253_s4 + $0x708] sm:$0xff] }
 0x2cd   :  { %1000 = vmatmul.f32.gmra.mxu3 %v958_v31  ;;  %v2590_v31 = vld [vmem:[%s5253_s4 + $0x690] sm:$0xff] }
 0x2ce   :  { %1140 = vmatpush.msrb.mxu3 %v2558_v7  ;;  %1218 = vmatpush.msrb.mxu1 %v2575_v32  ;;  %v2607_v7 = vld [vmem:[%s5253_s4 + $0x700] sm:$0xff] }
 0x2d0   :  { %1141 = vmatpush.msrb.mxu3 %v2557_v33  ;;  %1219 = vmatpush.msrb.mxu1 %v2574_v5  ;;  %v2589_v33 = vld [vmem:[%s5253_s4 + $0x688] sm:$0xff]  ;;  %v2588_v5 = vld [vmem:[%s5253_s4 + $0x680] sm:$0xff] }
 0x2d2   :  { %1142 = vmatpush.msrb.mxu3 %v2556_v34  ;;  %1220 = vmatpush.msrb.mxu1 %v2573_v35  ;;  %v2641_v34 = vld [vmem:[%s5253_s4 + $0x7f8] sm:$0xff]  ;;  %v2640_v35 = vld [vmem:[%s5253_s4 + $0x7f0] sm:$0xff] }
 0x2d4   :  { %v961_v37 = vpop.f32.mrf.mxu2  ;;  %1143 = vmatpush.msrb.mxu3 %v2555_v36  ;;  %1221 = vmatpush.msrb.mxu1 %v2572_v3  ;;  %v1338_v36 = vpop.f32.mrf.mxu0 }
 0x2d5   :  { %1003 = vmatmul.f32.gmra.mxu3 %v961_v37  ;;  %v624_v3 = vpop.f32.mrf.mxu1 }
 0x2d6   :  { %1144 = vmatpush.msrb.mxu3 %v2554_v39  ;;  %1222 = vmatpush.msrb.mxu1 %v2571_v40  ;;  %v2639_v39 = vld [vmem:[%s5253_s4 + $0x7e8] sm:$0xff] }
 0x2d8   :  { %1145 = vmatpush.msrb.mxu3 %v2553_v43  ;;  %1223 = vmatpush.msrb.mxu1 %v2570_v45  ;;  %v2637_v43 = vld [vmem:[%s5253_s4 + $0x7d8] sm:$0xff]  ;;  %v2636_v45 = vld [vmem:[%s5253_s4 + $0x7d0] sm:$0xff] }
 0x2da   :  { %1146 = vmatpush.msrb.mxu3 %v2552_v46  ;;  %1224 = vmatpush.msrb.mxu1 %v2569_v48  ;;  %v394_v46 = vadd.f32 %v4112_v27, %v3662_v30  ;;  %v2633_v30 = vld [vmem:[%s5253_s4 + $0x7b8] sm:$0xff]  ;;  %v2632_v27 = vld [vmem:[%s5253_s4 + $0x7b0] sm:$0xff] }
 0x2db   :  { %1225 = vmatmul.f32.vlgmr.msrb.gmra.mxu1 %v1183_v42  ;;  %v2638_v42 = vld [vmem:[%s5253_s4 + $0x7e0] sm:$0xff] }
 0x2dc   :  { %1147 = vmatpush.msrb.mxu3 %v2551_v52  ;;  %1361 = vmatpush.msra.mxu1 %v2622_v54  ;;  %v2635_v54 = vld [vmem:[%s5253_s4 + $0x7c8] sm:$0xff] }
 0x2de   :  { %1148 = vmatpush.msrb.mxu3 %v2550_v55  ;;  %1362 = vmatpush.msra.mxu1 %v2621_v57  ;;  %v1341_v48 = vpop.f32.mrf.mxu0  ;;  %v770_v55 = vpop.f32.mrf.mxu1 }
 0x2e0   :  { %1285 = vmatpush.msra.mxu3 %v2603_v58  ;;  %v4196_v8 = vpop.f32.mrf.mxu3  ;;  %1363 = vmatpush.msra.mxu1 %v2620_v60  ;;  %v2634_v60 = vld [vmem:[%s5253_s4 + $0x7c0] sm:$0xff] }
 0x2e1   :  { %v475_v57 = vadd.f32 %v4196_v8, %v394_v46  ;;  %v1514_v46 = vld [vmem:[%s5255_s7 + $0x68] sm:$0xff] }
 0x2e2   :  { %1286 = vmatpush.msra.mxu3 %v2602_v61  ;;  %1364 = vmatpush.msra.mxu1 %v2619_v10 }
 0x2e3   :  { %1228 = vmatmul.f32.gmra.mxu1 %v1186_v63  ;;  %v397_v63 = vadd.f32 %v4138_v17, %v3689_v38 }
 0x2e4   :  { %v1107_v11 = vpop.f32.mrf.mxu2  ;;  %1287 = vmatpush.msra.mxu3 %v2601_v13  ;;  %1365 = vmatpush.msra.mxu1 %v2618_v6  ;;  %v2631_v13 = vld [vmem:[%s5253_s4 + $0x7a8] sm:$0xff] }
 0x2e5   :  { %1149 = vmatmul.f32.vlgmr.msrb.gmra.mxu3 %v1107_v11 }
 0x2e6   :  { %1288 = vmatpush.msra.mxu3 %v2600_v4  ;;  %1366 = vmatpush.msra.mxu1 %v2617_v41  ;;  %v2630_v41 = vld [vmem:[%s5253_s4 + $0x7a0] sm:$0xff] }
 0x2e8   :  { %1289 = vmatpush.msra.mxu3 %v2599_v9  ;;  %1367 = vmatpush.msra.mxu1 %v2616_v2  ;;  %v4222_v1 = vpop.f32.mrf.mxu3  ;;  %v773_v9 = vpop.f32.mrf.mxu1  ;;  %v2629_v2 = vld [vmem:[%s5253_s4 + $0x798] sm:$0xff] }
 0x2e9   :  { %v476_v6 = vadd.f32 %v4222_v1, %v397_v63  ;;  %v1507_v63 = vld [vmem:[%s5255_s7 + $0x30] sm:$0xff] }
 0x2ea   :  { %1290 = vmatpush.msra.mxu3 %v2598_v44  ;;  %1368 = vmatpush.msra.mxu1 %v2615_v47  ;;  %v2628_v44 = vld [vmem:[%s5253_s4 + $0x790] sm:$0xff]  ;;  %v400_v47 = vadd.f32 %v4170_v51, %v3716_v49 }
 0x2eb   :  { %1231 = vmatmul.f32.gmra.mxu1 %v1189_v0 }
 0x2ec   :  { %v1110_v19 = vpop.f32.mrf.mxu2  ;;  %1291 = vmatpush.msra.mxu3 %v2597_v50  ;;  %1369 = vmatpush.msra.mxu1 %v2614_v18  ;;  %v2627_v50 = vld [vmem:[%s5253_s4 + $0x788] sm:$0xff] }
 0x2ed   :  { %1152 = vmatmul.f32.gmra.mxu3 %v1110_v19 }
 0x2ee   :  { %1292 = vmatpush.msra.mxu3 %v2596_v53  ;;  %1370 = vmatpush.msra.mxu1 %v2613_v21  ;;  %v2626_v53 = vld [vmem:[%s5253_s4 + $0x780] sm:$0xff] }
 0x2f0   :  { %1293 = vmatpush.msra.mxu3 %v2595_v56  ;;  %1371 = vmatpush.msra.mxu1 %v2612_v59  ;;  %v4250_v62 = vpop.f32.mrf.mxu3  ;;  %v776_v49 = vpop.f32.mrf.mxu1 }
 0x2f1   :  { %v477_v18 = vadd.f32 %v4250_v62, %v400_v47 }
 0x2f2   :  { %1294 = vmatpush.msra.mxu3 %v2594_v22  ;;  %1372 = vmatpush.msra.mxu1 %v2611_v23 }
 0x2f4   :  { %v1113_v25 = vpop.f32.mrf.mxu2  ;;  %1295 = vmatpush.msra.mxu3 %v2593_v24  ;;  %1373 = vmatpush.msra.mxu1 %v2610_v12 }
 0x2f5   :  { %1155 = vmatmul.f32.gmra.mxu3 %v1113_v25 }
 0x2f6   :  { %1296 = vmatpush.msra.mxu3 %v2592_v26  ;;  %1374 = vmatpush.msra.mxu1 %v2609_v14 }
 0x2f8   :  { %1297 = vmatpush.msra.mxu3 %v2591_v28  ;;  %1375 = vmatpush.msra.mxu1 %v2608_v29  ;;  %v542_v32 = vpop.f32.mrf.mxu3 }
 0x2f9   :  { %v551_v61 = vadd.f32 %v542_v32, %v475_v57  ;;  %v1511_v57 = vld [vmem:[%s5255_s7 + $0x50] sm:$0xff] }
 0x2fa   :  { %1298 = vmatpush.msra.mxu3 %v2590_v31  ;;  %1376 = vmatpush.msra.mxu1 %v2607_v7 }
 0x2fb   :  { %1377 = vmatmul.f32.vlgmr.msra.gmra.mxu1 %v1335_v15  ;;  %v627_v10 = vadd.f32 %v4233_v20, %v551_v61  ;;  %v1509_v61 = vld [vmem:[%s5255_s7 + $0x40] sm:$0xff] }
 0x2fc   :  { %1299 = vmatpush.msra.mxu3 %v2589_v33 }
 0x2fe   :  { %1300 = vmatpush.msra.mxu3 %v2588_v5 }
 0x300   :  { %1437 = vmatpush.msrb.mxu3 %v2641_v34  ;;  %v545_v37 = vpop.f32.mrf.mxu3 }
 0x301   :  { %v552_v38 = vadd.f32 %v545_v37, %v476_v6  ;;  %v1504_v6 = vld [vmem:[%s5255_s7 + $0x18] sm:$0xff] }
 0x302   :  { %1438 = vmatpush.msrb.mxu3 %v2640_v35 }
 0x303   :  { %1380 = vmatmul.f32.gmra.mxu1 %v1338_v36  ;;  %v628_v0 = vadd.f32 %v4267_v16, %v552_v38 }
 0x304   :  { %v1259_v40 = vpop.f32.mrf.mxu2  ;;  %1439 = vmatpush.msrb.mxu3 %v2639_v39 }
 0x305   :  { %1301 = vmatmul.f32.vlgmr.msra.gmra.mxu3 %v1259_v40 }
 0x306   :  { %1440 = vmatpush.msrb.mxu3 %v2638_v42  ;;  %v1516_v42 = vld [vmem:[%s5255_s7 + $0x78] sm:$0xff] }
 0x308   :  { %1441 = vmatpush.msrb.mxu3 %v2637_v43  ;;  %v548_v52 = vpop.f32.mrf.mxu3  ;;  %v1515_v43 = vld [vmem:[%s5255_s7 + $0x70] sm:$0xff] }
 0x309   :  { %v553_v20 = vadd.f32 %v548_v52, %v477_v18 }
 0x30a   :  { %1442 = vmatpush.msrb.mxu3 %v2636_v45 }
 0x30b   :  { %1383 = vmatmul.f32.gmra.mxu1 %v1341_v48  ;;  %v629_v51 = vadd.f32 %v624_v3, %v553_v20  ;;  %v1513_v48 = vld [vmem:[%s5255_s7 + $0x60] sm:$0xff] }
 0x30c   :  { %v1262_v58 = vpop.f32.mrf.mxu2  ;;  %1443 = vmatpush.msrb.mxu3 %v2635_v54 }
 0x30d   :  { %1304 = vmatmul.f32.gmra.mxu3 %v1262_v58  ;;  %v1510_v58 = vld [vmem:[%s5255_s7 + $0x48] sm:$0xff] }
 0x30e   :  { %1444 = vmatpush.msrb.mxu3 %v2634_v60 }
 0x310   :  { %1445 = vmatpush.msrb.mxu3 %v2633_v30  ;;  %v694_v8 = vpop.f32.mrf.mxu3 }
 0x311   :  { %v703_v4 = vadd.f32 %v694_v8, %v627_v10  ;;  %v1506_v10 = vld [vmem:[%s5255_s7 + $0x28] sm:$0xff]  ;;  %v1505_v8 = vld [vmem:[%s5255_s7 + $0x20] sm:$0xff] }
 0x312   :  { %1446 = vmatpush.msrb.mxu3 %v2632_v27  ;;  %v1508_v27 = vld [vmem:[%s5255_s7 + $0x38] sm:$0xff] }
 0x313   :  { %v779_v17 = vadd.f32 %v770_v55, %v703_v4  ;;  %v1512_v55 = vld [vmem:[%s5255_s7 + $0x58] sm:$0xff]  ;;  %v1503_v4 = vld [vmem:[%s5255_s7 + $0x10] sm:$0xff] }
 0x314   :  { %v1265_v11 = vpop.f32.mrf.mxu2  ;;  %1447 = vmatpush.msrb.mxu3 %v2631_v13 }
 0x315   :  { %1307 = vmatmul.f32.gmra.mxu3 %v1265_v11 }
 0x316   :  { %1448 = vmatpush.msrb.mxu3 %v2630_v41  ;;  %v1502_v41 = vld [vmem:[%s5255_s7 + $0x8] sm:$0xff] }
 0x318   :  { %1449 = vmatpush.msrb.mxu3 %v2629_v2  ;;  %v697_v1 = vpop.f32.mrf.mxu3  ;;  %v922_v24 = vpop.f32.mrf.mxu1 }
 0x319   :  { %v704_v19 = vadd.f32 %v697_v1, %v628_v0 }
 0x31a   :  { %1450 = vmatpush.msrb.mxu3 %v2628_v44 }
 0x31b   :  { %v780_v21 = vadd.f32 %v773_v9, %v704_v19  ;;  %v1501_v9 = vld [vmem:[%s5255_s7] sm:$0xff] }
 0x31c   :  { %1451 = vmatpush.msrb.mxu3 %v2627_v50 }
 0x31e   :  { %1452 = vmatpush.msrb.mxu3 %v2626_v53 }
 0x320   :  { %v925_v14 = vpop.f32.mrf.mxu1  ;;  %1579 = vmatpush.msra.mxu3 %v1516_v42  ;;  %v2659_v42 = vld [vmem:[%s5255_s7 + $0xf0] sm:$0xff] }
 0x321   :  { %v700_v56 = vpop.f32.mrf.mxu3 }
 0x322   :  { %v705_v22 = vadd.f32 %v700_v56, %v629_v51  ;;  %1580 = vmatpush.msra.mxu3 %v1515_v43  ;;  %v2674_v43 = vld [vmem:[%s5255_s7 + $0x158] sm:$0xff] }
 0x324   :  { %v1411_v59 = vpop.f32.mrf.mxu2  ;;  %v781_v23 = vadd.f32 %v776_v49, %v705_v22  ;;  %1581 = vmatpush.msra.mxu3 %v1514_v46  ;;  %v2673_v46 = vld [vmem:[%s5255_s7 + $0x150] sm:$0xff] }
 0x325   :  { %1453 = vmatmul.f32.vlgmr.msrb.gmra.mxu3 %v1411_v59 }
 0x326   :  { %1582 = vmatpush.msra.mxu3 %v1513_v48  ;;  %v2657_v48 = vld [vmem:[%s5255_s7 + $0xe0] sm:$0xff] }
 0x328   :  { %v928_v35 = vpop.f32.mrf.mxu1  ;;  %1583 = vmatpush.msra.mxu3 %v1512_v55  ;;  %v2671_v55 = vld [vmem:[%s5255_s7 + $0x140] sm:$0xff] }
 0x329   :  { %v846_v62 = vpop.f32.mrf.mxu3 }
 0x32a   :  { %v855_v25 = vadd.f32 %v846_v62, %v779_v17  ;;  %1584 = vmatpush.msra.mxu3 %v1511_v57  ;;  %v2655_v57 = vld [vmem:[%s5255_s7 + $0xd0] sm:$0xff] }
 0x32c   :  { %v1414_v12 = vpop.f32.mrf.mxu2  ;;  %v931_v26 = vadd.f32 %v922_v24, %v855_v25  ;;  %1585 = vmatpush.msra.mxu3 %v1510_v58  ;;  %v2670_v58 = vld [vmem:[%s5255_s7 + $0x138] sm:$0xff] }
 0x32d   :  { %1456 = vmatmul.f32.gmra.mxu3 %v1414_v12 }
 0x32e   :  { %1586 = vmatpush.msra.mxu3 %v1509_v61  ;;  %v2669_v61 = vld [vmem:[%s5255_s7 + $0x130] sm:$0xff] }
 0x330   :  { %1587 = vmatpush.msra.mxu3 %v1508_v27  ;;  %v2668_v27 = vld [vmem:[%s5255_s7 + $0x128] sm:$0xff] }
 0x331   :  { %v849_v28 = vpop.f32.mrf.mxu3 }
 0x332   :  { %v856_v16 = vadd.f32 %v849_v28, %v780_v21  ;;  %1588 = vmatpush.msra.mxu3 %v1507_v63  ;;  %v2788_v28 = vld [vmem:[%s5254_s5] ss:$0 sm:$0xff]  ;;  %v2652_v63 = vld [vmem:[%s5255_s7 + $0xb8] sm:$0xff] }
 0x334   :  { %v1417_v15 = vpop.f32.mrf.mxu2  ;;  %v932_v29 = vadd.f32 %v925_v14, %v856_v16  ;;  %1589 = vmatpush.msra.mxu3 %v1506_v10  ;;  %v2667_v10 = vld [vmem:[%s5255_s7 + $0x120] sm:$0xff] }
 0x335   :  { %1459 = vmatmul.f32.gmra.mxu3 %v1417_v15 }
 0x336   :  { %1590 = vmatpush.msra.mxu3 %v1505_v8  ;;  %v2651_v8 = vld [vmem:[%s5255_s7 + $0xb0] sm:$0xff] }
 0x338   :  { %v1074_v36 = vpop.f32.mrf.mxu1  ;;  %1591 = vmatpush.msra.mxu3 %v1504_v6  ;;  %v2650_v6 = vld [vmem:[%s5255_s7 + $0xa8] sm:$0xff] }
 0x339   :  { %v852_v31 = vpop.f32.mrf.mxu3 }
 0x33a   :  { %v857_v7 = vadd.f32 %v852_v31, %v781_v23  ;;  %1592 = vmatpush.msra.mxu3 %v1503_v4  ;;  %v2649_v4 = vld [vmem:[%s5255_s7 + $0xa0] sm:$0xff] }
 0x33c   :  { %1593 = vmatpush.msra.mxu3 %v1502_v41  ;;  %v933_v2 = vadd.f32 %v928_v35, %v857_v7  ;;  %v2643_v35 = vld [vmem:[%s5256_s6 + $0x8] sm:$0xff] }
 0x33d   :  { %v2664_v41 = vld [vmem:[%s5255_s7 + $0x108] sm:$0xff] }
 0x33e   :  { %1594 = vmatpush.msra.mxu3 %v1501_v9  ;;  %v2648_v9 = vld [vmem:[%s5255_s7 + $0x98] sm:$0xff] }
 0x340   :  { %v1077_v39 = vpop.f32.mrf.mxu1 }
 0x348   :  { %v998_v32 = vpop.f32.mrf.mxu3  ;;  %v1080_v45 = vpop.f32.mrf.mxu1 }
 0x349   :  { %v1007_v33 = vadd.f32 %v998_v32, %v931_v26 }
 0x34b   :  { %v1083_v50 = vadd.f32 %v1074_v36, %v1007_v33  ;;  %v2678_v36 = vld [vmem:[%s5255_s7 + $0x178] sm:$0xff] }
 0x350   :  { %v1001_v5 = vpop.f32.mrf.mxu3 }
 0x351   :  { %v1008_v34 = vadd.f32 %v1001_v5, %v932_v29 }
 0x353   :  { %v1084_v0 = vadd.f32 %v1077_v39, %v1008_v34  ;;  %v1476_v34 = vld [vmem:[%s5256_s6] sm:$0xff] }
 0x354   :  { %v2675_v39 = vld [vmem:[%s5255_s7 + $0x160] sm:$0xff] }
 0x358   :  { %v1004_v3 = vpop.f32.mrf.mxu3  ;;  %v1226_v52 = vpop.f32.mrf.mxu1 }
 0x359   :  { %v1009_v44 = vadd.f32 %v1004_v3, %v933_v2  ;;  %v2677_v3 = vld [vmem:[%s5255_s7 + $0x170] sm:$0xff]  ;;  %v2646_v2 = vld [vmem:[%s5255_s7 + $0x88] sm:$0xff] }
 0x35b   :  { %v1085_v18 = vadd.f32 %v1080_v45, %v1009_v44  ;;  %v2658_v45 = vld [vmem:[%s5255_s7 + $0xe8] sm:$0xff]  ;;  %v2645_v44 = vld [vmem:[%s5255_s7 + $0x80] sm:$0xff] }
 0x360   :  { %v1229_v30 = vpop.f32.mrf.mxu1 }
 0x368   :  { %v1150_v37 = vpop.f32.mrf.mxu3  ;;  %v1232_v11 = vpop.f32.mrf.mxu1 }
 0x369   :  { %v1159_v53 = vadd.f32 %v1150_v37, %v1083_v50  ;;  %v2676_v37 = vld [vmem:[%s5255_s7 + $0x168] sm:$0xff]  ;;  %v2693_v50 = vld [vmem:[%s5255_s7 + $0x1e0] sm:$0xff] }
 0x36b   :  { %v1235_v51 = vadd.f32 %v1226_v52, %v1159_v53  ;;  %v2672_v52 = vld [vmem:[%s5255_s7 + $0x148] sm:$0xff] }
 0x36c   :  { %v2690_v53 = vld [vmem:[%s5255_s7 + $0x1c8] sm:$0xff] }
 0x370   :  { %v1153_v40 = vpop.f32.mrf.mxu3 }
 0x371   :  { %v1160_v19 = vadd.f32 %v1153_v40, %v1084_v0  ;;  %v2660_v40 = vld [vmem:[%s5255_s7 + $0xf8] sm:$0xff]  ;;  %v2695_v0 = vld [vmem:[%s5255_s7 + $0x1f0] sm:$0xff] }
 0x372   :  { %1559 = vmatpush.msra.mxu2 %v2660_v40  ;;  %v2710_v40 = vld [vmem:[%s5255_s7 + $0x258] sm:$0xff] }
 0x373   :  { %v1236_v21 = vadd.f32 %v1229_v30, %v1160_v19  ;;  %v2653_v30 = vld [vmem:[%s5255_s7 + $0xc0] sm:$0xff]  ;;  %v2691_v19 = vld [vmem:[%s5255_s7 + $0x1d0] sm:$0xff] }
 0x374   :  { %1560 = vmatpush.msra.mxu2 %v2659_v42  ;;  %v2725_v42 = vld [vmem:[%s5255_s7 + $0x2c0] sm:$0xff] }
 0x376   :  { %1561 = vmatpush.msra.mxu2 %v2658_v45  ;;  %v2724_v45 = vld [vmem:[%s5255_s7 + $0x2b8] sm:$0xff] }
 0x378   :  { %v1156_v54 = vpop.f32.mrf.mxu3  ;;  %v1378_v38 = vpop.f32.mrf.mxu1  ;;  %1562 = vmatpush.msra.mxu2 %v2657_v48  ;;  %v2723_v48 = vld [vmem:[%s5255_s7 + $0x2b0] sm:$0xff] }
 0x379   :  { %v1161_v20 = vadd.f32 %v1156_v54, %v1085_v18  ;;  %v2656_v54 = vld [vmem:[%s5255_s7 + $0xd8] sm:$0xff] }
 0x37a   :  { %1563 = vmatpush.msra.mxu2 %v2656_v54  ;;  %v2692_v18 = vld [vmem:[%s5255_s7 + $0x1d8] sm:$0xff]  ;;  %v2721_v54 = vld [vmem:[%s5255_s7 + $0x2a0] sm:$0xff] }
 0x37b   :  { %v1237_v56 = vadd.f32 %v1232_v11, %v1161_v20  ;;  %v2665_v11 = vld [vmem:[%s5255_s7 + $0x110] sm:$0xff]  ;;  %v2689_v20 = vld [vmem:[%s5255_s7 + $0x1c0] sm:$0xff] }
 0x37c   :  { %1564 = vmatpush.msra.mxu2 %v2655_v57  ;;  %v2719_v57 = vld [vmem:[%s5255_s7 + $0x290] sm:$0xff] }
 0x380   :  { %v1381_v1 = vpop.f32.mrf.mxu1 }
 0x388   :  { %v1302_v60 = vpop.f32.mrf.mxu3  ;;  %v1384_v24 = vpop.f32.mrf.mxu1 }
 0x389   :  { %v1311_v22 = vadd.f32 %v1302_v60, %v1235_v51  ;;  %v2654_v60 = vld [vmem:[%s5255_s7 + $0xc8] sm:$0xff] }
 0x38a   :  { %1565 = vmatpush.msra.mxu2 %v2654_v60  ;;  %v2686_v51 = vld [vmem:[%s5255_s7 + $0x1a8] sm:$0xff]  ;;  %v2717_v60 = vld [vmem:[%s5255_s7 + $0x280] sm:$0xff] }
 0x38b   :  { %v1387_v62 = vadd.f32 %v1378_v38, %v1311_v22  ;;  %v2663_v38 = vld [vmem:[%s5255_s7 + $0x100] sm:$0xff]  ;;  %v2683_v22 = vld [vmem:[%s5255_s7 + $0x190] sm:$0xff] }
 0x38c   :  { %1566 = vmatpush.msra.mxu2 %v2653_v30  ;;  %v2706_v30 = vld [vmem:[%s5255_s7 + $0x238] sm:$0xff] }
 0x38e   :  { %1567 = vmatpush.msra.mxu2 %v2652_v63 }
 0x390   :  { %v1305_v13 = vpop.f32.mrf.mxu3  ;;  %1568 = vmatpush.msra.mxu2 %v2651_v8  ;;  %v2700_v8 = vld [vmem:[%s5255_s7 + $0x208] sm:$0xff] }
 0x391   :  { %v1312_v59 = vadd.f32 %v1305_v13, %v1236_v21  ;;  %v2666_v13 = vld [vmem:[%s5255_s7 + $0x118] sm:$0xff] }
 0x392   :  { %1569 = vmatpush.msra.mxu2 %v2650_v6  ;;  %v2688_v21 = vld [vmem:[%s5255_s7 + $0x1b8] sm:$0xff]  ;;  %v2769_v6 = vld [vmem:[%s5256_s6 + $0x40] sm:$0xff] }
 0x393   :  { %v1388_v12 = vadd.f32 %v1381_v1, %v1312_v59  ;;  %v2694_v1 = vld [vmem:[%s5255_s7 + $0x1e8] sm:$0xff]  ;;  %v2684_v59 = vld [vmem:[%s5255_s7 + $0x198] sm:$0xff] }
 0x394   :  { %1570 = vmatpush.msra.mxu2 %v2649_v4  ;;  %v2786_v4 = vld [vmem:[%s5255_s7 + $0x478] sm:$0xff] }
 0x396   :  { %1571 = vmatpush.msra.mxu2 %v2648_v9  ;;  %v2750_v9 = vld [vmem:[%s5255_s7 + $0x378] sm:$0xff] }
 0x398   :  { %v1308_v17 = vpop.f32.mrf.mxu3 }
 0x399   :  { %v1313_v23 = vadd.f32 %v1308_v17, %v1237_v56  ;;  %v2647_v17 = vld [vmem:[%s5255_s7 + $0x90] sm:$0xff]  ;;  %v2685_v56 = vld [vmem:[%s5255_s7 + $0x1a0] sm:$0xff] }
 0x39a   :  { %1572 = vmatpush.msra.mxu2 %v2647_v17  ;;  %v2749_v17 = vld [vmem:[%s5255_s7 + $0x370] sm:$0xff] }
 0x39b   :  { %v1389_v25 = vadd.f32 %v1384_v24, %v1313_v23  ;;  %v2682_v23 = vld [vmem:[%s5255_s7 + $0x188] sm:$0xff]  ;;  %v2681_v24 = vld [vmem:[%s5255_s7 + $0x180] sm:$0xff] }
 0x39c   :  { %1573 = vmatpush.msra.mxu2 %v2646_v2  ;;  %v2748_v2 = vld [vmem:[%s5255_s7 + $0x368] sm:$0xff] }
 0x39e   :  { %1574 = vmatpush.msra.mxu2 %v2645_v44  ;;  %v2747_v44 = vld [vmem:[%s5255_s7 + $0x360] sm:$0xff] }
 0x3a8   :  { %v1454_v47 = vpop.f32.mrf.mxu3 }
 0x3a9   :  { %v1463_v15 = vadd.f32 %v1454_v47, %v1387_v62  ;;  %v2696_v47 = vld [vmem:[%s5255_s7 + $0x1f8] sm:$0xff] }
 0x3aa   :  { %1704 = vmatpush.msrb.mxu2 %v2696_v47  ;;  %v2733_v47 = vld [vmem:[%s5256_s6 + $0x30] sm:$0xff] }
 0x3ab   :  { %v1470_v7 = vadd.f32 %v2788_v28, %v1463_v15  ;;  %v2732_v15 = vld [vmem:[%s5255_s7 + $0x2f8] sm:$0xff] }
 0x3ac   :  { %1705 = vmatpush.msrb.mxu2 %v2695_v0  ;;  %v2746_v0 = vld [vmem:[%s5255_s7 + $0x358] sm:$0xff] }
 0x3ad   :  { %v4401_v5 = vmax.f32 %v1470_v7, 0.0  ;;  %v2713_v7 = vld [vmem:[%s5255_s7 + $0x270] sm:$0xff] }
 0x3ae   :  { %1706 = vmatpush.msrb.mxu2 %v2694_v1 }
 0x3b0   :  { %v1457_v49 = vpop.f32.mrf.mxu3  ;;  %1707 = vmatpush.msrb.mxu2 %v2693_v50  ;;  %v2745_v50 = vld [vmem:[%s5255_s7 + $0x350] sm:$0xff] }
 0x3b1   :  { %v1464_v26 = vadd.f32 %v1457_v49, %v1388_v12  ;;  %v2687_v49 = vld [vmem:[%s5255_s7 + $0x1b0] sm:$0xff]  ;;  %v2679_v12 = vld [vmem:[%s5256_s6 + $0x18] sm:$0xff] }
 0x3b2   :  { %1708 = vmatpush.msrb.mxu2 %v2692_v18  ;;  %v2744_v18 = vld [vmem:[%s5255_s7 + $0x348] sm:$0xff] }
 0x3b3   :  { %v1471_v29 = vadd.f32 %v2788_v28, %v1464_v26  ;;  %v2661_v26 = vld [vmem:[%s5256_s6 + $0x10] sm:$0xff] }
 0x3b4   :  { %1709 = vmatpush.msrb.mxu2 %v2691_v19  ;;  %v2743_v19 = vld [vmem:[%s5255_s7 + $0x340] sm:$0xff] }
 0x3b5   :  { %v4396_v33 = vmax.f32 %v1471_v29, 0.0  ;;  %v2729_v29 = vld [vmem:[%s5255_s7 + $0x2e0] sm:$0xff] }
 0x3b6   :  { %1710 = vmatpush.msrb.mxu2 %v2690_v53  ;;  %v2742_v53 = vld [vmem:[%s5255_s7 + $0x338] sm:$0xff] }
 0x3b8   :  { %v1460_v14 = vpop.f32.mrf.mxu3  ;;  %1711 = vmatpush.msrb.mxu2 %v2689_v20 }
 0x3b9   :  { %v1465_v16 = vadd.f32 %v1460_v14, %v1389_v25  ;;  %v2697_v14 = vld [vmem:[%s5256_s6 + $0x20] sm:$0xff] }
 0x3ba   :  { %1712 = vmatpush.msrb.mxu2 %v2688_v21  ;;  %v2741_v21 = vld [vmem:[%s5255_s7 + $0x330] sm:$0xff] }
 0x3bb   :  { %v1472_v31 = vadd.f32 %v2788_v28, %v1465_v16  ;;  %v2731_v28 = vld [vmem:[%s5255_s7 + $0x2f0] sm:$0xff]  ;;  %v2730_v16 = vld [vmem:[%s5255_s7 + $0x2e8] sm:$0xff] }
 0x3bc   :  { %1713 = vmatpush.msrb.mxu2 %v2687_v49  ;;  %v2740_v49 = vld [vmem:[%s5255_s7 + $0x328] sm:$0xff] }
 0x3bd   :  { %v4394_v32 = vmax.f32 %v1472_v31, 0.0  ;;  %v2714_v31 = vld [vmem:[%s5255_s7 + $0x278] sm:$0xff] }
 0x3be   :  { %1714 = vmatpush.msrb.mxu2 %v2686_v51  ;;  %v2751_v51 = vld [vmem:[%s5256_s6 + $0x38] sm:$0xff] }
 0x3bf   :  { %1494 = vmatpush.msrb.mxu0 %v4394_v32  ;;  %1535 = vmatpush.msrb.mxu1 %v4394_v32 }
 0x3c0   :  { %1617 = vmatpush.msrb.mxu3 %v4394_v32  ;;  %1715 = vmatpush.msrb.mxu2 %v2685_v56  ;;  %v2739_v56 = vld [vmem:[%s5255_s7 + $0x320] sm:$0xff] }
 0x3c1   :  { %1495 = vmatpush.msrb.mxu0 %v4396_v33  ;;  %1536 = vmatpush.msrb.mxu1 %v4396_v33 }
 0x3c2   :  { %1618 = vmatpush.msrb.mxu3 %v4396_v33  ;;  %1716 = vmatpush.msrb.mxu2 %v2684_v59  ;;  %v2768_v59 = vld [vmem:[%s5255_s7 + $0x3f8] sm:$0xff] }
 0x3c3   :  { %1496 = vmatpush.msrb.mxu0 %v4401_v5  ;;  %1537 = vmatpush.msrb.mxu1 %v4401_v5 }
 0x3c4   :  { %1619 = vmatpush.msrb.mxu3 %v4401_v5  ;;  %2642 = vmatmul.msk.f32.vlgmr.msrb.gmra.mxu0 %vm1477_vm0, %v1476_v34  ;;  %v2715_v34 = vld [vmem:[%s5256_s6 + $0x28] sm:$0xff] }
 0x3c5   :  { %2644 = vmatmul.msk.f32.vlgmr.msrb.gmra.mxu1 %vm1477_vm0, %v2643_v35  ;;  %1680 = vmatpush.msra.mxu0 %v4394_v32  ;;  %v2728_v35 = vld [vmem:[%s5255_s7 + $0x2d8] sm:$0xff] }
 0x3c6   :  { %1641 = vmatpush.msra.mxu1 %v2678_v36  ;;  %1717 = vmatpush.msrb.mxu2 %v2683_v22  ;;  %v2712_v36 = vld [vmem:[%s5255_s7 + $0x268] sm:$0xff] }
 0x3c7   :  { %1681 = vmatpush.msra.mxu0 %v4396_v33  ;;  %v2784_v22 = vld [vmem:[%s5255_s7 + $0x468] sm:$0xff] }
 0x3c8   :  { %1642 = vmatpush.msra.mxu1 %v2677_v3  ;;  %1718 = vmatpush.msrb.mxu2 %v2682_v23  ;;  %v2727_v3 = vld [vmem:[%s5255_s7 + $0x2d0] sm:$0xff]  ;;  %v2738_v23 = vld [vmem:[%s5255_s7 + $0x318] sm:$0xff] }
 0x3c9   :  { %1682 = vmatpush.msra.mxu0 %v4401_v5 }
 0x3ca   :  { %1643 = vmatpush.msra.mxu1 %v2676_v37  ;;  %1719 = vmatpush.msrb.mxu2 %v2681_v24  ;;  %v2711_v37 = vld [vmem:[%s5255_s7 + $0x260] sm:$0xff]  ;;  %v2767_v24 = vld [vmem:[%s5255_s7 + $0x3f0] sm:$0xff] }
 0x3cb   :  { %1767 = vmatpush.msrb.mxu0 %v2714_v31  ;;  %v2780_v31 = vld [vmem:[%s5255_s7 + $0x448] sm:$0xff] }
 0x3cc   :  { %1644 = vmatpush.msra.mxu1 %v2675_v39  ;;  %2680 = vmatmul.msk.f32.vlgmr.msra.gmra.mxu0 %vm1477_vm0, %v2679_v12  ;;  %v2726_v39 = vld [vmem:[%s5255_s7 + $0x2c8] sm:$0xff]  ;;  %v2783_v12 = vld [vmem:[%s5255_s7 + $0x460] sm:$0xff] }
 0x3cd   :  { %1768 = vmatpush.msrb.mxu0 %v2713_v7  ;;  %v2763_v7 = vld [vmem:[%s5255_s7 + $0x3d0] sm:$0xff] }
 0x3ce   :  { %1645 = vmatpush.msra.mxu1 %v2674_v43  ;;  %v2709_v43 = vld [vmem:[%s5255_s7 + $0x250] sm:$0xff] }
 0x3cf   :  { %1769 = vmatpush.msrb.mxu0 %v2712_v36  ;;  %v2762_v36 = vld [vmem:[%s5255_s7 + $0x3c8] sm:$0xff] }
 0x3d0   :  { %1646 = vmatpush.msra.mxu1 %v2673_v46  ;;  %v2708_v46 = vld [vmem:[%s5255_s7 + $0x248] sm:$0xff] }
 0x3d1   :  { %1770 = vmatpush.msrb.mxu0 %v2711_v37  ;;  %v2761_v37 = vld [vmem:[%s5255_s7 + $0x3c0] sm:$0xff] }
 0x3d2   :  { %1647 = vmatpush.msra.mxu1 %v2672_v52  ;;  %v2722_v52 = vld [vmem:[%s5255_s7 + $0x2a8] sm:$0xff] }
 0x3d3   :  { %1771 = vmatpush.msrb.mxu0 %v2710_v40  ;;  %v2760_v40 = vld [vmem:[%s5255_s7 + $0x3b8] sm:$0xff] }
 0x3d4   :  { %1648 = vmatpush.msra.mxu1 %v2671_v55  ;;  %v2720_v55 = vld [vmem:[%s5255_s7 + $0x298] sm:$0xff] }
 0x3d5   :  { %1772 = vmatpush.msrb.mxu0 %v2709_v43  ;;  %v2759_v43 = vld [vmem:[%s5255_s7 + $0x3b0] sm:$0xff] }
 0x3d6   :  { %1649 = vmatpush.msra.mxu1 %v2670_v58  ;;  %v2718_v58 = vld [vmem:[%s5255_s7 + $0x288] sm:$0xff] }
 0x3d7   :  { %1773 = vmatpush.msrb.mxu0 %v2708_v46 }
 0x3d8   :  { %1650 = vmatpush.msra.mxu1 %v2669_v61  ;;  %v2707_v61 = vld [vmem:[%s5255_s7 + $0x240] sm:$0xff] }
 0x3d9   :  { %1774 = vmatpush.msrb.mxu0 %v2707_v61  ;;  %v2771_v61 = vld [vmem:[%s5255_s7 + $0x400] sm:$0xff] }
 0x3da   :  { %1651 = vmatpush.msra.mxu1 %v2668_v27  ;;  %v2705_v27 = vld [vmem:[%s5255_s7 + $0x230] sm:$0xff] }
 0x3db   :  { %1775 = vmatpush.msrb.mxu0 %v2706_v30 }
 0x3dc   :  { %1652 = vmatpush.msra.mxu1 %v2667_v10  ;;  %v2701_v10 = vld [vmem:[%s5255_s7 + $0x210] sm:$0xff] }
 0x3dd   :  { %1776 = vmatpush.msrb.mxu0 %v2705_v27  ;;  %v2754_v27 = vld [vmem:[%s5255_s7 + $0x388] sm:$0xff] }
 0x3de   :  { %1653 = vmatpush.msra.mxu1 %v2666_v13  ;;  %v2699_v13 = vld [vmem:[%s5255_s7 + $0x200] sm:$0xff] }
 0x3e0   :  { %1654 = vmatpush.msra.mxu1 %v2665_v11 }
 0x3e2   :  { %1655 = vmatpush.msra.mxu1 %v2664_v41  ;;  %v2785_v41 = vld [vmem:[%s5255_s7 + $0x470] sm:$0xff] }
 0x3e4   :  { %1656 = vmatpush.msra.mxu1 %v2663_v38 }
 0x3e6   :  { %1869 = vmatpush.msrb.mxu1 %v4394_v32 }
 0x3e8   :  { %1870 = vmatpush.msrb.mxu1 %v4396_v33 }
 0x3ea   :  { %1871 = vmatpush.msrb.mxu1 %v4401_v5 }
 0x441   :  { %v1498_v62 = vpop.f32.mrf.mxu0 }
 0x442   :  { %v1539_v25 = vpop.f32.mrf.mxu1  ;;  %1595 = vmatmul.f32.vlgmr.msra.gmra.mxu3 %v1498_v62  ;;  %v2737_v62 = vld [vmem:[%s5255_s7 + $0x310] sm:$0xff] }
 0x443   :  { %1575 = vmatmul.f32.vlgmr.msra.gmra.mxu2 %v1539_v25  ;;  %1743 = vmatpush.msra.mxu3 %v4394_v32  ;;  %v2766_v25 = vld [vmem:[%s5255_s7 + $0x3e8] sm:$0xff] }
 0x444   :  { %1995 = vmatpush.msra.mxu2 %v4394_v32 }
 0x445   :  { %1744 = vmatpush.msra.mxu3 %v4396_v33 }
 0x446   :  { %1996 = vmatpush.msra.mxu2 %v4396_v33 }
 0x447   :  { %1745 = vmatpush.msra.mxu3 %v4401_v5 }
 0x448   :  { %1997 = vmatpush.msra.mxu2 %v4401_v5 }
 0x449   :  { %v1684_v63 = vpop.f32.mrf.mxu0 }
 0x44a   :  { %2662 = vmatmul.msk.f32.vlgmr.msrb.gmra.mxu3 %vm1477_vm0, %v2661_v26  ;;  %v2782_v26 = vld [vmem:[%s5255_s7 + $0x458] sm:$0xff] }
 0x44b   :  { %1806 = vmatpush.msrb.mxu3 %v4394_v32  ;;  %1720 = vmatmul.f32.vlgmr.msrb.gmra.mxu2 %v1684_v63  ;;  %v2753_v63 = vld [vmem:[%s5255_s7 + $0x380] sm:$0xff] }
 0x44c   :  { %2019 = vmatpush.msrb.mxu2 %v2786_v4 }
 0x44d   :  { %1807 = vmatpush.msrb.mxu3 %v4396_v33 }
 0x44e   :  { %2020 = vmatpush.msrb.mxu2 %v2785_v41 }
 0x44f   :  { %1808 = vmatpush.msrb.mxu3 %v4401_v5 }
 0x450   :  { %2021 = vmatpush.msrb.mxu2 %v2784_v22  ;;  %v2092_v22 = vld [vmem:[%s5258_s9 + $0x170] sm:$0xff] }
 0x452   :  { %2698 = vmatmul.msk.f32.vlgmr.msra.gmra.mxu3 %vm1477_vm0, %v2697_v14  ;;  %2022 = vmatpush.msrb.mxu2 %v2783_v12  ;;  %v2736_v14 = vld [vmem:[%s5255_s7 + $0x308] sm:$0xff] }
 0x453   :  { %1830 = vmatpush.msra.mxu3 %v2732_v15  ;;  %2770 = vmatmul.msk.f32.vlgmr.msra.gmra.mxu2 %vm1477_vm0, %v2769_v6  ;;  %v2765_v15 = vld [vmem:[%s5255_s7 + $0x3e0] sm:$0xff]  ;;  %v2087_v12 = vld [vmem:[%s5258_s9 + $0x148] sm:$0xff] }
 0x454   :  { %2023 = vmatpush.msrb.mxu2 %v2782_v26  ;;  %v2082_v26 = vld [vmem:[%s5258_s9 + $0x120] sm:$0xff] }
 0x455   :  { %1831 = vmatpush.msra.mxu3 %v2731_v28  ;;  %v2781_v28 = vld [vmem:[%s5255_s7 + $0x450] sm:$0xff] }
 0x456   :  { %2024 = vmatpush.msrb.mxu2 %v2781_v28  ;;  %v2085_v28 = vld [vmem:[%s5258_s9 + $0x138] sm:$0xff] }
 0x457   :  { %1832 = vmatpush.msra.mxu3 %v2730_v16  ;;  %v2735_v16 = vld [vmem:[%s5255_s7 + $0x300] sm:$0xff] }
 0x458   :  { %2025 = vmatpush.msrb.mxu2 %v2780_v31  ;;  %v2080_v31 = vld [vmem:[%s5258_s9 + $0x110] sm:$0xff] }
 0x459   :  { %1833 = vmatpush.msra.mxu3 %v2729_v29  ;;  %v2764_v29 = vld [vmem:[%s5255_s7 + $0x3d8] sm:$0xff] }
 0x45a   :  { %2716 = vmatmul.msk.f32.vlgmr.msrb.gmra.mxu3 %vm1477_vm0, %v2715_v34  ;;  %v2779_v34 = vld [vmem:[%s5255_s7 + $0x440] sm:$0xff] }
 0x45b   :  { %1834 = vmatpush.msra.mxu3 %v2728_v35  ;;  %2026 = vmatpush.msrb.mxu2 %v2779_v34  ;;  %v2074_v34 = vld [vmem:[%s5258_s9 + $0xe0] sm:$0xff] }
 0x45d   :  { %1835 = vmatpush.msra.mxu3 %v2727_v3  ;;  %v2778_v3 = vld [vmem:[%s5255_s7 + $0x438] sm:$0xff] }
 0x45e   :  { %2027 = vmatpush.msrb.mxu2 %v2778_v3  ;;  %v2077_v3 = vld [vmem:[%s5258_s9 + $0xf8] sm:$0xff] }
 0x45f   :  { %1836 = vmatpush.msra.mxu3 %v2726_v39  ;;  %v2777_v39 = vld [vmem:[%s5255_s7 + $0x430] sm:$0xff] }
 0x460   :  { %2028 = vmatpush.msrb.mxu2 %v2777_v39  ;;  %v2071_v39 = vld [vmem:[%s5258_s9 + $0xc8] sm:$0xff] }
 0x461   :  { %1837 = vmatpush.msra.mxu3 %v2725_v42  ;;  %v2776_v42 = vld [vmem:[%s5255_s7 + $0x428] sm:$0xff] }
 0x462   :  { %2029 = vmatpush.msrb.mxu2 %v2776_v42  ;;  %v2073_v42 = vld [vmem:[%s5258_s9 + $0xd8] sm:$0xff] }
 0x463   :  { %1838 = vmatpush.msra.mxu3 %v2724_v45  ;;  %v2775_v45 = vld [vmem:[%s5255_s7 + $0x420] sm:$0xff] }
 0x464   :  { %2030 = vmatpush.msrb.mxu2 %v2775_v45  ;;  %v2067_v45 = vld [vmem:[%s5258_s9 + $0xa8] sm:$0xff] }
 0x465   :  { %1839 = vmatpush.msra.mxu3 %v2723_v48  ;;  %v2758_v48 = vld [vmem:[%s5255_s7 + $0x3a8] sm:$0xff] }
 0x467   :  { %1840 = vmatpush.msra.mxu3 %v2722_v52  ;;  %v2774_v52 = vld [vmem:[%s5255_s7 + $0x418] sm:$0xff] }
 0x468   :  { %2031 = vmatpush.msrb.mxu2 %v2774_v52  ;;  %v2062_v52 = vld [vmem:[%s5258_s9 + $0x80] sm:$0xff] }
 0x469   :  { %1841 = vmatpush.msra.mxu3 %v2721_v54  ;;  %v2757_v54 = vld [vmem:[%s5255_s7 + $0x3a0] sm:$0xff] }
 0x46b   :  { %1842 = vmatpush.msra.mxu3 %v2720_v55  ;;  %v2773_v55 = vld [vmem:[%s5255_s7 + $0x410] sm:$0xff] }
 0x46c   :  { %2032 = vmatpush.msrb.mxu2 %v2773_v55  ;;  %v2064_v55 = vld [vmem:[%s5258_s9 + $0x90] sm:$0xff] }
 0x46d   :  { %1843 = vmatpush.msra.mxu3 %v2719_v57  ;;  %v2756_v57 = vld [vmem:[%s5255_s7 + $0x398] sm:$0xff] }
 0x46f   :  { %1844 = vmatpush.msra.mxu3 %v2718_v58  ;;  %v2772_v58 = vld [vmem:[%s5255_s7 + $0x408] sm:$0xff] }
 0x470   :  { %2033 = vmatpush.msrb.mxu2 %v2772_v58  ;;  %v2058_v58 = vld [vmem:[%s5258_s9 + $0x60] sm:$0xff] }
 0x471   :  { %1845 = vmatpush.msra.mxu3 %v2717_v60  ;;  %v2755_v60 = vld [vmem:[%s5255_s7 + $0x390] sm:$0xff] }
 0x472   :  { %2034 = vmatpush.msrb.mxu2 %v2771_v61  ;;  %v2060_v61 = vld [vmem:[%s5258_s9 + $0x70] sm:$0xff] }
 0x473   :  { %1932 = vmatpush.msrb.mxu3 %v4394_v32  ;;  %v2704_v32 = vld [vmem:[%s5255_s7 + $0x228] sm:$0xff] }
 0x474   :  { %1777 = vmatpush.msrb.mxu0 %v2704_v32 }
 0x475   :  { %1933 = vmatpush.msrb.mxu3 %v4396_v33  ;;  %v2703_v33 = vld [vmem:[%s5255_s7 + $0x220] sm:$0xff] }
 0x476   :  { %1778 = vmatpush.msrb.mxu0 %v2703_v33 }
 0x477   :  { %1934 = vmatpush.msrb.mxu3 %v4401_v5  ;;  %v2702_v5 = vld [vmem:[%s5255_s7 + $0x218] sm:$0xff] }
 0x478   :  { %1779 = vmatpush.msrb.mxu0 %v2702_v5 }
 0x47a   :  { %1780 = vmatpush.msrb.mxu0 %v2701_v10 }
 0x47c   :  { %1781 = vmatpush.msrb.mxu0 %v2700_v8 }
 0x47e   :  { %1782 = vmatpush.msrb.mxu0 %v2699_v13 }
 0x480   :  { %1956 = vmatpush.msra.mxu0 %v2768_v59  ;;  %v2091_v59 = vld [vmem:[%s5258_s9 + $0x168] sm:$0xff] }
 0x482   :  { %1957 = vmatpush.msra.mxu0 %v2767_v24  ;;  %v2086_v24 = vld [vmem:[%s5258_s9 + $0x140] sm:$0xff] }
 0x484   :  { %1958 = vmatpush.msra.mxu0 %v2766_v25  ;;  %v2089_v25 = vld [vmem:[%s5258_s9 + $0x158] sm:$0xff] }
 0x486   :  { %1959 = vmatpush.msra.mxu0 %v2765_v15  ;;  %v2084_v15 = vld [vmem:[%s5258_s9 + $0x130] sm:$0xff] }
 0x488   :  { %1960 = vmatpush.msra.mxu0 %v2764_v29  ;;  %v2079_v29 = vld [vmem:[%s5258_s9 + $0x108] sm:$0xff] }
 0x48a   :  { %1961 = vmatpush.msra.mxu0 %v2763_v7  ;;  %v2081_v7 = vld [vmem:[%s5258_s9 + $0x118] sm:$0xff] }
 0x48c   :  { %1962 = vmatpush.msra.mxu0 %v2762_v36  ;;  %v2076_v36 = vld [vmem:[%s5258_s9 + $0xf0] sm:$0xff] }
 0x48e   :  { %1963 = vmatpush.msra.mxu0 %v2761_v37  ;;  %v2070_v37 = vld [vmem:[%s5258_s9 + $0xc0] sm:$0xff] }
 0x490   :  { %1964 = vmatpush.msra.mxu0 %v2760_v40  ;;  %v2072_v40 = vld [vmem:[%s5258_s9 + $0xd0] sm:$0xff] }
 0x492   :  { %1965 = vmatpush.msra.mxu0 %v2759_v43  ;;  %v2066_v43 = vld [vmem:[%s5258_s9 + $0xa0] sm:$0xff] }
 0x494   :  { %1966 = vmatpush.msra.mxu0 %v2758_v48  ;;  %v2069_v48 = vld [vmem:[%s5258_s9 + $0xb8] sm:$0xff] }
 0x496   :  { %1967 = vmatpush.msra.mxu0 %v2757_v54  ;;  %v2063_v54 = vld [vmem:[%s5258_s9 + $0x88] sm:$0xff] }
 0x498   :  { %1968 = vmatpush.msra.mxu0 %v2756_v57  ;;  %v2065_v57 = vld [vmem:[%s5258_s9 + $0x98] sm:$0xff] }
 0x49a   :  { %1969 = vmatpush.msra.mxu0 %v2755_v60  ;;  %v2059_v60 = vld [vmem:[%s5258_s9 + $0x68] sm:$0xff] }
 0x49c   :  { %1970 = vmatpush.msra.mxu0 %v2754_v27  ;;  %v2054_v27 = vld [vmem:[%s5258_s9 + $0x40] sm:$0xff] }
 0x49e   :  { %1971 = vmatpush.msra.mxu0 %v2753_v63  ;;  %v2055_v63 = vld [vmem:[%s5258_s9 + $0x48] sm:$0xff] }
 0x4c5   :  { %v4695_v11 = vpop.f32.mrf.mxu3 }
 0x4c6   :  { %v1576_v35 = vpop.f32.mrf.mxu2 }
 0x4c7   :  { %v1597_v32 = vadd.f32 %v4695_v11, %v1576_v35  ;;  %v2107_v11 = vld [vmem:[%s5258_s9 + $0x1e8] sm:$0xff] }
 0x4c8   :  { %v2075_v35 = vld [vmem:[%s5258_s9 + $0xe8] sm:$0xff] }
 0x4cd   :  { %v1621_v38 = vpop.f32.mrf.mxu3 }
 0x4ce   :  { %1657 = vmatmul.f32.vlgmr.msra.gmra.mxu1 %v1621_v38  ;;  %v1721_v46 = vpop.f32.mrf.mxu2  ;;  %v2106_v38 = vld [vmem:[%s5258_s9 + $0x1e0] sm:$0xff] }
 0x4cf   :  { %1893 = vmatpush.msra.mxu1 %v2750_v9 }
 0x4d1   :  { %1894 = vmatpush.msra.mxu1 %v2749_v17  ;;  %v2108_v17 = vld [vmem:[%s5258_s9 + $0x1f0] sm:$0xff] }
 0x4d3   :  { %1895 = vmatpush.msra.mxu1 %v2748_v2  ;;  %v2109_v2 = vld [vmem:[%s5258_s9 + $0x1f8] sm:$0xff] }
 0x4d4   :  { %2180 = vmatpush.msra.mxu2 %v2109_v2  ;;  %v2234_v2 = vld [vmem:[%s5259_s11 + $0xf0] sm:$0xff] }
 0x4d5   :  { %v1747_v1 = vpop.f32.mrf.mxu3  ;;  %1896 = vmatpush.msra.mxu1 %v2747_v44  ;;  %v2102_v44 = vld [vmem:[%s5258_s9 + $0x1c0] sm:$0xff] }
 0x4d6   :  { %1783 = vmatmul.f32.vlgmr.msrb.gmra.mxu0 %v1747_v1  ;;  %2734 = vmatmul.msk.f32.vlgmr.msrb.gmra.mxu1 %vm1477_vm0, %v2733_v47  ;;  %v1999_v30 = vpop.f32.mrf.mxu2  ;;  %v2103_v47 = vld [vmem:[%s5258_s9 + $0x1c8] sm:$0xff]  ;;  %v2105_v1 = vld [vmem:[%s5258_s9 + $0x1d8] sm:$0xff] }
 0x4d7   :  { %1897 = vmatpush.msra.mxu1 %v2746_v0  ;;  %2035 = vmatmul.f32.vlgmr.msrb.gmra.mxu2 %v1999_v30  ;;  %v2104_v0 = vld [vmem:[%s5258_s9 + $0x1d0] sm:$0xff]  ;;  %v2061_v30 = vld [vmem:[%s5258_s9 + $0x78] sm:$0xff] }
 0x4d8   :  { %2160 = vmatpush.msrb.mxu0 %v2108_v17  ;;  %2181 = vmatpush.msra.mxu2 %v2105_v1  ;;  %v2251_v17 = vld [vmem:[%s5259_s11 + $0x178] sm:$0xff]  ;;  %v2249_v1 = vld [vmem:[%s5259_s11 + $0x168] sm:$0xff] }
 0x4d9   :  { %1898 = vmatpush.msra.mxu1 %v2745_v50  ;;  %v2098_v50 = vld [vmem:[%s5258_s9 + $0x1a0] sm:$0xff] }
 0x4da   :  { %2161 = vmatpush.msrb.mxu0 %v2104_v0  ;;  %v2219_v0 = vld [vmem:[%s5259_s11 + $0x78] sm:$0xff] }
 0x4db   :  { %1899 = vmatpush.msra.mxu1 %v2744_v18  ;;  %v2099_v18 = vld [vmem:[%s5258_s9 + $0x1a8] sm:$0xff] }
 0x4dd   :  { %v1810_v20 = vpop.f32.mrf.mxu3  ;;  %1900 = vmatpush.msra.mxu1 %v2743_v19  ;;  %v2100_v19 = vld [vmem:[%s5258_s9 + $0x1b0] sm:$0xff] }
 0x4de   :  { %1846 = vmatmul.f32.vlgmr.msra.gmra.mxu3 %v1810_v20  ;;  %v2094_v20 = vld [vmem:[%s5258_s9 + $0x180] sm:$0xff]  ;;  %2162 = vmatpush.msrb.mxu0 %v2100_v19  ;;  %v2266_v19 = vld [vmem:[%s5259_s11 + $0x1f0] sm:$0xff] }
 0x4df   :  { %1901 = vmatpush.msra.mxu1 %v2742_v53  ;;  %2120 = vmatpush.msra.mxu3 %v2106_v38  ;;  %v2101_v53 = vld [vmem:[%s5258_s9 + $0x1b8] sm:$0xff] }
 0x4e0   :  { %2182 = vmatpush.msra.mxu2 %v2101_v53  ;;  %v2049_v38 = vld [vmem:[%s5258_s9 + $0x18] sm:$0xff]  ;;  %v2217_v53 = vld [vmem:[%s5259_s11 + $0x68] sm:$0xff] }
 0x4e1   :  { %1902 = vmatpush.msra.mxu1 %v2741_v21  ;;  %2121 = vmatpush.msra.mxu3 %v2102_v44  ;;  %v2095_v21 = vld [vmem:[%s5258_s9 + $0x188] sm:$0xff]  ;;  %v2250_v44 = vld [vmem:[%s5259_s11 + $0x170] sm:$0xff] }
 0x4e3   :  { %1903 = vmatpush.msra.mxu1 %v2740_v49  ;;  %2122 = vmatpush.msra.mxu3 %v2098_v50  ;;  %v2096_v49 = vld [vmem:[%s5258_s9 + $0x190] sm:$0xff]  ;;  %v2267_v50 = vld [vmem:[%s5259_s11 + $0x1f8] sm:$0xff] }
 0x4e4   :  { %2163 = vmatpush.msrb.mxu0 %v2096_v49  ;;  %v2265_v49 = vld [vmem:[%s5259_s11 + $0x1e8] sm:$0xff] }
 0x4e5   :  { %1904 = vmatpush.msra.mxu1 %v2739_v56  ;;  %v2090_v56 = vld [vmem:[%s5258_s9 + $0x160] sm:$0xff]  ;;  %2123 = vmatpush.msra.mxu3 %v2094_v20 }
 0x4e6   :  { %2752 = vmatmul.msk.f32.vlgmr.msrb.gmra.mxu3 %vm1477_vm0, %v2751_v51  ;;  %v2097_v51 = vld [vmem:[%s5258_s9 + $0x198] sm:$0xff]  ;;  %2164 = vmatpush.msrb.mxu0 %v2092_v22  ;;  %v2232_v20 = vld [vmem:[%s5259_s11 + $0xe0] sm:$0xff] }
 0x4e7   :  { %1905 = vmatpush.msra.mxu1 %v2738_v23  ;;  %v2093_v23 = vld [vmem:[%s5258_s9 + $0x178] sm:$0xff]  ;;  %2183 = vmatpush.msra.mxu2 %v2097_v51  ;;  %v2216_v51 = vld [vmem:[%s5259_s11 + $0x60] sm:$0xff] }
 0x4e8   :  { %2124 = vmatpush.msra.mxu3 %v2090_v56  ;;  %v2231_v56 = vld [vmem:[%s5259_s11 + $0xd8] sm:$0xff]  ;;  %v2264_v22 = vld [vmem:[%s5259_s11 + $0x1e0] sm:$0xff] }
 0x4e9   :  { %1906 = vmatpush.msra.mxu1 %v2737_v62  ;;  %v2088_v62 = vld [vmem:[%s5258_s9 + $0x150] sm:$0xff]  ;;  %2184 = vmatpush.msra.mxu2 %v2093_v23  ;;  %v2215_v23 = vld [vmem:[%s5259_s11 + $0x58] sm:$0xff] }
 0x4ea   :  { %2125 = vmatpush.msra.mxu3 %v2086_v24  ;;  %2165 = vmatpush.msrb.mxu0 %v2088_v62  ;;  %v2230_v24 = vld [vmem:[%s5259_s11 + $0xd0] sm:$0xff]  ;;  %v2263_v62 = vld [vmem:[%s5259_s11 + $0x1d8] sm:$0xff] }
 0x4eb   :  { %1907 = vmatpush.msra.mxu1 %v2736_v14  ;;  %v2083_v14 = vld [vmem:[%s5258_s9 + $0x128] sm:$0xff]  ;;  %2185 = vmatpush.msra.mxu2 %v2089_v25  ;;  %v2214_v25 = vld [vmem:[%s5259_s11 + $0x50] sm:$0xff] }
 0x4ec   :  { %2126 = vmatpush.msra.mxu3 %v2082_v26  ;;  %2166 = vmatpush.msrb.mxu0 %v2084_v15  ;;  %v2229_v26 = vld [vmem:[%s5259_s11 + $0xc8] sm:$0xff]  ;;  %v2262_v15 = vld [vmem:[%s5259_s11 + $0x1d0] sm:$0xff] }
 0x4ed   :  { %1908 = vmatpush.msra.mxu1 %v2735_v16  ;;  %v2078_v16 = vld [vmem:[%s5258_s9 + $0x100] sm:$0xff]  ;;  %2186 = vmatpush.msra.mxu2 %v2085_v28  ;;  %v2213_v28 = vld [vmem:[%s5259_s11 + $0x48] sm:$0xff] }
 0x4ee   :  { %2127 = vmatpush.msra.mxu3 %v2078_v16  ;;  %2167 = vmatpush.msrb.mxu0 %v2080_v31  ;;  %v2228_v16 = vld [vmem:[%s5259_s11 + $0xc0] sm:$0xff]  ;;  %v2261_v31 = vld [vmem:[%s5259_s11 + $0x1c8] sm:$0xff] }
 0x4ef   :  { %2140 = vmatpush.msrb.mxu1 %v2107_v11  ;;  %2187 = vmatpush.msra.mxu2 %v2081_v7  ;;  %v2235_v11 = vld [vmem:[%s5259_s11 + $0xf8] sm:$0xff]  ;;  %v2212_v7 = vld [vmem:[%s5259_s11 + $0x40] sm:$0xff] }
 0x4f0   :  { %2128 = vmatpush.msra.mxu3 %v2074_v34  ;;  %2168 = vmatpush.msrb.mxu0 %v2076_v36  ;;  %v2227_v34 = vld [vmem:[%s5259_s11 + $0xb8] sm:$0xff]  ;;  %v2260_v36 = vld [vmem:[%s5259_s11 + $0x1c0] sm:$0xff] }
 0x4f1   :  { %2141 = vmatpush.msrb.mxu1 %v2103_v47  ;;  %2188 = vmatpush.msra.mxu2 %v2077_v3  ;;  %v2233_v47 = vld [vmem:[%s5259_s11 + $0xe8] sm:$0xff]  ;;  %v2211_v3 = vld [vmem:[%s5259_s11 + $0x38] sm:$0xff] }
 0x4f2   :  { %2129 = vmatpush.msra.mxu3 %v2070_v37  ;;  %2169 = vmatpush.msrb.mxu0 %v2072_v40  ;;  %v2226_v37 = vld [vmem:[%s5259_s11 + $0xb0] sm:$0xff] }
 0x4f3   :  { %2142 = vmatpush.msrb.mxu1 %v2099_v18  ;;  %2189 = vmatpush.msra.mxu2 %v2073_v42  ;;  %v2218_v18 = vld [vmem:[%s5259_s11 + $0x70] sm:$0xff]  ;;  %v2259_v42 = vld [vmem:[%s5259_s11 + $0x1b8] sm:$0xff] }
 0x4f4   :  { %2130 = vmatpush.msra.mxu3 %v2066_v43  ;;  %v2210_v43 = vld [vmem:[%s5259_s11 + $0x30] sm:$0xff] }
 0x4f5   :  { %2143 = vmatpush.msrb.mxu1 %v2095_v21  ;;  %2190 = vmatpush.msra.mxu2 %v2069_v48  ;;  %v2248_v21 = vld [vmem:[%s5259_s11 + $0x160] sm:$0xff]  ;;  %v2258_v48 = vld [vmem:[%s5259_s11 + $0x1b0] sm:$0xff] }
 0x4f6   :  { %2131 = vmatpush.msra.mxu3 %v2062_v52 }
 0x4f7   :  { %2144 = vmatpush.msrb.mxu1 %v2091_v59  ;;  %2191 = vmatpush.msra.mxu2 %v2065_v57  ;;  %v2247_v59 = vld [vmem:[%s5259_s11 + $0x158] sm:$0xff] }
 0x4f8   :  { %2132 = vmatpush.msra.mxu3 %v2058_v58 }
 0x4f9   :  { %2145 = vmatpush.msrb.mxu1 %v2087_v12  ;;  %2192 = vmatpush.msra.mxu2 %v2061_v30  ;;  %v2246_v12 = vld [vmem:[%s5259_s11 + $0x150] sm:$0xff]  ;;  %v2239_v30 = vld [vmem:[%s5259_s11 + $0x118] sm:$0xff] }
 0x4fa   :  { %2133 = vmatpush.msra.mxu3 %v2054_v27 }
 0x4fb   :  { %2146 = vmatpush.msrb.mxu1 %v2083_v14  ;;  %v2245_v14 = vld [vmem:[%s5259_s11 + $0x148] sm:$0xff] }
 0x4fd   :  { %2147 = vmatpush.msrb.mxu1 %v2079_v29  ;;  %v2244_v29 = vld [vmem:[%s5259_s11 + $0x140] sm:$0xff] }
 0x4ff   :  { %2148 = vmatpush.msrb.mxu1 %v2075_v35  ;;  %v2243_v35 = vld [vmem:[%s5259_s11 + $0x138] sm:$0xff] }
 0x501   :  { %2149 = vmatpush.msrb.mxu1 %v2071_v39  ;;  %v2242_v39 = vld [vmem:[%s5259_s11 + $0x130] sm:$0xff] }
 0x503   :  { %2150 = vmatpush.msrb.mxu1 %v2067_v45  ;;  %v2225_v45 = vld [vmem:[%s5259_s11 + $0xa8] sm:$0xff] }
 0x505   :  { %2151 = vmatpush.msrb.mxu1 %v2063_v54  ;;  %v2224_v54 = vld [vmem:[%s5259_s11 + $0xa0] sm:$0xff] }
 0x507   :  { %2152 = vmatpush.msrb.mxu1 %v2059_v60 }
 0x509   :  { %2153 = vmatpush.msrb.mxu1 %v2055_v63 }
 0x54b   :  { %v1658_v33 = vpop.f32.mrf.mxu1 }
 0x54c   :  { %v1661_v5 = vadd.f32 %v1658_v33, %v1597_v32  ;;  %v2056_v32 = vld [vmem:[%s5258_s9 + $0x50] sm:$0xff]  ;;  %v2057_v33 = vld [vmem:[%s5258_s9 + $0x58] sm:$0xff] }
 0x54d   :  { %2193 = vmatpush.msra.mxu2 %v2057_v33  ;;  %v2209_v33 = vld [vmem:[%s5259_s11 + $0x28] sm:$0xff] }
 0x54e   :  { %v1724_v10 = vadd.f32 %v1721_v46, %v1661_v5  ;;  %v2068_v46 = vld [vmem:[%s5258_s9 + $0xb0] sm:$0xff]  ;;  %v2050_v5 = vld [vmem:[%s5258_s9 + $0x20] sm:$0xff] }
 0x54f   :  { %2170 = vmatpush.msrb.mxu0 %v2068_v46  ;;  %2134 = vmatpush.msra.mxu3 %v2050_v5  ;;  %v2241_v46 = vld [vmem:[%s5259_s11 + $0x128] sm:$0xff]  ;;  %v2222_v5 = vld [vmem:[%s5259_s11 + $0x90] sm:$0xff] }
 0x551   :  { %2171 = vmatpush.msrb.mxu0 %v2064_v55  ;;  %v2240_v55 = vld [vmem:[%s5259_s11 + $0x120] sm:$0xff] }
 0x553   :  { %v1873_v8 = vpop.f32.mrf.mxu1  ;;  %v1784_v13 = vpop.f32.mrf.mxu0  ;;  %2172 = vmatpush.msrb.mxu0 %v2060_v61  ;;  %v2789_v61 = vld [vmem:[%s5257_s8] ss:$0 sm:$0xff] }
 0x554   :  { %1909 = vmatmul.f32.vlgmr.msra.gmra.mxu1 %v1873_v8  ;;  %v1787_v6 = vadd.f32 %v1784_v13, %v1724_v10  ;;  %v2051_v10 = vld [vmem:[%s5258_s9 + $0x28] sm:$0xff]  ;;  %v2052_v8 = vld [vmem:[%s5258_s9 + $0x30] sm:$0xff]  ;;  %v2053_v13 = vld [vmem:[%s5258_s9 + $0x38] sm:$0xff] }
 0x555   :  { %2173 = vmatpush.msrb.mxu0 %v2056_v32  ;;  %2154 = vmatpush.msrb.mxu1 %v2051_v10  ;;  %v2238_v10 = vld [vmem:[%s5259_s11 + $0x110] sm:$0xff] }
 0x556   :  { %2194 = vmatpush.msra.mxu2 %v2053_v13  ;;  %v2208_v13 = vld [vmem:[%s5259_s11 + $0x20] sm:$0xff] }
 0x557   :  { %2174 = vmatpush.msrb.mxu0 %v2052_v8  ;;  %v2257_v8 = vld [vmem:[%s5259_s11 + $0x1a8] sm:$0xff] }
 0x558   :  { %2195 = vmatpush.msra.mxu2 %v2049_v38  ;;  %v2207_v38 = vld [vmem:[%s5259_s11 + $0x18] sm:$0xff] }
 0x55a   :  { %2332 = vmatpush.msrb.mxu2 %v2267_v50  ;;  %v2036_v58 = vpop.f32.mrf.mxu2  ;;  %v2204_v50 = vld [vmem:[%s5259_s11] sm:$0xff] }
 0x55c   :  { %2333 = vmatpush.msrb.mxu2 %v2266_v19  ;;  %v2110_v19 = vld [vmem:[%s5260_s10] sm:$0xf] }
 0x55e   :  { %2334 = vmatpush.msrb.mxu2 %v2265_v49 }
 0x560   :  { %2335 = vmatpush.msrb.mxu2 %v2264_v22  ;;  %v2112_v22 = vperm.slane %v2110_v19, 0 }
 0x561   :  { %v1847_v4 = vpop.f32.mrf.mxu3 }
 0x562   :  { %v4850_v41 = vadd.f32 %v1847_v4, %v1787_v6  ;;  %v2046_v6 = vld [vmem:[%s5258_s9] sm:$0xff]  ;;  %v2047_v4 = vld [vmem:[%s5258_s9 + $0x8] sm:$0xff]  ;;  %2336 = vmatpush.msrb.mxu2 %v2263_v62 }
 0x563   :  { %2135 = vmatpush.msra.mxu3 %v2046_v6  ;;  %2155 = vmatpush.msrb.mxu1 %v2047_v4  ;;  %v2221_v6 = vld [vmem:[%s5259_s11 + $0x88] sm:$0xff] }
 0x564   :  { %2337 = vmatpush.msrb.mxu2 %v2262_v15  ;;  %v2237_v4 = vld [vmem:[%s5259_s11 + $0x108] sm:$0xff] }
 0x565   :  { %2292 = vmatpush.msra.mxu1 %v2235_v11  ;;  %2272 = vmatpush.msrb.mxu3 %v2219_v0  ;;  %v2220_v11 = vld [vmem:[%s5259_s11 + $0x80] sm:$0xff]  ;;  %v2205_v0 = vld [vmem:[%s5259_s11 + $0x8] sm:$0xff] }
 0x566   :  { %2338 = vmatpush.msrb.mxu2 %v2261_v31 }
 0x567   :  { %2293 = vmatpush.msra.mxu1 %v2234_v2  ;;  %2273 = vmatpush.msrb.mxu3 %v2218_v18  ;;  %v2255_v2 = vld [vmem:[%s5259_s11 + $0x198] sm:$0xff]  ;;  %v2252_v18 = vld [vmem:[%s5259_s11 + $0x180] sm:$0xff] }
 0x568   :  { %2339 = vmatpush.msrb.mxu2 %v2260_v36 }
 0x569   :  { %v1936_v9 = vpop.f32.mrf.mxu3  ;;  %2294 = vmatpush.msra.mxu1 %v2233_v47  ;;  %2274 = vmatpush.msrb.mxu3 %v2217_v53  ;;  %v2254_v47 = vld [vmem:[%s5259_s11 + $0x190] sm:$0xff]  ;;  %v2113_v53 = vperm.slane %v2110_v19, 1 }
 0x56a   :  { %1972 = vmatmul.f32.vlgmr.msra.gmra.mxu0 %v1936_v9  ;;  %v2048_v9 = vld [vmem:[%s5258_s9 + $0x10] sm:$0xff]  ;;  %2340 = vmatpush.msrb.mxu2 %v2259_v42 }
 0x56b   :  { %2175 = vmatpush.msrb.mxu0 %v2048_v9  ;;  %2295 = vmatpush.msra.mxu1 %v2232_v20  ;;  %v2256_v9 = vld [vmem:[%s5259_s11 + $0x1a0] sm:$0xff]  ;;  %v2114_v20 = vperm.slane %v2110_v19, 2 }
 0x56c   :  { %2275 = vmatpush.msrb.mxu3 %v2216_v51  ;;  %2341 = vmatpush.msrb.mxu2 %v2258_v48 }
 0x56d   :  { %2312 = vmatpush.msra.mxu0 %v2251_v17  ;;  %2296 = vmatpush.msra.mxu1 %v2231_v56  ;;  %v2236_v17 = vld [vmem:[%s5259_s11 + $0x100] sm:$0xff] }
 0x56e   :  { %2276 = vmatpush.msrb.mxu3 %v2215_v23  ;;  %2342 = vmatpush.msrb.mxu2 %v2257_v8 }
 0x56f   :  { %2313 = vmatpush.msra.mxu0 %v2250_v44  ;;  %2297 = vmatpush.msra.mxu1 %v2230_v24  ;;  %v2206_v44 = vld [vmem:[%s5259_s11 + $0x10] sm:$0xff]  ;;  %v2115_v24 = vperm.slane %v2110_v19, 3 }
 0x570   :  { %2277 = vmatpush.msrb.mxu3 %v2214_v25  ;;  %2343 = vmatpush.msrb.mxu2 %v2256_v9 }
 0x571   :  { %2314 = vmatpush.msra.mxu0 %v2249_v1  ;;  %2298 = vmatpush.msra.mxu1 %v2229_v26  ;;  %v2253_v1 = vld [vmem:[%s5259_s11 + $0x188] sm:$0xff] }
 0x572   :  { %2278 = vmatpush.msrb.mxu3 %v2213_v28  ;;  %2344 = vmatpush.msrb.mxu2 %v2255_v2  ;;  %v2790_v28 = vld [vmem:[%s5261_s12] ss:$0 sm:$0xff] }
 0x573   :  { %2315 = vmatpush.msra.mxu0 %v2248_v21  ;;  %2299 = vmatpush.msra.mxu1 %v2228_v16 }
 0x574   :  { %2279 = vmatpush.msrb.mxu3 %v2212_v7  ;;  %2345 = vmatpush.msrb.mxu2 %v2254_v47 }
 0x575   :  { %2316 = vmatpush.msra.mxu0 %v2247_v59  ;;  %2300 = vmatpush.msra.mxu1 %v2227_v34 }
 0x576   :  { %2280 = vmatpush.msrb.mxu3 %v2211_v3  ;;  %2346 = vmatpush.msrb.mxu2 %v2253_v1 }
 0x577   :  { %2317 = vmatpush.msra.mxu0 %v2246_v12  ;;  %2301 = vmatpush.msra.mxu1 %v2226_v37 }
 0x578   :  { %2281 = vmatpush.msrb.mxu3 %v2210_v43  ;;  %2347 = vmatpush.msrb.mxu2 %v2252_v18 }
 0x579   :  { %2318 = vmatpush.msra.mxu0 %v2245_v14  ;;  %2302 = vmatpush.msra.mxu1 %v2225_v45 }
 0x57a   :  { %2282 = vmatpush.msrb.mxu3 %v2209_v33 }
 0x57b   :  { %2319 = vmatpush.msra.mxu0 %v2244_v29  ;;  %2303 = vmatpush.msra.mxu1 %v2224_v54 }
 0x57c   :  { %2283 = vmatpush.msrb.mxu3 %v2208_v13 }
 0x57d   :  { %2320 = vmatpush.msra.mxu0 %v2243_v35 }
 0x57e   :  { %2284 = vmatpush.msrb.mxu3 %v2207_v38 }
 0x57f   :  { %2321 = vmatpush.msra.mxu0 %v2242_v39 }
 0x580   :  { %2285 = vmatpush.msrb.mxu3 %v2206_v44 }
 0x581   :  { %2322 = vmatpush.msra.mxu0 %v2241_v46 }
 0x582   :  { %2286 = vmatpush.msrb.mxu3 %v2205_v0 }
 0x583   :  { %2323 = vmatpush.msra.mxu0 %v2240_v55 }
 0x584   :  { %2287 = vmatpush.msrb.mxu3 %v2204_v50 }
 0x585   :  { %2324 = vmatpush.msra.mxu0 %v2239_v30 }
 0x587   :  { %2325 = vmatpush.msra.mxu0 %v2238_v10 }
 0x589   :  { %2326 = vmatpush.msra.mxu0 %v2237_v4 }
 0x58b   :  { %2327 = vmatpush.msra.mxu0 %v2236_v17 }
 0x5d1   :  { %v1910_v40 = vpop.f32.mrf.mxu1 }
 0x5d2   :  { %v1913_v52 = vadd.f32 %v1910_v40, %v4850_v41  ;;  %v2223_v41 = vld [vmem:[%s5259_s11 + $0x98] sm:$0xff] }
 0x5d3   :  { %2304 = vmatpush.msra.mxu1 %v2223_v41 }
 0x5d5   :  { %2305 = vmatpush.msra.mxu1 %v2222_v5 }
 0x5d7   :  { %2306 = vmatpush.msra.mxu1 %v2221_v6 }
 0x5d9   :  { %2307 = vmatpush.msra.mxu1 %v2220_v11 }
 0x5e7   :  { %v1973_v57 = vpop.f32.mrf.mxu0 }
 0x5e8   :  { %v1976_v60 = vadd.f32 %v1973_v57, %v1913_v52 }
 0x5ea   :  { %v2039_v27 = vadd.f32 %v2036_v58, %v1976_v60 }
 0x5ec   :  { %v2044_v63 = vadd.f32 %v2789_v61, %v2039_v27 }
 0x5ee   :  { %v2045_v32 = vmax.f32 %v2044_v63, 0.0 }
 0x5f0   :  { %2136 = vmatmul.f32.vlgmr.msra.gmra.mxu3 %v2045_v32  ;;  %2156 = vmatmul.f32.vlgmr.msrb.gmra.mxu1 %v2045_v32 }
 0x5f1   :  { %2176 = vmatmul.f32.vlgmr.msrb.gmra.mxu0 %v2045_v32  ;;  %2196 = vmatmul.f32.vlgmr.msra.gmra.mxu2 %v2045_v32 }
 0x66d   :  { %v2157_v21 = vpop.f32.mrf.mxu1 }
 0x66e   :  { %v2158_v49 = vadd.f32 %v2157_v21, %v2113_v53  ;;  %v2177_v51 = vpop.f32.mrf.mxu0 }
 0x66f   :  { %v2178_v56 = vadd.f32 %v2177_v51, %v2114_v20 }
 0x670   :  { %v2201_v59 = vmax.f32 %v2158_v49, 0.0 }
 0x671   :  { %v2202_v23 = vmax.f32 %v2178_v56, 0.0 }
 0x672   :  { %2308 = vmatmul.f32.vlgmr.msra.gmra.mxu1 %v2201_v59 }
 0x673   :  { %2328 = vmatmul.f32.vlgmr.msra.gmra.mxu0 %v2202_v23  ;;  %v2137_v12 = vpop.f32.mrf.mxu3 }
 0x674   :  { %v2138_v62 = vadd.f32 %v2137_v12, %v2112_v22  ;;  %v2197_v25 = vpop.f32.mrf.mxu2 }
 0x675   :  { %v2198_v26 = vadd.f32 %v2197_v25, %v2115_v24 }
 0x676   :  { %v2200_v14 = vmax.f32 %v2138_v62, 0.0 }
 0x677   :  { %v2203_v15 = vmax.f32 %v2198_v26, 0.0 }
 0x678   :  { %2288 = vmatmul.f32.vlgmr.msrb.gmra.mxu3 %v2200_v14 }
 0x679   :  { %2348 = vmatmul.f32.vlgmr.msrb.gmra.mxu2 %v2203_v15 }
 0x6ef   :  { %v2309_v31 = vpop.f32.mrf.mxu1 }
 0x6f0   :  { %v2329_v34 = vpop.f32.mrf.mxu0 }
 0x6fb   :  { %v2289_v16 = vpop.f32.mrf.mxu3 }
 0x6fc   :  { %v2290_v29 = vadd.f32 %v2790_v28, %v2289_v16  ;;  %v2349_v36 = vpop.f32.mrf.mxu2 }
 0x6fe   :  { %v2310_v7 = vadd.f32 %v2309_v31, %v2290_v29 }
 0x700   :  { %v2330_v35 = vadd.f32 %v2329_v34, %v2310_v7 }
 0x702   :  { %v2350_v3 = vadd.f32 %v2349_v36, %v2330_v35 }
 0x704   :  { %2352 = vst [vmem:[%s5262_s13] sm:$0xff] %v2350_v3 }

</bundles_post_ra>
